<compile_context>
chip_gen: v5e
topology: v5e:2x2
jax: 0.10.0
libtpu: 0.0.40
codegen_flags: <defaults>
</compile_context>

<pallas_src>
import jax
import jax.numpy as jnp
from jax.experimental import pallas as pl
from jax.experimental.pallas import tpu as pltpu


# ----------------------------- Pallas kernels ------------------------------ #

def _conv1_kernel(x_ref, w_ref, b_ref, o_ref):
    # Per-image width-Toeplitz GEMM: (26,84) @ (84,832) -> (26,832), +bias, ReLU.
    acc = jnp.dot(x_ref[0], w_ref[...], preferred_element_type=jnp.float32)
    acc = jnp.maximum(acc + b_ref[...], 0.0)
    o_ref[0] = acc.astype(o_ref.dtype)


def conv1_pallas(x3, w_toeplitz, b_tiled):
    N = x3.shape[0]
    return pl.pallas_call(
        _conv1_kernel,
        out_shape=jax.ShapeDtypeStruct((N, 26, 26 * 32), jnp.bfloat16),
        grid=(N,),
        in_specs=[pl.BlockSpec((1, 26, 84), lambda n: (n, 0, 0)),
                  pl.BlockSpec((84, 26 * 32), lambda n: (0, 0)),
                  pl.BlockSpec((1, 26 * 32), lambda n: (0, 0))],
        out_specs=pl.BlockSpec((1, 26, 26 * 32), lambda n: (n, 0, 0)),
        compiler_params=pltpu.CompilerParams(
            dimension_semantics=("parallel",)),
    )(x3, w_toeplitz, b_tiled)


def _conv2_pool_kernel(p_ref, w_ref, b_ref, o_ref):
    # p_ref: (1, 4, 144, 288) — the 4 slices are the 2x2 pooling-window offsets.
    # max over the 4 GEMM results == max-pool2d fused into the conv epilogue
    # (bias add and ReLU commute with the max).
    w = w_ref[...]
    m = jnp.dot(p_ref[0, 0], w, preferred_element_type=jnp.float32)
    for q in range(1, 4):
        m = jnp.maximum(m, jnp.dot(p_ref[0, q], w,
                                   preferred_element_type=jnp.float32))
    m = jnp.maximum(m + b_ref[...], 0.0)
    o_ref[0] = m.astype(o_ref.dtype)


def conv2_pool_pallas(p4, w, b):
    N = p4.shape[0]
    return pl.pallas_call(
        _conv2_pool_kernel,
        out_shape=jax.ShapeDtypeStruct((N, 144, 64), jnp.bfloat16),
        grid=(N,),
        in_specs=[pl.BlockSpec((1, 4, 144, 288), lambda n: (n, 0, 0, 0)),
                  pl.BlockSpec((288, 64), lambda n: (0, 0)),
                  pl.BlockSpec((1, 64), lambda n: (0, 0))],
        out_specs=pl.BlockSpec((1, 144, 64), lambda n: (n, 0, 0)),
        compiler_params=pltpu.CompilerParams(
            dimension_semantics=("parallel",)),
    )(p4, w, b)


def _fc_head_kernel(x_ref, w1_ref, b1_ref, w2_ref, b2_ref, o_ref, acc_ref):
    # fc1 (K-tiled, accumulator resident) + fc2 + log_softmax fused.
    k = pl.program_id(0)

    @pl.when(k == 0)
    def _():
        acc_ref[...] = jnp.zeros_like(acc_ref)

    acc_ref[...] += jnp.dot(x_ref[...], w1_ref[...],
                            preferred_element_type=jnp.float32)

    @pl.when(k == pl.num_programs(0) - 1)
    def _():
        h = jnp.maximum(acc_ref[...] + b1_ref[...], 0.0)          # (M,128) f32
        z = jnp.dot(h.astype(jnp.bfloat16), w2_ref[...],
                    preferred_element_type=jnp.float32) + b2_ref[...]
        m = jnp.max(z, axis=-1, keepdims=True)
        lse = m + jnp.log(jnp.sum(jnp.exp(z - m), axis=-1, keepdims=True))
        o_ref[...] = (z - lse).astype(o_ref.dtype)


def fc_head_pallas(x, w1, b1, w2, b2, *, tk=2304):
    M, K = x.shape
    assert K % tk == 0
    return pl.pallas_call(
        _fc_head_kernel,
        out_shape=jax.ShapeDtypeStruct((M, 10), jnp.float32),
        grid=(K // tk,),
        in_specs=[pl.BlockSpec((M, tk), lambda k: (0, k)),
                  pl.BlockSpec((tk, 128), lambda k: (k, 0)),
                  pl.BlockSpec((1, 128), lambda k: (0, 0)),
                  pl.BlockSpec((128, 10), lambda k: (0, 0)),
                  pl.BlockSpec((1, 10), lambda k: (0, 0))],
        out_specs=pl.BlockSpec((M, 10), lambda k: (0, 0)),
        scratch_shapes=[pltpu.VMEM((M, 128), jnp.float32)],
        compiler_params=pltpu.CompilerParams(
            dimension_semantics=("arbitrary",)),
    )(x, w1, b1, w2, b2)


# -------------------- one-time parameter preparation ----------------------- #

def init_params(key):
    # Deterministic synthetic params, exact PyTorch shapes/init style.
    ks = jax.random.split(key, 8)

    def init(k, shape, fan_in):
        bound = 1.0 / jnp.sqrt(jnp.float32(fan_in))
        return jax.random.uniform(k, shape, jnp.float32, -bound, bound)

    return {
        "conv1_w": init(ks[0], (32, 1, 3, 3), 1 * 9),
        "conv1_b": init(ks[1], (32,), 1 * 9),
        "conv2_w": init(ks[2], (64, 32, 3, 3), 32 * 9),
        "conv2_b": init(ks[3], (64,), 32 * 9),
        "fc1_w": init(ks[4], (128, 9216), 9216),
        "fc1_b": init(ks[5], (128,), 9216),
        "fc2_w": init(ks[6], (10, 128), 128),
        "fc2_b": init(ks[7], (10,), 128),
    }


def prepare_net_params(p):
    """One-time layout permutations + bf16 casts (folds all NCHW<->NHWC fixes)."""
    f32, bf16 = jnp.float32, jnp.bfloat16

    # conv1 -> width-Toeplitz GEMM operand B[(dh*28 + w'), (w*32 + co)]
    #   B[dh, w', w, co] = W1[dh, w'-w, co] if 0 <= w'-w <= 2 else 0
    W1 = jnp.transpose(p["conv1_w"][:, 0], (1, 2, 0))          # (kh,kw,co)=(3,3,32)
    wp = jnp.arange(28)
    wo = jnp.arange(26)
    dw = wp[:, None] - wo[None, :]                              # (28,26)
    mask = (dw >= 0) & (dw <= 2)
    B4 = jnp.where(mask[None, :, :, None], W1[:, jnp.clip(dw, 0, 2), :], 0.0)
    conv1_B = B4.reshape(3 * 28, 26 * 32).astype(bf16)          # (84, 832)
    conv1_b = jnp.tile(p["conv1_b"], 26).reshape(1, 26 * 32).astype(f32)

    # conv2: (Cout,Cin,kh,kw) -> (kh*kw*Cin, Cout), matching patch order (dh,dw,cin)
    conv2_w = jnp.transpose(p["conv2_w"], (2, 3, 1, 0)).reshape(288, 64).astype(bf16)
    conv2_b = p["conv2_b"].reshape(1, 64).astype(f32)

    # fc1: permute columns from torch flatten order (c, hp, wp) to NHWC (hp, wp, c)
    fc1_w = p["fc1_w"].reshape(128, 64, 12, 12).transpose(0, 2, 3, 1).reshape(128, 9216)
    fc1_w = fc1_w.T.astype(bf16)                                # (9216, 128)
    fc1_b = p["fc1_b"].reshape(1, 128).astype(f32)

    fc2_w = p["fc2_w"].T.astype(bf16)                           # (128, 10)
    fc2_b = p["fc2_b"].reshape(1, 10).astype(f32)

    return dict(conv1_B=conv1_B, conv1_b=conv1_b,
                conv2_w=conv2_w, conv2_b=conv2_b,
                fc1_w=fc1_w, fc1_b=fc1_b, fc2_w=fc2_w, fc2_b=fc2_b)


# ------------------------------ forward pass -------------------------------- #

@jax.jit
def net_forward(pp, x):
    # x: (N, 1, 28, 28) float32 NCHW (PyTorch-style input)
    N = x.shape[0]
    x2 = x.reshape(N, 28, 28).astype(jnp.bfloat16)

    # conv1 (1->32, 3x3, valid) + ReLU via width-Toeplitz GEMM.
    # X3[n, h, dh*28 + w'] = x[n, h+dh, w']   (only 3x expansion of a tiny image)
    x3 = jnp.concatenate([x2[:, 0:26, :], x2[:, 1:27, :], x2[:, 2:28, :]], axis=2)
    y1 = conv1_pallas(x3, pp["conv1_B"], pp["conv1_b"])         # (N, 26, 832) bf16
    y1 = y1.reshape(N, 26, 26, 32)                              # NHWC, free reshape

    # conv2 (32->64, 3x3, valid) + ReLU + max_pool2d(2) fused in one kernel.
    # im2col rows are pre-grouped by the 2x2 pooling-window offset (i, j):
    #   p4[n, i*2+j, hp*12+wp, (dh*3+dw)*32 + c] = y1[n, 2hp+i+dh, 2wp+j+dw, c]
    blocks = []
    for i in range(2):
        for j in range(2):
            taps = [y1[:, i + dh: i + dh + 23: 2, j + dw: j + dw + 23: 2, :]
                    for dh in range(3) for dw in range(3)]
            blocks.append(jnp.concatenate(taps, axis=-1).reshape(N, 144, 288))
    p4 = jnp.stack(blocks, axis=1)                              # (N, 4, 144, 288)
    pooled = conv2_pool_pallas(p4, pp["conv2_w"], pp["conv2_b"])  # (N, 144, 64)

    # dropout1 (p=0.25) / dropout2 (p=0.5): identity in eval/inference mode.
    # NHWC flatten (matches the fc1 column permutation done at init) — free.
    flat = pooled.reshape(N, 9216)

    # fc1 + ReLU + fc2 + log_softmax fused, K-tiled over fc1's 9216.
    return fc_head_pallas(flat, pp["fc1_w"], pp["fc1_b"],
                          pp["fc2_w"], pp["fc2_b"])             # (N, 10) f32


# -------------------- pure-JAX reference (for verification) ----------------- #

def _ref_conv_valid(x_nchw, w_oihw, b):
    N, C, H, W = x_nchw.shape
    O, _, kh, kw = w_oihw.shape
    Ho, Wo = H - kh + 1, W - kw + 1
    cols = []
    for dh in range(kh):
        for dw in range(kw):
            cols.append(x_nchw[:, :, dh:dh + Ho, dw:dw + Wo])
    p = jnp.stack(cols, axis=2)                                 # (N,C,kh*kw,Ho,Wo)
    p = p.transpose(0, 3, 4, 1, 2).reshape(N * Ho * Wo, C * kh * kw)
    y = p @ w_oihw.reshape(O, C * kh * kw).T + b
    return y.reshape(N, Ho, Wo, O).transpose(0, 3, 1, 2)        # NCHW


@jax.jit
def reference_forward(params, x):
    # Mirrors the kernel path's bf16 rounding points so the comparison is tight.
    b2f = lambda a: a.astype(jnp.bfloat16).astype(jnp.float32)
    N = x.shape[0]
    y = _ref_conv_valid(b2f(x), b2f(params["conv1_w"]), params["conv1_b"])
    y = b2f(jnp.maximum(y, 0.0))
    y = _ref_conv_valid(y, b2f(params["conv2_w"]), params["conv2_b"])
    y = jnp.maximum(y, 0.0)
    y = y.reshape(N, 64, 12, 2, 12, 2).max(axis=(3, 5))         # max_pool2d(2)
    y = b2f(y)
    flat = y.reshape(N, 9216)                                   # torch (c,h,w) order
    z1 = jnp.maximum(flat @ b2f(params["fc1_w"]).T + params["fc1_b"], 0.0)
    z2 = b2f(z1) @ b2f(params["fc2_w"]).T + params["fc2_b"]
    return jax.nn.log_softmax(z2, axis=1)


# ----------------------------------- main ----------------------------------- #

if __name__ == "__main__":
    key = jax.random.PRNGKey(0)
    pkey, xkey = jax.random.split(key)
    params = init_params(pkey)
    x = jax.random.normal(xkey, (2, 1, 28, 28), jnp.float32)

    prepped = prepare_net_params(params)
    out = jax.block_until_ready(net_forward(prepped, x))

    assert out.shape == (2, 10), out.shape
    assert bool(jnp.all(jnp.isfinite(out)))
    # log_softmax rows must exponentiate-sum to ~1
    assert bool(jnp.allclose(jnp.sum(jnp.exp(out), axis=1), 1.0, atol=1e-4))

    ref = jax.block_until_ready(reference_forward(params, x))
    max_diff = float(jnp.max(jnp.abs(out - ref)))
    assert bool(jnp.allclose(out, ref, atol=2e-3, rtol=2e-3)), max_diff

    print("KERNEL_OK")
</pallas_src>

<mosaic_0001>
module attributes {stable_mosaic.version = 11 : i64} {
  func.func @_conv1_kernel(%arg0: i32, %arg1: memref<1x26x84xbf16, #tpu.memory_space<vmem>>, %arg2: memref<84x832xbf16, #tpu.memory_space<vmem>>, %arg3: memref<1x832xf32, #tpu.memory_space<vmem>>, %arg4: memref<1x26x832xbf16, #tpu.memory_space<vmem>>) attributes {dimension_semantics = [#tpu.dimension_semantics<parallel>], iteration_bounds = array<i64: 2>, scalar_prefetch = 0 : i64, scratch_operands = 0 : i64, tpu.core_type = #tpu.core_type<tc>, window_params = [{transform_indices = @transform_0, window_bounds = array<i64: 1, 26, 84>}, {pipeline_mode = #tpu.pipeline_mode<synchronous>, transform_indices = @transform_1, window_bounds = array<i64: 84, 832>}, {pipeline_mode = #tpu.pipeline_mode<synchronous>, transform_indices = @transform_2, window_bounds = array<i64: 1, 832>}, {transform_indices = @transform_3, window_bounds = array<i64: 1, 26, 832>}]} {
    %c0 = arith.constant 0 : index
    %c0_0 = arith.constant 0 : index
    %c0_1 = arith.constant 0 : index
    %0 = vector.load %arg1[%c0, %c0_0, %c0_1] : memref<1x26x84xbf16, #tpu.memory_space<vmem>>, vector<1x26x84xbf16>
    %1 = vector.shape_cast %0 : vector<1x26x84xbf16> to vector<26x84xbf16>
    %c0_2 = arith.constant 0 : index
    %c0_3 = arith.constant 0 : index
    %2 = vector.load %arg2[%c0_2, %c0_3] : memref<84x832xbf16, #tpu.memory_space<vmem>>, vector<84x832xbf16>
    %cst = arith.constant dense<0.000000e+00> : vector<26x832xf32>
    %3 = tpu.matmul %1, %2, %cst {dimension_numbers = #tpu.dot_dimension_numbers<[1], [0], [0], [1], [0, 0, 1, 1], [], []>} : vector<26x84xbf16>, vector<84x832xbf16>, vector<26x832xf32> -> vector<26x832xf32>
    %c0_4 = arith.constant 0 : index
    %c0_5 = arith.constant 0 : index
    %4 = vector.load %arg3[%c0_4, %c0_5] : memref<1x832xf32, #tpu.memory_space<vmem>>, vector<1x832xf32>
    %5 = vector.broadcast %4 : vector<1x832xf32> to vector<26x832xf32>
    %6 = arith.addf %3, %5 : vector<26x832xf32>
    %cst_6 = arith.constant 0.000000e+00 : f32
    %7 = vector.broadcast %cst_6 : f32 to vector<26x832xf32>
    %8 = arith.maximumf %6, %7 : vector<26x832xf32>
    %9 = arith.truncf %8 : vector<26x832xf32> to vector<26x832xbf16>
    %c0_7 = arith.constant 0 : index
    %c0_8 = arith.constant 0 : index
    %c0_9 = arith.constant 0 : index
    %10 = vector.load %arg4[%c0_7, %c0_8, %c0_9] : memref<1x26x832xbf16, #tpu.memory_space<vmem>>, vector<1x26x832xbf16>
    %11 = vector.shape_cast %10 : vector<1x26x832xbf16> to vector<26x832xbf16>
    %12 = vector.shape_cast %9 : vector<26x832xbf16> to vector<1x26x832xbf16>
    tpu.vector_store %arg4[%c0_7, %c0_8, %c0_9], %12 {strides = array<i32>} : memref<1x26x832xbf16, #tpu.memory_space<vmem>>, vector<1x26x832xbf16>,
    return
  }
  func.func @transform_0(%arg0: i32) -> (i32, i32, i32) {
    %c0_i32 = arith.constant 0 : i32
    %c0_i32_0 = arith.constant 0 : i32
    %c0_i32_1 = arith.constant 0 : i32
    return %arg0, %c0_i32, %c0_i32_0 : i32, i32, i32
  }
  func.func @transform_1(%arg0: i32) -> (i32, i32) {
    %c0_i32 = arith.constant 0 : i32
    %c0_i32_0 = arith.constant 0 : i32
    %c0_i32_1 = arith.constant 0 : i32
    return %c0_i32, %c0_i32_0 : i32, i32
  }
  func.func @transform_2(%arg0: i32) -> (i32, i32) {
    %c0_i32 = arith.constant 0 : i32
    %c0_i32_0 = arith.constant 0 : i32
    %c0_i32_1 = arith.constant 0 : i32
    return %c0_i32, %c0_i32_0 : i32, i32
  }
  func.func @transform_3(%arg0: i32) -> (i32, i32, i32) {
    %c0_i32 = arith.constant 0 : i32
    %c0_i32_0 = arith.constant 0 : i32
    %c0_i32_1 = arith.constant 0 : i32
    return %arg0, %c0_i32, %c0_i32_0 : i32, i32, i32
  }
}

module attributes {stable_mosaic.version = 11 : i64} {
  func.func @_conv2_pool_kernel(%arg0: i32, %arg1: memref<1x4x144x288xbf16, #tpu.memory_space<vmem>>, %arg2: memref<288x64xbf16, #tpu.memory_space<vmem>>, %arg3: memref<1x64xf32, #tpu.memory_space<vmem>>, %arg4: memref<1x144x64xbf16, #tpu.memory_space<vmem>>) attributes {dimension_semantics = [#tpu.dimension_semantics<parallel>], iteration_bounds = array<i64: 2>, scalar_prefetch = 0 : i64, scratch_operands = 0 : i64, tpu.core_type = #tpu.core_type<tc>, window_params = [{transform_indices = @transform_0, window_bounds = array<i64: 1, 4, 144, 288>}, {pipeline_mode = #tpu.pipeline_mode<synchronous>, transform_indices = @transform_1, window_bounds = array<i64: 288, 64>}, {pipeline_mode = #tpu.pipeline_mode<synchronous>, transform_indices = @transform_2, window_bounds = array<i64: 1, 64>}, {transform_indices = @transform_3, window_bounds = array<i64: 1, 144, 64>}]} {
    %c0 = arith.constant 0 : index
    %c0_0 = arith.constant 0 : index
    %0 = vector.load %arg2[%c0, %c0_0] : memref<288x64xbf16, #tpu.memory_space<vmem>>, vector<288x64xbf16>
    %c0_1 = arith.constant 0 : index
    %c0_2 = arith.constant 0 : index
    %c0_3 = arith.constant 0 : index
    %c0_4 = arith.constant 0 : index
    %1 = vector.load %arg1[%c0_1, %c0_2, %c0_3, %c0_4] : memref<1x4x144x288xbf16, #tpu.memory_space<vmem>>, vector<1x1x144x288xbf16>
    %2 = vector.shape_cast %1 : vector<1x1x144x288xbf16> to vector<144x288xbf16>
    %cst = arith.constant dense<0.000000e+00> : vector<144x64xf32>
    %3 = tpu.matmul %2, %0, %cst {dimension_numbers = #tpu.dot_dimension_numbers<[1], [0], [0], [1], [0, 0, 1, 1], [], []>} : vector<144x288xbf16>, vector<288x64xbf16>, vector<144x64xf32> -> vector<144x64xf32>
    %c0_5 = arith.constant 0 : index
    %c1 = arith.constant 1 : index
    %c0_6 = arith.constant 0 : index
    %c0_7 = arith.constant 0 : index
    %4 = vector.load %arg1[%c0_5, %c1, %c0_6, %c0_7] : memref<1x4x144x288xbf16, #tpu.memory_space<vmem>>, vector<1x1x144x288xbf16>
    %5 = vector.shape_cast %4 : vector<1x1x144x288xbf16> to vector<144x288xbf16>
    %cst_8 = arith.constant dense<0.000000e+00> : vector<144x64xf32>
    %6 = tpu.matmul %5, %0, %cst_8 {dimension_numbers = #tpu.dot_dimension_numbers<[1], [0], [0], [1], [0, 0, 1, 1], [], []>} : vector<144x288xbf16>, vector<288x64xbf16>, vector<144x64xf32> -> vector<144x64xf32>
    %7 = arith.maximumf %3, %6 : vector<144x64xf32>
    %c0_9 = arith.constant 0 : index
    %c2 = arith.constant 2 : index
    %c0_10 = arith.constant 0 : index
    %c0_11 = arith.constant 0 : index
    %8 = vector.load %arg1[%c0_9, %c2, %c0_10, %c0_11] : memref<1x4x144x288xbf16, #tpu.memory_space<vmem>>, vector<1x1x144x288xbf16>
    %9 = vector.shape_cast %8 : vector<1x1x144x288xbf16> to vector<144x288xbf16>
    %cst_12 = arith.constant dense<0.000000e+00> : vector<144x64xf32>
    %10 = tpu.matmul %9, %0, %cst_12 {dimension_numbers = #tpu.dot_dimension_numbers<[1], [0], [0], [1], [0, 0, 1, 1], [], []>} : vector<144x288xbf16>, vector<288x64xbf16>, vector<144x64xf32> -> vector<144x64xf32>
    %11 = arith.maximumf %7, %10 : vector<144x64xf32>
    %c0_13 = arith.constant 0 : index
    %c3 = arith.constant 3 : index
    %c0_14 = arith.constant 0 : index
    %c0_15 = arith.constant 0 : index
    %12 = vector.load %arg1[%c0_13, %c3, %c0_14, %c0_15] : memref<1x4x144x288xbf16, #tpu.memory_space<vmem>>, vector<1x1x144x288xbf16>
    %13 = vector.shape_cast %12 : vector<1x1x144x288xbf16> to vector<144x288xbf16>
    %cst_16 = arith.constant dense<0.000000e+00> : vector<144x64xf32>
    %14 = tpu.matmul %13, %0, %cst_16 {dimension_numbers = #tpu.dot_dimension_numbers<[1], [0], [0], [1], [0, 0, 1, 1], [], []>} : vector<144x288xbf16>, vector<288x64xbf16>, vector<144x64xf32> -> vector<144x64xf32>
    %15 = arith.maximumf %11, %14 : vector<144x64xf32>
    %c0_17 = arith.constant 0 : index
    %c0_18 = arith.constant 0 : index
    %16 = vector.load %arg3[%c0_17, %c0_18] : memref<1x64xf32, #tpu.memory_space<vmem>>, vector<1x64xf32>
    %17 = vector.broadcast %16 : vector<1x64xf32> to vector<144x64xf32>
    %18 = arith.addf %15, %17 : vector<144x64xf32>
    %cst_19 = arith.constant 0.000000e+00 : f32
    %19 = vector.broadcast %cst_19 : f32 to vector<144x64xf32>
    %20 = arith.maximumf %18, %19 : vector<144x64xf32>
    %21 = arith.truncf %20 : vector<144x64xf32> to vector<144x64xbf16>
    %c0_20 = arith.constant 0 : index
    %c0_21 = arith.constant 0 : index
    %c0_22 = arith.constant 0 : index
    %22 = vector.load %arg4[%c0_20, %c0_21, %c0_22] : memref<1x144x64xbf16, #tpu.memory_space<vmem>>, vector<1x144x64xbf16>
    %23 = vector.shape_cast %22 : vector<1x144x64xbf16> to vector<144x64xbf16>
    %24 = vector.shape_cast %21 : vector<144x64xbf16> to vector<1x144x64xbf16>
    tpu.vector_store %arg4[%c0_20, %c0_21, %c0_22], %24 {strides = array<i32>} : memref<1x144x64xbf16, #tpu.memory_space<vmem>>, vector<1x144x64xbf16>,
    return
  }
  func.func @transform_0(%arg0: i32) -> (i32, i32, i32, i32) {
    %c0_i32 = arith.constant 0 : i32
    %c0_i32_0 = arith.constant 0 : i32
    %c0_i32_1 = arith.constant 0 : i32
    %c0_i32_2 = arith.constant 0 : i32
    return %arg0, %c0_i32, %c0_i32_0, %c0_i32_1 : i32, i32, i32, i32
  }
  func.func @transform_1(%arg0: i32) -> (i32, i32) {
    %c0_i32 = arith.constant 0 : i32
    %c0_i32_0 = arith.constant 0 : i32
    %c0_i32_1 = arith.constant 0 : i32
    return %c0_i32, %c0_i32_0 : i32, i32
  }
  func.func @transform_2(%arg0: i32) -> (i32, i32) {
    %c0_i32 = arith.constant 0 : i32
    %c0_i32_0 = arith.constant 0 : i32
    %c0_i32_1 = arith.constant 0 : i32
    return %c0_i32, %c0_i32_0 : i32, i32
  }
  func.func @transform_3(%arg0: i32) -> (i32, i32, i32) {
    %c0_i32 = arith.constant 0 : i32
    %c0_i32_0 = arith.constant 0 : i32
    %c0_i32_1 = arith.constant 0 : i32
    return %arg0, %c0_i32, %c0_i32_0 : i32, i32, i32
  }
}

module attributes {stable_mosaic.version = 11 : i64} {
  func.func @_fc_head_kernel(%arg0: i32, %arg1: memref<2x2304xbf16, #tpu.memory_space<vmem>>, %arg2: memref<2304x128xbf16, #tpu.memory_space<vmem>>, %arg3: memref<1x128xf32, #tpu.memory_space<vmem>>, %arg4: memref<128x10xbf16, #tpu.memory_space<vmem>>, %arg5: memref<1x10xf32, #tpu.memory_space<vmem>>, %arg6: memref<2x10xf32, #tpu.memory_space<vmem>>, %arg7: memref<2x128xf32, #tpu.memory_space<vmem>>) attributes {dimension_semantics = [#tpu.dimension_semantics<arbitrary>], iteration_bounds = array<i64: 4>, scalar_prefetch = 0 : i64, scratch_operands = 1 : i64, tpu.core_type = #tpu.core_type<tc>, window_params = [{transform_indices = @transform_0, window_bounds = array<i64: 2, 2304>}, {transform_indices = @transform_1, window_bounds = array<i64: 2304, 128>}, {pipeline_mode = #tpu.pipeline_mode<synchronous>, transform_indices = @transform_2, window_bounds = array<i64: 1, 128>}, {pipeline_mode = #tpu.pipeline_mode<synchronous>, transform_indices = @transform_3, window_bounds = array<i64: 128, 10>}, {pipeline_mode = #tpu.pipeline_mode<synchronous>, transform_indices = @transform_4, window_bounds = array<i64: 1, 10>}, {pipeline_mode = #tpu.pipeline_mode<synchronous>, transform_indices = @transform_5, window_bounds = array<i64: 2, 10>}]} {
    %c0_i32 = arith.constant 0 : i32
    %0 = arith.cmpi eq, %arg0, %c0_i32 : i32
    %1 = arith.extui %0 : i1 to i32
    %c0_i32_0 = arith.constant 0 : i32
    %2 = arith.cmpi ne, %1, %c0_i32_0 : i32
    scf.if %2 {
      %cst_9 = arith.constant 0.000000e+00 : f32
      %12 = vector.broadcast %cst_9 : f32 to vector<2x128xf32>
      %c0_10 = arith.constant 0 : index
      %c0_11 = arith.constant 0 : index
      %13 = vector.load %arg7[%c0_10, %c0_11] : memref<2x128xf32, #tpu.memory_space<vmem>>, vector<2x128xf32>
      tpu.vector_store %arg7[%c0_10, %c0_11], %12 {strides = array<i32>} : memref<2x128xf32, #tpu.memory_space<vmem>>, vector<2x128xf32>,
    } else {
    }
    %c0 = arith.constant 0 : index
    %c0_1 = arith.constant 0 : index
    %3 = vector.load %arg7[%c0, %c0_1] : memref<2x128xf32, #tpu.memory_space<vmem>>, vector<2x128xf32>
    %c0_2 = arith.constant 0 : index
    %c0_3 = arith.constant 0 : index
    %4 = vector.load %arg1[%c0_2, %c0_3] : memref<2x2304xbf16, #tpu.memory_space<vmem>>, vector<2x2304xbf16>
    %c0_4 = arith.constant 0 : index
    %c0_5 = arith.constant 0 : index
    %5 = vector.load %arg2[%c0_4, %c0_5] : memref<2304x128xbf16, #tpu.memory_space<vmem>>, vector<2304x128xbf16>
    %cst = arith.constant dense<0.000000e+00> : vector<2x128xf32>
    %6 = tpu.matmul %4, %5, %cst {dimension_numbers = #tpu.dot_dimension_numbers<[1], [0], [0], [1], [0, 0, 1, 1], [], []>} : vector<2x2304xbf16>, vector<2304x128xbf16>, vector<2x128xf32> -> vector<2x128xf32>
    %7 = arith.addf %3, %6 : vector<2x128xf32>
    %c0_6 = arith.constant 0 : index
    %c0_7 = arith.constant 0 : index
    %8 = vector.load %arg7[%c0_6, %c0_7] : memref<2x128xf32, #tpu.memory_space<vmem>>, vector<2x128xf32>
    tpu.vector_store %arg7[%c0_6, %c0_7], %7 {strides = array<i32>} : memref<2x128xf32, #tpu.memory_space<vmem>>, vector<2x128xf32>,
    %c3_i32 = arith.constant 3 : i32
    %9 = arith.cmpi eq, %arg0, %c3_i32 : i32
    %10 = arith.extui %9 : i1 to i32
    %c0_i32_8 = arith.constant 0 : i32
    %11 = arith.cmpi ne, %10, %c0_i32_8 : i32
    scf.if %11 {
      %c0_9 = arith.constant 0 : index
      %c0_10 = arith.constant 0 : index
      %12 = vector.load %arg7[%c0_9, %c0_10] : memref<2x128xf32, #tpu.memory_space<vmem>>, vector<2x128xf32>
      %c0_11 = arith.constant 0 : index
      %c0_12 = arith.constant 0 : index
      %13 = vector.load %arg3[%c0_11, %c0_12] : memref<1x128xf32, #tpu.memory_space<vmem>>, vector<1x128xf32>
      %14 = vector.broadcast %13 : vector<1x128xf32> to vector<2x128xf32>
      %15 = arith.addf %12, %14 : vector<2x128xf32>
      %cst_13 = arith.constant 0.000000e+00 : f32
      %16 = vector.broadcast %cst_13 : f32 to vector<2x128xf32>
      %17 = arith.maximumf %15, %16 : vector<2x128xf32>
      %18 = arith.truncf %17 : vector<2x128xf32> to vector<2x128xbf16>
      %c0_14 = arith.constant 0 : index
      %c0_15 = arith.constant 0 : index
      %19 = vector.load %arg4[%c0_14, %c0_15] : memref<128x10xbf16, #tpu.memory_space<vmem>>, vector<128x10xbf16>
      %cst_16 = arith.constant dense<0.000000e+00> : vector<2x10xf32>
      %20 = tpu.matmul %18, %19, %cst_16 {dimension_numbers = #tpu.dot_dimension_numbers<[1], [0], [0], [1], [0, 0, 1, 1], [], []>} : vector<2x128xbf16>, vector<128x10xbf16>, vector<2x10xf32> -> vector<2x10xf32>
      %c0_17 = arith.constant 0 : index
      %c0_18 = arith.constant 0 : index
      %21 = vector.load %arg5[%c0_17, %c0_18] : memref<1x10xf32, #tpu.memory_space<vmem>>, vector<1x10xf32>
      %22 = vector.broadcast %21 : vector<1x10xf32> to vector<2x10xf32>
      %23 = arith.addf %20, %22 : vector<2x10xf32>
      %cst_19 = arith.constant dense<0xFF800000> : vector<2xf32>
      %24 = vector.multi_reduction <maximumf>, %23, %cst_19 [1] : vector<2x10xf32> to vector<2xf32>
      %25 = vector.shape_cast %24 : vector<2xf32> to vector<2x1xf32>
      %26 = vector.broadcast %25 : vector<2x1xf32> to vector<2x10xf32>
      %27 = arith.subf %23, %26 : vector<2x10xf32>
      %28 = math.exp %27 : vector<2x10xf32>
      %cst_20 = arith.constant dense<0.000000e+00> : vector<2xf32>
      %29 = vector.multi_reduction <add>, %28, %cst_20 [1] : vector<2x10xf32> to vector<2xf32>
      %30 = vector.shape_cast %29 : vector<2xf32> to vector<2x1xf32>
      %31 = math.log %30 : vector<2x1xf32>
      %32 = arith.addf %25, %31 : vector<2x1xf32>
      %33 = vector.broadcast %32 : vector<2x1xf32> to vector<2x10xf32>
      %34 = arith.subf %23, %33 : vector<2x10xf32>
      %c0_21 = arith.constant 0 : index
      %c0_22 = arith.constant 0 : index
      %35 = vector.load %arg6[%c0_21, %c0_22] : memref<2x10xf32, #tpu.memory_space<vmem>>, vector<2x10xf32>
      tpu.vector_store %arg6[%c0_21, %c0_22], %34 {strides = array<i32>} : memref<2x10xf32, #tpu.memory_space<vmem>>, vector<2x10xf32>,
    } else {
    }
    return
  }
  func.func @transform_0(%arg0: i32) -> (i32, i32) {
    %c0_i32 = arith.constant 0 : i32
    %c0_i32_0 = arith.constant 0 : i32
    return %c0_i32, %arg0 : i32, i32
  }
  func.func @transform_1(%arg0: i32) -> (i32, i32) {
    %c0_i32 = arith.constant 0 : i32
    %c0_i32_0 = arith.constant 0 : i32
    return %arg0, %c0_i32 : i32, i32
  }
  func.func @transform_2(%arg0: i32) -> (i32, i32) {
    %c0_i32 = arith.constant 0 : i32
    %c0_i32_0 = arith.constant 0 : i32
    %c0_i32_1 = arith.constant 0 : i32
    return %c0_i32, %c0_i32_0 : i32, i32
  }
  func.func @transform_3(%arg0: i32) -> (i32, i32) {
    %c0_i32 = arith.constant 0 : i32
    %c0_i32_0 = arith.constant 0 : i32
    %c0_i32_1 = arith.constant 0 : i32
    return %c0_i32, %c0_i32_0 : i32, i32
  }
  func.func @transform_4(%arg0: i32) -> (i32, i32) {
    %c0_i32 = arith.constant 0 : i32
    %c0_i32_0 = arith.constant 0 : i32
    %c0_i32_1 = arith.constant 0 : i32
    return %c0_i32, %c0_i32_0 : i32, i32
  }
  func.func @transform_5(%arg0: i32) -> (i32, i32) {
    %c0_i32 = arith.constant 0 : i32
    %c0_i32_0 = arith.constant 0 : i32
    %c0_i32_1 = arith.constant 0 : i32
    return %c0_i32, %c0_i32_0 : i32, i32
  }
}

</mosaic_0001>

<bundles_post_ra>
// kernel: net_forward.3
= control target key start
LH: loop header
LB: loop body
LE: loop exit
PB: predicated region body
PF: predicated region fallthrough
CT: control target
= control target key end

     0   :  { %8 = vsyncpa [#allocation3], 0  ;;  %s1246_s0 = inlined_call_operand.vmem [shape: bf16[2,26,84], index: 0, kind: input, shape index: {}]   ;;  %s1247_s1 = inlined_call_operand.hbm [shape: bf16[84,832], index: 1, kind: input, shape index: {}]   ;;  %s1248_s2 = inlined_call_operand.hbm [shape: f32[1,832], index: 2, kind: input, shape index: {}]   ;;  %s1249_s3 = inlined_call_operand.vmem [shape: bf16[2,26,832], index: 3, kind: output, shape index: {}]  }
   0x1   :  { %9 = vsyncpa [#allocation5], 0  ;;  %s1129_s12 = smov 0  }
   0x2 LB: > { %s125_s15 = sshll.u32 %s1247_s1, 4  ;;  %s1138_s16 = sadd.s32 4294967295, %s1103_s12   ;;  %s1103_s12 = sphi %s1129_s12, %s15_s12   ;;  %s126_s15 = int_to_ptr.hbm [resolvable:$true] %s125_s15 }
   0x3   : > { %p779_p0 = scmp.ge.s32.totalorder %s1103_s12, 1  ;;  %p114_p1 = scmp.lt.s32.totalorder %s1103_s12, 3 }
   0x4   : > { %p1013_p2 = scmp.eq.s32.totalorder %s1138_s16, 0  ;;  %s1105_s18 = smov [#allocation2]  }
   0x5   : > { %p1143_p3 = pnand %p779_p0, %p114_p1  ;;  %s127_s19 = sshll.u32 %s1105_s18, 4  ;;  %s128_s19 = int_to_ptr.vmem [resolvable:$true] %s127_s19 }
   0x6   : > { %s140_s22 = sshll.u32 %s1248_s2, 4  ;;  %s1106_s23 = smov [#allocation4]   ;;  %s141_s22 = int_to_ptr.hbm [resolvable:$true] %s140_s22 }
   0x7   : > { %p1006_p4 = pneg %p1143_p3  ;;  %s142_s24 = sshll.u32 %s1106_s23, 4  ;;  %s143_s24 = int_to_ptr.vmem [resolvable:$true] %s142_s24 }
   0x8   : > { %s1107_s25 = smov 448   ;;  %s1108_s26 = smov 28  }
   0x9   : > { %p1007_p5 = pnand %p1013_p2, %p1006_p4  ;;  %163 = sbr.rel (%p1143_p3) target bundleno = 242 (0xf2), region = 32 }
   0xb   : > { %1009 = dma.hbm_to_vmem [thread:$0]  (!%p1007_p5), %s126_s15, 4928, %s128_s19, [#allocation3], %s1107_s25, %s1107_s25, %s1108_s26  }
   0xc   : > { %1012 = dma.hbm_to_vmem [thread:$0]  (!%p1007_p5), %s141_s22, 112, %s143_s24, [#allocation5]  }
   0xe   : > { %1094 = dma.done.wait (%p1013_p2), [#allocation3], 4928  }
   0xf   : > { %1096 = vsyncadd (%p1013_p2), [#allocation3], 4294962368 }
  0x10   : > { %1098 = dma.done.wait (%p1013_p2), [#allocation5], 112  }
  0x11   : > { %1100 = vsyncadd (%p1013_p2), [#allocation5], 4294967184  ;;  %v248_v0 = vld [vmem:[#allocation2 + $0x118] sm:$0x33]  ;;  %v249_v1 = vld [vmem:[#allocation2 + $0x120] sm:$0x33] }
  0x12   : > { %v392_v2 = vunpack.c.l.b16 %v248_v0  ;;  %v393_v3 = vunpack.c.h.b16 %v248_v0  ;;  %v394_v4 = vunpack.c.l.b16 %v249_v1  ;;  %v395_v5 = vunpack.c.h.b16 %v249_v1  ;;  %v911_v6 = vld [vmem:[#allocation2 + $0xe0] sm:$0xf]  ;;  %v987_v7 = vld [vmem:[#allocation2 + $0xf8] sm:$0xf0]  ;;  %v984_v12 = vld [vmem:[#allocation2 + $0xe4] sm:$0xf] }
  0x13   : > { %vm483_vm0 = vcmask 1041408   ;;  %v913_v13 = vld [vmem:[#allocation2 + $0xfc] sm:$0xf0]  ;;  %v919_v14 = vld [vmem:[#allocation2 + $0xe8] sm:$0xf]  ;;  %v912_v22 = vor.u32 %v987_v7, %v911_v6  ;;  %p193_p6 = scmp.lt.s32.totalorder %s1138_s16, 1 }
  0x14   : > { %v434_v8 = vpack.c.b16 %v392_v2, %v392_v2  ;;  %v435_v9 = vpack.c.b16 %v393_v3, %v393_v3  ;;  %v436_v10 = vpack.c.b16 %v394_v4, %v394_v4  ;;  %v437_v11 = vpack.c.b16 %v395_v5, %v395_v5  ;;  %v988_v15 = vld [vmem:[#allocation2 + $0x100] sm:$0xf0]  ;;  %v985_v16 = vld [vmem:[#allocation2 + $0xec] sm:$0xf]  ;;  %v921_v17 = vld [vmem:[#allocation2 + $0x104] sm:$0xf0] }
  0x15   : > { %v916_v23 = vor.u32 %v984_v12, %v913_v13  ;;  %v883_v24 = vld [vmem:[#allocation2 + $0xa8] sm:$0xf]  ;;  %v980_v25 = vld [vmem:[#allocation2 + $0xc0] sm:$0xf0]  ;;  %v920_v26 = vor.u32 %v988_v15, %v919_v14  ;;  %v924_v27 = vor.u32 %v985_v16, %v921_v17  ;;  %v977_v28 = vld [vmem:[#allocation2 + $0xac] sm:$0xf] }
  0x16   : > { %v485_v18 = vsel %vm483_vm0, %v434_v8, 0  ;;  %v488_v19 = vsel %vm483_vm0, %v435_v9, 0  ;;  %v491_v20 = vsel %vm483_vm0, %v436_v10, 0  ;;  %v494_v21 = vsel %vm483_vm0, %v437_v11, 0  ;;  %v885_v29 = vld [vmem:[#allocation2 + $0xc4] sm:$0xf0] }
  0x17   : > { %507 = vmatpush.bf16.msra.mxu0 %v485_v18  ;;  %526 = vmatpush.bf16.msra.mxu1 %v488_v19  ;;  %v891_v30 = vld [vmem:[#allocation2 + $0xb0] sm:$0xf]  ;;  %v981_v31 = vld [vmem:[#allocation2 + $0xc8] sm:$0xf0]  ;;  %v978_v32 = vld [vmem:[#allocation2 + $0xb4] sm:$0xf]  ;;  %v884_v34 = vor.u32 %v980_v25, %v883_v24  ;;  %v888_v35 = vor.u32 %v977_v28, %v885_v29 }
  0x18   : > { %545 = vmatpush.bf16.msra.mxu2 %v491_v20  ;;  %564 = vmatpush.bf16.msra.mxu3 %v494_v21  ;;  %v893_v33 = vld [vmem:[#allocation2 + $0xcc] sm:$0xf0]  ;;  %v973_v37 = vld [vmem:[#allocation2 + $0x88] sm:$0xf0]  ;;  %v892_v38 = vor.u32 %v981_v31, %v891_v30  ;;  %v970_v40 = vld [vmem:[#allocation2 + $0x74] sm:$0xf] }
  0x19   : > { %v855_v36 = vld [vmem:[#allocation2 + $0x70] sm:$0xf]  ;;  %v896_v39 = vor.u32 %v978_v32, %v893_v33  ;;  %v863_v42 = vld [vmem:[#allocation2 + $0x78] sm:$0xf]  ;;  %v974_v43 = vld [vmem:[#allocation2 + $0x90] sm:$0xf0] }
  0x1a   : > { %v857_v41 = vld [vmem:[#allocation2 + $0x8c] sm:$0xf0]  ;;  %v971_v44 = vld [vmem:[#allocation2 + $0x7c] sm:$0xf]  ;;  %v865_v45 = vld [vmem:[#allocation2 + $0x94] sm:$0xf0]  ;;  %v856_v47 = vor.u32 %v973_v37, %v855_v36  ;;  %v864_v52 = vor.u32 %v974_v43, %v863_v42 }
  0x1b   : > { %508 = vmatpush.bf16.msra.mxu0 %v912_v22  ;;  %527 = vmatpush.bf16.msra.mxu1 %v916_v23  ;;  %v827_v46 = vld [vmem:[#allocation2 + $0x38] sm:$0xf]  ;;  %s1252_s16 = smov (!%p193_p6, %s1138_s16), 1  ;;  %v860_v48 = vor.u32 %v970_v40, %v857_v41  ;;  %v966_v49 = vld [vmem:[#allocation2 + $0x50] sm:$0xf0]  ;;  %v868_v53 = vor.u32 %v971_v44, %v865_v45  ;;  %vm476_vm1 = vcmask 687104  }
  0x1c   : > { %546 = vmatpush.bf16.msra.mxu2 %v920_v26  ;;  %565 = vmatpush.bf16.msra.mxu3 %v924_v27  ;;  %v963_v50 = vld [vmem:[#allocation2 + $0x3c] sm:$0xf]  ;;  %v829_v51 = vld [vmem:[#allocation2 + $0x54] sm:$0xf0]  ;;  %v835_v54 = vld [vmem:[#allocation2 + $0x40] sm:$0xf]  ;;  %v828_v62 = vor.u32 %v966_v49, %v827_v46 }
  0x1d   : > { %v251_v55 = vld [vmem:[#allocation2 + $0x130] sm:$0x3]  ;;  %v250_v56 = vld [vmem:[#allocation2 + $0x128] sm:$0x33]  ;;  %v967_v57 = vld [vmem:[#allocation2 + $0x58] sm:$0xf0]  ;;  %v832_v63 = vor.u32 %v963_v50, %v829_v51 }
  0x1e   : > { %v964_v58 = vld [vmem:[#allocation2 + $0x44] sm:$0xf]  ;;  %v837_v59 = vld [vmem:[#allocation2 + $0x5c] sm:$0xf0]  ;;  %v398_v60 = vunpack.c.l.b16 %v251_v55  ;;  %v397_v61 = vunpack.c.h.b16 %v250_v56  ;;  %v959_v1 = vld [vmem:[#allocation2 + $0x18] sm:$0xf0]  ;;  %v836_v2 = vor.u32 %v967_v57, %v835_v54  ;;  %v396_v10 = vunpack.c.l.b16 %v250_v56 }
  0x1f   : > { %509 = vmatpush.bf16.msra.mxu0 %v884_v34  ;;  %528 = vmatpush.bf16.msra.mxu1 %v888_v35  ;;  %v799_v0 = vld [vmem:[#allocation2] sm:$0xf]  ;;  %s953_s27 = sshll.u32 %s1252_s16, 4  ;;  %v840_v3 = vor.u32 %v964_v58, %v837_v59  ;;  %v956_v4 = vld [vmem:[#allocation2 + $0x4] sm:$0xf]  ;;  %s997_s4 = smul.u32 112, %s1252_s16 }
  0x20   : > { %547 = vmatpush.bf16.msra.mxu2 %v892_v38  ;;  %566 = vmatpush.bf16.msra.mxu3 %v896_v39  ;;  %v801_v5 = vld [vmem:[#allocation2 + $0x1c] sm:$0xf0]  ;;  %v807_v6 = vld [vmem:[#allocation2 + $0x8] sm:$0xf]  ;;  %v960_v7 = vld [vmem:[#allocation2 + $0x20] sm:$0xf0]  ;;  %s1178_s30 = scalar_lea.vmem %s1246_s0, %s953_s27  ;;  %v440_v11 = vpack.c.b16 %v398_v60, %v398_v60  ;;  %v439_v12 = vpack.c.b16 %v397_v61, %v397_v61  ;;  %v800_v13 = vor.u32 %v959_v1, %v799_v0 }
  0x21   : > { %v957_v8 = vld [vmem:[#allocation2 + $0xc] sm:$0xf]  ;;  %v809_v9 = vld [vmem:[#allocation2 + $0x24] sm:$0xf0]  ;;  %v804_v14 = vor.u32 %v956_v4, %v801_v5  ;;  %v808_v15 = vor.u32 %v960_v7, %v807_v6  ;;  %v1181_v17 = vld [vmem:[%s1178_s30] sm:$0xff]  ;;  %v438_v20 = vpack.c.b16 %v396_v10, %v396_v10  ;;  %s1217_s7 = scalar_lea.vmem %s1249_s3, %s997_s4  ;;  %vm685_vm2 = vcmask 519168  }
  0x22   : > { %v812_v16 = vor.u32 %v957_v8, %v809_v9  ;;  %v935_v18 = vld [vmem:[#allocation2 + $0xf8] sm:$0xf]  ;;  %v990_v19 = vld [vmem:[#allocation2 + $0x110] sm:$0xf0]  ;;  %v503_v21 = vsel %vm483_vm0, %v440_v11, 0  ;;  %v500_v22 = vsel %vm483_vm0, %v439_v12, 0 }
  0x23   : > { %510 = vmatpush.bf16.msra.mxu0 %v856_v47  ;;  %529 = vmatpush.bf16.msra.mxu1 %v860_v48  ;;  %v986_v23 = vld [vmem:[#allocation2 + $0xf4] sm:$0xf]  ;;  %v929_v24 = vld [vmem:[#allocation2 + $0x10c] sm:$0xf0]  ;;  %v907_v25 = vld [vmem:[#allocation2 + $0xc0] sm:$0xf]  ;;  %v936_v26 = vor.u32 %v990_v19, %v935_v18 }
  0x24   : > { %548 = vmatpush.bf16.msra.mxu2 %v864_v52  ;;  %567 = vmatpush.bf16.msra.mxu3 %v868_v53  ;;  %v497_v27 = vsel %vm483_vm0, %v438_v20, 0  ;;  %v932_v28 = vor.u32 %v986_v23, %v929_v24  ;;  %v927_v29 = vld [vmem:[#allocation2 + $0xf0] sm:$0xf]  ;;  %v989_v30 = vld [vmem:[#allocation2 + $0x108] sm:$0xf0]  ;;  %vm698_vm3 = vcmask 516096  }
  0x25   : > { %v983_v31 = vld [vmem:[#allocation2 + $0xd8] sm:$0xf0]  ;;  %v901_v33 = vld [vmem:[#allocation2 + $0xd4] sm:$0xf0]  ;;  %v928_v34 = vor.u32 %v989_v30, %v927_v29  ;;  %v879_v36 = vld [vmem:[#allocation2 + $0x88] sm:$0xf] }
  0x26   : > { %v979_v32 = vld [vmem:[#allocation2 + $0xbc] sm:$0xf]  ;;  %v908_v35 = vor.u32 %v983_v31, %v907_v25  ;;  %v899_v37 = vld [vmem:[#allocation2 + $0xb8] sm:$0xf]  ;;  %v982_v38 = vld [vmem:[#allocation2 + $0xd0] sm:$0xf0] }
  0x27   : > { %511 = vmatpush.bf16.msra.mxu0 %v828_v62  ;;  %530 = vmatpush.bf16.msra.mxu1 %v832_v63  ;;  %v904_v39 = vor.u32 %v979_v32, %v901_v33  ;;  %v976_v40 = vld [vmem:[#allocation2 + $0xa0] sm:$0xf0]  ;;  %v873_v42 = vld [vmem:[#allocation2 + $0x9c] sm:$0xf0]  ;;  %v900_v43 = vor.u32 %v982_v38, %v899_v37  ;;  %v975_v46 = vld [vmem:[#allocation2 + $0x98] sm:$0xf0] }
  0x28   : > { %549 = vmatpush.bf16.msra.mxu2 %v836_v2  ;;  %568 = vmatpush.bf16.msra.mxu3 %v840_v3  ;;  %v972_v41 = vld [vmem:[#allocation2 + $0x84] sm:$0xf]  ;;  %v880_v44 = vor.u32 %v976_v40, %v879_v36  ;;  %v871_v45 = vld [vmem:[#allocation2 + $0x80] sm:$0xf]  ;;  %v851_v48 = vld [vmem:[#allocation2 + $0x50] sm:$0xf] }
  0x29   : > { %v876_v47 = vor.u32 %v972_v41, %v873_v42  ;;  %v969_v49 = vld [vmem:[#allocation2 + $0x68] sm:$0xf0]  ;;  %v845_v51 = vld [vmem:[#allocation2 + $0x64] sm:$0xf0]  ;;  %v872_v54 = vor.u32 %v975_v46, %v871_v45  ;;  %v968_v57 = vld [vmem:[#allocation2 + $0x60] sm:$0xf0] }
  0x2a   : > { %v965_v50 = vld [vmem:[#allocation2 + $0x4c] sm:$0xf]  ;;  %v795_v52 = vld [vmem:[%s1178_s30 + $0x8] sm:$0xf]  ;;  %v852_v55 = vor.u32 %v969_v49, %v851_v48  ;;  %v823_v59 = vld [vmem:[#allocation2 + $0x18] sm:$0xf] }
  0x2b   : > { %512 = vmatpush.bf16.msra.mxu0 %v800_v13  ;;  %531 = vmatpush.bf16.msra.mxu1 %v804_v14  ;;  %v955_v53 = vld [vmem:[%s1178_s30 + $0x8] sm:$0x10]  ;;  %v843_v56 = vld [vmem:[#allocation2 + $0x48] sm:$0xf]  ;;  %v848_v58 = vor.u32 %v965_v50, %v845_v51  ;;  %v962_v61 = vld [vmem:[#allocation2 + $0x30] sm:$0xf0] }
  0x2c   : > { %550 = vmatpush.bf16.msra.mxu2 %v808_v15  ;;  %569 = vmatpush.bf16.msra.mxu3 %v812_v16  ;;  %v796_v60 = vor.u32 %v955_v53, %v795_v52  ;;  %v958_v62 = vld [vmem:[#allocation2 + $0x14] sm:$0xf]  ;;  %v817_v63 = vld [vmem:[#allocation2 + $0x2c] sm:$0xf0]  ;;  %v844_v0 = vor.u32 %v968_v57, %v843_v56  ;;  %v824_v1 = vor.u32 %v962_v61, %v823_v59  ;;  %v961_v3 = vld [vmem:[#allocation2 + $0x28] sm:$0xf0] }
  0x2d   : > { %v815_v2 = vld [vmem:[#allocation2 + $0x10] sm:$0xf]  ;;  %v820_v4 = vor.u32 %v958_v62, %v817_v63  ;;  %v1209_v6 = vld [vmem:[#allocation4] sm:$0x7f] }
  0x2e   : > { %937 = vmatmul.msk.bf16.vlgmr.msra.gmra.mxu0 %vm476_vm1, %v1181_v17  ;;  %939 = vmatmul.msk.bf16.vlgmr.msra.gmra.mxu1 %vm476_vm1, %v1181_v17  ;;  %v816_v5 = vor.u32 %v961_v3, %v815_v2  ;;  %v254_v7 = vperm.slane %v1209_v6, 0  ;;  %v255_v8 = vperm.slane %v1209_v6, 1  ;;  %v256_v15 = vperm.slane %v1209_v6, 2 }
  0x2f   : > { %602 = vmatpush.bf16.msrb.mxu1 %v500_v22  ;;  %941 = vmatmul.msk.bf16.vlgmr.msra.gmra.mxu2 %vm476_vm1, %v1181_v17  ;;  %v257_v16 = vperm.slane %v1209_v6, 3  ;;  %v259_v61 = vperm.slane %v1209_v6, 5 }
  0x30   : > { %621 = vmatpush.bf16.msrb.mxu2 %v503_v21  ;;  %943 = vmatmul.msk.bf16.vlgmr.msra.gmra.mxu3 %vm476_vm1, %v1181_v17 }
  0x31   : > { %583 = vmatpush.bf16.msrb.mxu0 %v497_v27  ;;  %991 = vmatpush.bf16.msrb.mxu3 %v497_v27 }
  0x33   : > { %603 = vmatpush.bf16.msrb.mxu1 %v932_v28 }
  0x34   : > { %622 = vmatpush.bf16.msrb.mxu2 %v936_v26 }
  0x35   : > { %584 = vmatpush.bf16.msrb.mxu0 %v928_v34  ;;  %992 = vmatpush.bf16.msrb.mxu3 %v928_v34 }
  0x37   : > { %604 = vmatpush.bf16.msrb.mxu1 %v904_v39 }
  0x38   : > { %623 = vmatpush.bf16.msrb.mxu2 %v908_v35 }
  0x39   : > { %585 = vmatpush.bf16.msrb.mxu0 %v900_v43  ;;  %993 = vmatpush.bf16.msrb.mxu3 %v900_v43 }
  0x3b   : > { %605 = vmatpush.bf16.msrb.mxu1 %v876_v47 }
  0x3c   : > { %624 = vmatpush.bf16.msrb.mxu2 %v880_v44 }
  0x3d   : > { %586 = vmatpush.bf16.msrb.mxu0 %v872_v54  ;;  %994 = vmatpush.bf16.msrb.mxu3 %v872_v54 }
  0x3e   : > { %938 = vmatmul.msk.bf16.gmra.mxu0 %vm476_vm1, %v796_v60  ;;  %940 = vmatmul.msk.bf16.gmra.mxu1 %vm476_vm1, %v796_v60 }
  0x3f   : > { %606 = vmatpush.bf16.msrb.mxu1 %v848_v58  ;;  %942 = vmatmul.msk.bf16.gmra.mxu2 %vm476_vm1, %v796_v60 }
  0x40   : > { %625 = vmatpush.bf16.msrb.mxu2 %v852_v55  ;;  %944 = vmatmul.msk.bf16.gmra.mxu3 %vm476_vm1, %v796_v60 }
  0x41   : > { %587 = vmatpush.bf16.msrb.mxu0 %v844_v0  ;;  %995 = vmatpush.bf16.msrb.mxu3 %v844_v0 }
  0x43   : > { %607 = vmatpush.bf16.msrb.mxu1 %v820_v4 }
  0x44   : > { %626 = vmatpush.bf16.msrb.mxu2 %v824_v1 }
  0x45   : > { %588 = vmatpush.bf16.msrb.mxu0 %v816_v5  ;;  %996 = vmatpush.bf16.msrb.mxu3 %v816_v5 }
  0x4e   : > { %945 = vmatmul.msk.bf16.vlgmr.msrb.gmra.mxu0 %vm476_vm1, %v1181_v17  ;;  %947 = vmatmul.msk.bf16.vlgmr.msrb.gmra.mxu1 %vm476_vm1, %v1181_v17 }
  0x4f   : > { %949 = vmatmul.msk.bf16.vlgmr.msrb.gmra.mxu2 %vm476_vm1, %v1181_v17 }
  0x50   : > { %946 = vmatmul.msk.bf16.vlgmr.msrb.gmra.mxu3 %vm476_vm1, %v796_v60 }
  0x5e   : > { %948 = vmatmul.msk.bf16.gmra.mxu1 %vm476_vm1, %v796_v60 }
  0x5f   : > { %950 = vmatmul.msk.bf16.gmra.mxu2 %vm476_vm1, %v796_v60  ;;  %v258_v60 = vperm.slane %v1209_v6, 4 }
  0xab   : > { %v514_v9 = vpop.f32.mrf.mxu0  ;;  %v533_v10 = vpop.f32.mrf.mxu1 }
  0xac   : > { %v515_v11 = vadd.f32 %v514_v9, %v254_v7  ;;  %v534_v12 = vadd.f32 %v533_v10, %v255_v8 }
  0xae   : > { %v638_v13 = vmax.f32 %v515_v11, 0.0  ;;  %v639_v14 = vmax.f32 %v534_v12, 0.0  ;;  %v260_v12 = vperm.slane %v1209_v6, 6 }
  0xb0   : > { %v666_v17 = vpack.c.bf16 %v639_v14, %v638_v13 }
  0xb2   : > { %682 = vst [vmem:[%s1217_s7] sm:$0xff] %v666_v17  ;;  %v552_v18 = vpop.f32.mrf.mxu2 }
  0xb3   : > { %v571_v19 = vpop.f32.mrf.mxu3  ;;  %v553_v20 = vadd.f32 %v552_v18, %v256_v15  ;;  %v516_v22 = vpop.f32.mrf.mxu0 }
  0xb4   : > { %v572_v21 = vadd.f32 %v571_v19, %v257_v16  ;;  %v535_v23 = vpop.f32.mrf.mxu1  ;;  %v517_v24 = vadd.f32 %v516_v22, %v254_v7 }
  0xb5   : > { %v536_v25 = vadd.f32 %v535_v23, %v255_v8  ;;  %v640_v26 = vmax.f32 %v553_v20, 0.0 }
  0xb6   : > { %v641_v27 = vmax.f32 %v572_v21, 0.0  ;;  %v645_v28 = vmax.f32 %v517_v24, 0.0 }
  0xb7   : > { %v646_v29 = vmax.f32 %v536_v25, 0.0 }
  0xb8   : > { %v667_v30 = vpack.c.bf16 %v641_v27, %v640_v26 }
  0xb9   : > { %v670_v31 = vpack.c.bf16 %v646_v29, %v645_v28 }
  0xba   : > { %683 = vst [vmem:[%s1217_s7 + $0x8] sm:$0xff] %v667_v30  ;;  %v554_v32 = vpop.f32.mrf.mxu2 }
  0xbb   : > { %687 = vst [vmem:[%s1217_s7 + $0x1c] sm:$0xff] %v670_v31  ;;  %v573_v33 = vpop.f32.mrf.mxu3  ;;  %v555_v34 = vadd.f32 %v554_v32, %v256_v15  ;;  %v519_v36 = vpop.f32.mrf.mxu0 }
  0xbc   : > { %v574_v35 = vadd.f32 %v573_v33, %v257_v16  ;;  %v538_v37 = vpop.f32.mrf.mxu1  ;;  %v520_v38 = vadd.f32 %v519_v36, %v254_v7 }
  0xbd   : > { %v539_v39 = vadd.f32 %v538_v37, %v255_v8  ;;  %v647_v40 = vmax.f32 %v555_v34, 0.0 }
  0xbe   : > { %v648_v41 = vmax.f32 %v574_v35, 0.0  ;;  %v652_v42 = vmax.f32 %v520_v38, 0.0 }
  0xbf   : > { %v653_v43 = vmax.f32 %v539_v39, 0.0 }
  0xc0   : > { %v671_v44 = vpack.c.bf16 %v648_v41, %v647_v40 }
  0xc1   : > { %v674_v45 = vpack.c.bf16 %v653_v43, %v652_v42 }
  0xc2   : > { %688 = vst [vmem:[%s1217_s7 + $0x24] sm:$0xff] %v671_v44  ;;  %v557_v46 = vpop.f32.mrf.mxu2 }
  0xc3   : > { %691 = vst [vmem:[%s1217_s7 + $0x38] sm:$0xff] %v674_v45  ;;  %v576_v47 = vpop.f32.mrf.mxu3  ;;  %v558_v48 = vadd.f32 %v557_v46, %v256_v15  ;;  %v521_v50 = vpop.f32.mrf.mxu0 }
  0xc4   : > { %v577_v49 = vadd.f32 %v576_v47, %v257_v16  ;;  %v540_v51 = vpop.f32.mrf.mxu1  ;;  %v522_v52 = vadd.f32 %v521_v50, %v254_v7 }
  0xc5   : > { %v541_v53 = vadd.f32 %v540_v51, %v255_v8  ;;  %v654_v54 = vmax.f32 %v558_v48, 0.0 }
  0xc6   : > { %v655_v55 = vmax.f32 %v577_v49, 0.0  ;;  %v659_v56 = vmax.f32 %v522_v52, 0.0 }
  0xc7   : > { %v660_v57 = vmax.f32 %v541_v53, 0.0 }
  0xc8   : > { %v675_v58 = vpack.c.bf16 %v655_v55, %v654_v54 }
  0xc9   : > { %v678_v59 = vpack.c.bf16 %v660_v57, %v659_v56 }
  0xca   : > { %692 = vst [vmem:[%s1217_s7 + $0x40] sm:$0xff] %v675_v58  ;;  %v559_v62 = vpop.f32.mrf.mxu2 }
  0xcb   : > { %695 = vst [vmem:[%s1217_s7 + $0x54] sm:$0x11] %v678_v59  ;;  %v578_v63 = vpop.f32.mrf.mxu3  ;;  %v560_v0 = vadd.f32 %v559_v62, %v256_v15  ;;  %v590_v2 = vpop.f32.mrf.mxu0 }
  0xcc   : > { %v579_v1 = vadd.f32 %v578_v63, %v257_v16  ;;  %v609_v3 = vpop.f32.mrf.mxu1  ;;  %v591_v4 = vadd.f32 %v590_v2, %v258_v60 }
  0xcd   : > { %v610_v5 = vadd.f32 %v609_v3, %v259_v61  ;;  %v661_v7 = vmax.f32 %v560_v0, 0.0 }
  0xce   : > { %v662_v8 = vmax.f32 %v579_v1, 0.0  ;;  %v642_v9 = vmax.f32 %v591_v4, 0.0 }
  0xcf   : > { %v643_v10 = vmax.f32 %v610_v5, 0.0 }
  0xd0   : > { %v679_v11 = vpack.c.bf16 %v662_v8, %v661_v7 }
  0xd1   : > { %v668_v13 = vpack.c.bf16 %v643_v10, %v642_v9 }
  0xd2   : > { %696 = vst [vmem:[%s1217_s7 + $0x5c] sm:$0x11] %v679_v11  ;;  %v628_v14 = vpop.f32.mrf.mxu2 }
  0xd3   : > { %684 = vst [vmem:[%s1217_s7 + $0x10] sm:$0xff] %v668_v13  ;;  %v629_v17 = vadd.f32 %v628_v14, %v260_v12  ;;  %v592_v15 = vpop.f32.mrf.mxu0  ;;  %v595_v21 = vpop.f32.mrf.mxu3 }
  0xd4   : > { %v611_v16 = vpop.f32.mrf.mxu1  ;;  %v593_v18 = vadd.f32 %v592_v15, %v258_v60  ;;  %v596_v25 = vadd.f32 %v595_v21, %v258_v60 }
  0xd5   : > { %v612_v19 = vadd.f32 %v611_v16, %v259_v61  ;;  %v644_v20 = vmax.f32 %v629_v17, 0.0 }
  0xd6   : > { %v649_v22 = vmax.f32 %v593_v18, 0.0  ;;  %v656_v29 = vmax.f32 %v596_v25, 0.0 }
  0xd7   : > { %v650_v23 = vmax.f32 %v612_v19, 0.0  ;;  %v669_v24 = vpack.c.bf16 %v644_v20, %v644_v20 }
  0xd9   : > { %v672_v6 = vpack.c.bf16 %v650_v23, %v649_v22  ;;  %686 = vst.msk [vmem:[%s1217_s7 + $0x18] sm:$0xf] %vm685_vm2, %v669_v24 }
  0xda   : > { %v630_v26 = vpop.f32.mrf.mxu2 }
  0xdb   : > { %689 = vst [vmem:[%s1217_s7 + $0x2c] sm:$0xff] %v672_v6  ;;  %v631_v27 = vadd.f32 %v630_v26, %v260_v12  ;;  %v597_v34 = vpop.f32.mrf.mxu3 }
  0xdc   : > { %v614_v28 = vpop.f32.mrf.mxu1  ;;  %v598_v36 = vadd.f32 %v597_v34, %v258_v60 }
  0xdd   : > { %v615_v30 = vadd.f32 %v614_v28, %v259_v61  ;;  %v651_v31 = vmax.f32 %v631_v27, 0.0 }
  0xde   : > { %v663_v42 = vmax.f32 %v598_v36, 0.0 }
  0xdf   : > { %v657_v32 = vmax.f32 %v615_v30, 0.0  ;;  %v673_v33 = vpack.c.bf16 %v651_v31, %v651_v31 }
  0xe1   : > { %v676_v35 = vpack.c.bf16 %v657_v32, %v656_v29  ;;  %690 = vst.msk [vmem:[%s1217_s7 + $0x34] sm:$0xf] %vm685_vm2, %v673_v33 }
  0xe2   : > { %v633_v37 = vpop.f32.mrf.mxu2 }
  0xe3   : > { %693 = vst [vmem:[%s1217_s7 + $0x48] sm:$0xff] %v676_v35  ;;  %v634_v38 = vadd.f32 %v633_v37, %v260_v12 }
  0xe4   : > { %v616_v39 = vpop.f32.mrf.mxu1 }
  0xe5   : > { %v617_v40 = vadd.f32 %v616_v39, %v259_v61  ;;  %v658_v41 = vmax.f32 %v634_v38, 0.0 }
  0xe7   : > { %v664_v43 = vmax.f32 %v617_v40, 0.0  ;;  %v677_v44 = vpack.c.bf16 %v658_v41, %v658_v41 }
  0xe9   : > { %v680_v45 = vpack.c.bf16 %v664_v43, %v663_v42  ;;  %694 = vst.msk [vmem:[%s1217_s7 + $0x50] sm:$0xf] %vm685_vm2, %v677_v44 }
  0xea   : > { %v635_v46 = vpop.f32.mrf.mxu2 }
  0xeb   : > { %697 = vst [vmem:[%s1217_s7 + $0x64] sm:$0x11] %v680_v45  ;;  %v636_v47 = vadd.f32 %v635_v46, %v260_v12 }
  0xed   : > { %v665_v48 = vmax.f32 %v636_v47, 0.0 }
  0xef   : > { %v681_v49 = vpack.c.bf16 %v665_v48, %v665_v48 }
  0xf1   : > { %699 = vst.msk [vmem:[%s1217_s7 + $0x6c] sm:$0x1] %vm698_vm3, %v681_v49 }
  0xf2 PF: > { %s15_s12 = sadd.s32 1, %s1103_s12  }
  0xf3   : > { %p12_p7 = scmp.ge.s32.totalorder %s15_s12, 4  }
  0xf5   :  { %14 = sbr.rel (!%p12_p7) target bundleno = 2 (0x2), region = 71 }
  0xfa   :  { %721 = vsyncpa [#allocation3], 1 }
  0xfb   :  { %723 = vsyncpa [#allocation3 + $0x1], 1 }
  0xfc   :  { %724 = vsyncpa [#allocation5], 1 }

// kernel: net_forward.4
= control target key start
LH: loop header
LB: loop body
LE: loop exit
PB: predicated region body
PF: predicated region fallthrough
CT: control target
= control target key end

     0   :  { %s2768_s12 = smov 0   ;;  %s3536_s0 = inlined_call_operand.vmem [shape: bf16[2,4,144,288], index: 0, kind: input, shape index: {}]   ;;  %s3537_s1 = inlined_call_operand.vmem [shape: bf16[288,64], index: 1, kind: input, shape index: {}]   ;;  %s3538_s2 = inlined_call_operand.vmem [shape: f32[1,64], index: 2, kind: input, shape index: {}]   ;;  %s3539_s3 = inlined_call_operand.vmem [shape: bf16[2,144,64], index: 3, kind: output, shape index: {}]  }
   0x1 LB: > { %s1946_s13 = sadd.s32 4294967295, %s2746_s12   ;;  %p1950_p0 = scmp.ge.s32.totalorder %s2746_s12, 1  ;;  %s2746_s12 = sphi %s2768_s12, %s13_s12  }
   0x2   : > { %p137_p1 = scmp.lt.s32.totalorder %s2746_s12, 3 }
   0x4   : > { %p138_p2 = pnand %p1950_p0, %p137_p1 }
   0x6   : > { %141 = sbr.rel (%p138_p2) target bundleno = 612 (0x264), region = 32 }
   0xb   : > { %v2779_v0 = vld [vmem:[%s3537_s1 + $0x38] sm:$0xff]  ;;  %v2789_v2 = vld [vmem:[%s3537_s1 + $0x88] sm:$0xff]  ;;  %p161_p3 = scmp.lt.s32.totalorder %s1946_s13, 1  ;;  %v2796_v3 = vld [vmem:[%s3537_s1 + $0x30] sm:$0xff]  ;;  %vm487_vm0 = vcmask 261120   ;;  %vm1872_vm1 = vcmask 519168  }
   0xc   : > { %v2784_v1 = vld [vmem:[%s3537_s1 + $0x78] sm:$0xff]  ;;  %515 = vmatpush.bf16.msra.mxu0 %v2779_v0  ;;  %v2801_v4 = vld [vmem:[%s3537_s1 + $0x70] sm:$0xff]  ;;  %629 = vmatpush.bf16.msra.mxu2 %v2789_v2  ;;  %v2810_v5 = vld [vmem:[%s3537_s1 + $0x80] sm:$0xff] }
   0xd   : > { %569 = vmatpush.bf16.msra.mxu1 %v2784_v1  ;;  %s3584_s13 = smov (!%p161_p3, %s1946_s13), 1  ;;  %876 = vmatpush.bf16.msra.mxu3 %v2779_v0  ;;  %v2823_v6 = vld [vmem:[%s3537_s1 + $0x28] sm:$0xff]  ;;  %v2840_v11 = vld [vmem:[%s3537_s1 + $0x20] sm:$0xff]  ;;  %v2854_v13 = vld [vmem:[%s3537_s1 + $0x18] sm:$0xff] }
   0xe   : > { %s2729_s26 = smul.u32 864, %s3584_s13  ;;  %v2832_v9 = vld [vmem:[%s3537_s1 + $0x68] sm:$0xff]  ;;  %v2847_v12 = vld [vmem:[%s3537_s1 + $0x60] sm:$0xff]  ;;  %v2861_v14 = vld [vmem:[%s3537_s1 + $0x58] sm:$0xff] }
   0xf   : > { %v2868_v15 = vld [vmem:[%s3537_s1 + $0x10] sm:$0xff]  ;;  %v2884_v20 = vld [vmem:[%s3537_s1 + $0x8] sm:$0xff]  ;;  %v2897_v22 = vld [vmem:[%s3537_s1] sm:$0xff]  ;;  %s2730_s4 = smul.u32 72, %s3584_s13 }
  0x10   : > { %516 = vmatpush.bf16.msra.mxu0 %v2796_v3  ;;  %s2818_s29 = scalar_lea.vmem %s3536_s0, %s2729_s26  ;;  %630 = vmatpush.bf16.msra.mxu2 %v2810_v5  ;;  %v2875_v16 = vld [vmem:[%s3537_s1 + $0x50] sm:$0xff]  ;;  %v2891_v21 = vld [vmem:[%s3537_s1 + $0x48] sm:$0xff]  ;;  %v2902_v23 = vld [vmem:[%s3537_s1 + $0x40] sm:$0xff] }
  0x11   : > { %570 = vmatpush.bf16.msra.mxu1 %v2801_v4  ;;  %877 = vmatpush.bf16.msra.mxu3 %v2796_v3  ;;  %v1963_v7 = vld [vmem:[%s2818_s29 + $0x8] sm:$0xf]  ;;  %v2623_v8 = vld [vmem:[%s2818_s29 + $0x10] sm:$0xf0]  ;;  %v1975_v17 = vld [vmem:[%s2818_s29 + $0x20] sm:$0xf]  ;;  %s3422_s7 = scalar_lea.vmem %s3539_s3, %s2730_s4 }
  0x12   : > { %v1964_v10 = vor.u32 %v2623_v8, %v1963_v7  ;;  %v2626_v18 = vld [vmem:[%s2818_s29 + $0x28] sm:$0xf0]  ;;  %v1955_v24 = vld [vmem:[%s2818_s29] sm:$0xf]  ;;  %v2621_v26 = vld [vmem:[%s2818_s29 + $0x4] sm:$0xf] }
  0x13   : > { %v1976_v19 = vor.u32 %v2626_v18, %v1975_v17  ;;  %v2622_v25 = vld [vmem:[%s2818_s29 + $0x8] sm:$0xf0]  ;;  %v1957_v27 = vld [vmem:[%s2818_s29 + $0xc] sm:$0xf0]  ;;  %v2180_v28 = vld [vmem:[%s2818_s29 + $0xd8] sm:$0xf] }
  0x14   : > { %930 = vmatpush.bf16.msrb.mxu2 %v2784_v1  ;;  %517 = vmatpush.bf16.msra.mxu0 %v2823_v6  ;;  %v2649_v29 = vld [vmem:[%s2818_s29 + $0xe0] sm:$0xf0]  ;;  %v1956_v30 = vor.u32 %v2622_v25, %v1955_v24  ;;  %v1960_v31 = vor.u32 %v2621_v26, %v1957_v27  ;;  %v1987_v33 = vld [vmem:[%s2818_s29 + $0x38] sm:$0xf]  ;;  %v2624_v38 = vld [vmem:[%s2818_s29 + $0x1c] sm:$0xf] }
  0x15   : > { %2133 = vmatmul.msk.bf16.vlgmr.msra.gmra.mxu2 %vm487_vm0, %v1964_v10  ;;  %571 = vmatpush.bf16.msra.mxu1 %v2832_v9  ;;  %v2181_v32 = vor.u32 %v2649_v29, %v2180_v28  ;;  %v2629_v34 = vld [vmem:[%s2818_s29 + $0x40] sm:$0xf0]  ;;  %v1967_v36 = vld [vmem:[%s2818_s29 + $0x18] sm:$0xf]  ;;  %v1969_v39 = vld [vmem:[%s2818_s29 + $0x24] sm:$0xf0] }
  0x16   : > { %878 = vmatpush.bf16.msra.mxu3 %v2823_v6  ;;  %v1988_v35 = vor.u32 %v2629_v34, %v1987_v33  ;;  %v2625_v37 = vld [vmem:[%s2818_s29 + $0x20] sm:$0xf0]  ;;  %v2192_v40 = vld [vmem:[%s2818_s29 + $0xf0] sm:$0xf]  ;;  %v2652_v41 = vld [vmem:[%s2818_s29 + $0xf8] sm:$0xf0]  ;;  %v1972_v43 = vor.u32 %v2624_v38, %v1969_v39 }
  0x17   : > { %v1968_v42 = vor.u32 %v2625_v37, %v1967_v36  ;;  %v2193_v44 = vor.u32 %v2652_v41, %v2192_v40  ;;  %v1999_v45 = vld [vmem:[%s2818_s29 + $0x50] sm:$0xf]  ;;  %v2632_v46 = vld [vmem:[%s2818_s29 + $0x58] sm:$0xf0]  ;;  %v2627_v50 = vld [vmem:[%s2818_s29 + $0x34] sm:$0xf] }
  0x18   : > { %931 = vmatpush.bf16.msrb.mxu2 %v2801_v4  ;;  %518 = vmatpush.bf16.msra.mxu0 %v2840_v11  ;;  %v2000_v47 = vor.u32 %v2632_v46, %v1999_v45  ;;  %v1979_v48 = vld [vmem:[%s2818_s29 + $0x30] sm:$0xf]  ;;  %v2628_v49 = vld [vmem:[%s2818_s29 + $0x38] sm:$0xf0]  ;;  %v1981_v51 = vld [vmem:[%s2818_s29 + $0x3c] sm:$0xf0] }
  0x19   : > { %572 = vmatpush.bf16.msra.mxu1 %v2847_v12  ;;  %v2204_v52 = vld [vmem:[%s2818_s29 + $0x108] sm:$0xf]  ;;  %v2655_v53 = vld [vmem:[%s2818_s29 + $0x110] sm:$0xf0]  ;;  %v1980_v54 = vor.u32 %v2628_v49, %v1979_v48  ;;  %v1984_v55 = vor.u32 %v2627_v50, %v1981_v51  ;;  %v2630_v62 = vld [vmem:[%s2818_s29 + $0x4c] sm:$0xf] }
  0x1a   : > { %879 = vmatpush.bf16.msra.mxu3 %v2840_v11  ;;  %v2205_v56 = vor.u32 %v2655_v53, %v2204_v52  ;;  %v2011_v57 = vld [vmem:[%s2818_s29 + $0x68] sm:$0xf]  ;;  %v2635_v58 = vld [vmem:[%s2818_s29 + $0x70] sm:$0xf0]  ;;  %v1993_v63 = vld [vmem:[%s2818_s29 + $0x54] sm:$0xf0] }
  0x1b   : > { %v2012_v59 = vor.u32 %v2635_v58, %v2011_v57  ;;  %v1991_v60 = vld [vmem:[%s2818_s29 + $0x48] sm:$0xf]  ;;  %v2631_v61 = vld [vmem:[%s2818_s29 + $0x50] sm:$0xf0]  ;;  %v2003_v8 = vld [vmem:[%s2818_s29 + $0x60] sm:$0xf] }
  0x1c   : > { %932 = vmatpush.bf16.msrb.mxu2 %v2832_v9  ;;  %519 = vmatpush.bf16.msra.mxu0 %v2854_v13  ;;  %v2633_v10 = vld [vmem:[%s2818_s29 + $0x64] sm:$0xf]  ;;  %v2035_v17 = vld [vmem:[%s2818_s29 + $0x98] sm:$0xf]  ;;  %v2240_v24 = vld [vmem:[%s2818_s29 + $0x150] sm:$0xf] }
  0x1d   : > { %573 = vmatpush.bf16.msra.mxu1 %v2861_v14  ;;  %v2641_v18 = vld [vmem:[%s2818_s29 + $0xa0] sm:$0xf0]  ;;  %v2664_v25 = vld [vmem:[%s2818_s29 + $0x158] sm:$0xf0]  ;;  %v2047_v29 = vld [vmem:[%s2818_s29 + $0xb0] sm:$0xf] }
  0x1e   : > { %880 = vmatpush.bf16.msra.mxu3 %v2854_v13  ;;  %v2241_v28 = vor.u32 %v2664_v25, %v2240_v24  ;;  %v2640_v33 = vld [vmem:[%s2818_s29 + $0x98] sm:$0xf0]  ;;  %v2639_v34 = vld [vmem:[%s2818_s29 + $0x94] sm:$0xf]  ;;  %v2252_v36 = vld [vmem:[%s2818_s29 + $0x168] sm:$0xf] }
  0x1f   : > { %v2667_v37 = vld [vmem:[%s2818_s29 + $0x170] sm:$0xf0]  ;;  %v2059_v41 = vld [vmem:[%s2818_s29 + $0xc8] sm:$0xf]  ;;  %v2642_v46 = vld [vmem:[%s2818_s29 + $0xac] sm:$0xf] }
  0x20   : > { %933 = vmatpush.bf16.msrb.mxu2 %v2847_v12  ;;  %520 = vmatpush.bf16.msra.mxu0 %v2868_v15  ;;  %v2253_v40 = vor.u32 %v2667_v37, %v2252_v36  ;;  %v2643_v45 = vld [vmem:[%s2818_s29 + $0xb0] sm:$0xf0]  ;;  %v2264_v48 = vld [vmem:[%s2818_s29 + $0x180] sm:$0xf]  ;;  %v2670_v49 = vld [vmem:[%s2818_s29 + $0x188] sm:$0xf0] }
  0x21   : > { %574 = vmatpush.bf16.msra.mxu1 %v2875_v16  ;;  %v2265_v53 = vor.u32 %v2670_v49, %v2264_v48  ;;  %v2051_v58 = vld [vmem:[%s2818_s29 + $0xc0] sm:$0xf] }
  0x22   : > { %881 = vmatpush.bf16.msra.mxu3 %v2868_v15 }
  0x24   : > { %934 = vmatpush.bf16.msrb.mxu2 %v2861_v14  ;;  %521 = vmatpush.bf16.msra.mxu0 %v2884_v20 }
  0x25   : > { %2134 = vmatmul.msk.bf16.gmra.mxu2 %vm487_vm0, %v1976_v19  ;;  %575 = vmatpush.bf16.msra.mxu1 %v2891_v21  ;;  %v2036_v19 = vor.u32 %v2641_v18, %v2035_v17  ;;  %v2188_v17 = vld [vmem:[%s2818_s29 + $0xe0] sm:$0xf]  ;;  %v2650_v18 = vld [vmem:[%s2818_s29 + $0xe8] sm:$0xf0] }
  0x26   : > { %882 = vmatpush.bf16.msra.mxu3 %v2884_v20  ;;  %v2189_v25 = vor.u32 %v2650_v18, %v2188_v17 }
  0x28   : > { %935 = vmatpush.bf16.msrb.mxu2 %v2875_v16  ;;  %522 = vmatpush.bf16.msra.mxu0 %v2897_v22 }
  0x29   : > { %576 = vmatpush.bf16.msra.mxu1 %v2902_v23 }
  0x2a   : > { %883 = vmatpush.bf16.msra.mxu3 %v2897_v22 }
  0x2b   : > { %523 = vmatmul.bf16.vlgmr.msra.gmra.mxu0 %v1956_v30  ;;  %v2644_v30 = vld [vmem:[%s2818_s29 + $0xb8] sm:$0xf0] }
  0x2c   : > { %990 = vmatpush.bf16.msrb.mxu0 %v2789_v2  ;;  %577 = vmatmul.bf16.vlgmr.msra.gmra.mxu1 %v1960_v31  ;;  %v2048_v31 = vor.u32 %v2644_v30, %v2047_v29 }
  0x2d   : > { %1255 = vmatpush.bf16.msrb.mxu1 %v2779_v0  ;;  %884 = vmatmul.bf16.vlgmr.msra.gmra.mxu3 %v2181_v32  ;;  %v2027_v32 = vld [vmem:[%s2818_s29 + $0x90] sm:$0xf] }
  0x2e   : > { %1309 = vmatpush.bf16.msrb.mxu3 %v2784_v1  ;;  %936 = vmatpush.bf16.msrb.mxu2 %v2891_v21  ;;  %v2028_v38 = vor.u32 %v2640_v33, %v2027_v32  ;;  %v2654_v32 = vld [vmem:[%s2818_s29 + $0x10c] sm:$0xf]  ;;  %v2206_v33 = vld [vmem:[%s2818_s29 + $0x114] sm:$0xf0] }
  0x2f   : > { %v2209_v37 = vor.u32 %v2654_v32, %v2206_v33  ;;  %v2369_v32 = vld [vmem:[%s2818_s29 + $0x1f8] sm:$0xf]  ;;  %v2685_v33 = vld [vmem:[%s2818_s29 + $0x200] sm:$0xf0] }
  0x30   : > { %991 = vmatpush.bf16.msrb.mxu0 %v2810_v5 }
  0x31   : > { %1256 = vmatpush.bf16.msrb.mxu1 %v2796_v3 }
  0x32   : > { %1310 = vmatpush.bf16.msrb.mxu3 %v2801_v4  ;;  %937 = vmatpush.bf16.msrb.mxu2 %v2902_v23 }
  0x34   : > { %1634 = vmatpush.bf16.msra.mxu0 %v2779_v0  ;;  %v2216_v0 = vld [vmem:[%s2818_s29 + $0x120] sm:$0xf] }
  0x35   : > { %1257 = vmatpush.bf16.msrb.mxu1 %v2823_v6  ;;  %2135 = vmatmul.msk.bf16.gmra.mxu2 %vm487_vm0, %v1988_v35  ;;  %v2029_v35 = vld [vmem:[%s2818_s29 + $0x9c] sm:$0xf0] }
  0x36   : > { %1311 = vmatpush.bf16.msrb.mxu3 %v2832_v9  ;;  %1369 = vmatpush.bf16.msra.mxu2 %v2789_v2  ;;  %v2032_v39 = vor.u32 %v2639_v34, %v2029_v35 }
  0x38   : > { %1635 = vmatpush.bf16.msra.mxu0 %v2796_v3  ;;  %v1996_v3 = vor.u32 %v2630_v62, %v1993_v63  ;;  %v2276_v62 = vld [vmem:[%s2818_s29 + $0x198] sm:$0xf]  ;;  %v2673_v63 = vld [vmem:[%s2818_s29 + $0x1a0] sm:$0xf0] }
  0x39   : > { %1258 = vmatpush.bf16.msrb.mxu1 %v2840_v11 }
  0x3a   : > { %1312 = vmatpush.bf16.msrb.mxu3 %v2847_v12  ;;  %1370 = vmatpush.bf16.msra.mxu2 %v2810_v5 }
  0x3b   : > { %528 = vmatmul.bf16.gmra.mxu0 %v1968_v42  ;;  %v2647_v42 = vld [vmem:[%s2818_s29 + $0xd0] sm:$0xf0] }
  0x3c   : > { %1636 = vmatpush.bf16.msra.mxu0 %v2823_v6  ;;  %582 = vmatmul.bf16.gmra.mxu1 %v1972_v43  ;;  %v2638_v6 = vld [vmem:[%s2818_s29 + $0x88] sm:$0xf0]  ;;  %v2060_v43 = vor.u32 %v2647_v42, %v2059_v41  ;;  %v2200_v41 = vld [vmem:[%s2818_s29 + $0xf8] sm:$0xf]  ;;  %v2653_v42 = vld [vmem:[%s2818_s29 + $0x100] sm:$0xf0] }
  0x3d   : > { %1259 = vmatpush.bf16.msrb.mxu1 %v2854_v13  ;;  %889 = vmatmul.bf16.gmra.mxu3 %v2193_v44  ;;  %v2039_v44 = vld [vmem:[%s2818_s29 + $0xa8] sm:$0xf]  ;;  %v2201_v49 = vor.u32 %v2653_v42, %v2200_v41  ;;  %v2370_v42 = vor.u32 %v2685_v33, %v2369_v32  ;;  %v2691_v32 = vld [vmem:[%s2818_s29 + $0x230] sm:$0xf0]  ;;  %v2690_v33 = vld [vmem:[%s2818_s29 + $0x22c] sm:$0xf] }
  0x3e   : > { %1313 = vmatpush.bf16.msrb.mxu3 %v2861_v14  ;;  %v2040_v51 = vor.u32 %v2643_v45, %v2039_v44  ;;  %v2679_v44 = vld [vmem:[%s2818_s29 + $0x1d0] sm:$0xf0]  ;;  %v2678_v45 = vld [vmem:[%s2818_s29 + $0x1cc] sm:$0xf] }
  0x40   : > { %1637 = vmatpush.bf16.msra.mxu0 %v2840_v11  ;;  %v2005_v11 = vld [vmem:[%s2818_s29 + $0x6c] sm:$0xf0] }
  0x41   : > { %1260 = vmatpush.bf16.msrb.mxu1 %v2868_v15 }
  0x42   : > { %1314 = vmatpush.bf16.msrb.mxu3 %v2875_v16 }
  0x44   : > { %1638 = vmatpush.bf16.msra.mxu0 %v2854_v13  ;;  %v2661_v13 = vld [vmem:[%s2818_s29 + $0x140] sm:$0xf0] }
  0x45   : > { %1261 = vmatpush.bf16.msrb.mxu1 %v2884_v20  ;;  %2136 = vmatmul.msk.bf16.gmra.mxu2 %vm487_vm0, %v2000_v47  ;;  %v2041_v47 = vld [vmem:[%s2818_s29 + $0xb4] sm:$0xf0] }
  0x46   : > { %1315 = vmatpush.bf16.msrb.mxu3 %v2891_v21  ;;  %v2044_v52 = vor.u32 %v2642_v46, %v2041_v47  ;;  %v2347_v46 = vld [vmem:[%s2818_s29 + $0x1d4] sm:$0xf0] }
  0x48   : > { %1639 = vmatpush.bf16.msra.mxu0 %v2868_v15  ;;  %v2008_v15 = vor.u32 %v2633_v10, %v2005_v11 }
  0x49   : > { %1262 = vmatpush.bf16.msrb.mxu1 %v2897_v22 }
  0x4a   : > { %1316 = vmatpush.bf16.msrb.mxu3 %v2902_v23 }
  0x4b   : > { %533 = vmatmul.bf16.gmra.mxu0 %v1980_v54  ;;  %v2648_v54 = vld [vmem:[%s2818_s29 + $0xdc] sm:$0xf] }
  0x4c   : > { %1640 = vmatpush.bf16.msra.mxu0 %v2884_v20  ;;  %587 = vmatmul.bf16.gmra.mxu1 %v1984_v55  ;;  %v2015_v20 = vld [vmem:[%s2818_s29 + $0x78] sm:$0xf]  ;;  %v2182_v55 = vld [vmem:[%s2818_s29 + $0xe4] sm:$0xf0] }
  0x4d   : > { %1688 = vmatpush.bf16.msra.mxu1 %v2784_v1  ;;  %894 = vmatmul.bf16.gmra.mxu3 %v2205_v56  ;;  %v2658_v1 = vld [vmem:[%s2818_s29 + $0x128] sm:$0xf0]  ;;  %v2185_v57 = vor.u32 %v2648_v54, %v2182_v55 }
  0x4e   : > { %1748 = vmatpush.bf16.msra.mxu3 %v2789_v2  ;;  %v1992_v2 = vor.u32 %v2631_v61, %v1991_v60  ;;  %v2645_v60 = vld [vmem:[%s2818_s29 + $0xc4] sm:$0xf]  ;;  %v2053_v61 = vld [vmem:[%s2818_s29 + $0xcc] sm:$0xf0] }
  0x50   : > { %1641 = vmatpush.bf16.msra.mxu0 %v2897_v22  ;;  %v2636_v22 = vld [vmem:[%s2818_s29 + $0x7c] sm:$0xf] }
  0x51   : > { %1689 = vmatpush.bf16.msra.mxu1 %v2801_v4  ;;  %v2217_v4 = vor.u32 %v2658_v1, %v2216_v0 }
  0x52   : > { %1749 = vmatpush.bf16.msra.mxu3 %v2810_v5  ;;  %v2023_v5 = vld [vmem:[%s2818_s29 + $0x80] sm:$0xf] }
  0x53   : > { %v2024_v7 = vor.u32 %v2638_v6, %v2023_v5 }
  0x55   : > { %1690 = vmatpush.bf16.msra.mxu1 %v2832_v9  ;;  %2137 = vmatmul.msk.bf16.gmra.mxu2 %vm487_vm0, %v2012_v59  ;;  %v2634_v9 = vld [vmem:[%s2818_s29 + $0x68] sm:$0xf0] }
  0x56   : > { %v2646_v59 = vld [vmem:[%s2818_s29 + $0xc8] sm:$0xf0] }
  0x57   : > { %v2052_v1 = vor.u32 %v2646_v59, %v2051_v58 }
  0x59   : > { %1691 = vmatpush.bf16.msra.mxu1 %v2847_v12  ;;  %v2228_v12 = vld [vmem:[%s2818_s29 + $0x138] sm:$0xf] }
  0x5b   : > { %538 = vmatmul.bf16.gmra.mxu0 %v1992_v2 }
  0x5c   : > { %592 = vmatmul.bf16.gmra.mxu1 %v1996_v3  ;;  %v2056_v3 = vor.u32 %v2645_v60, %v2053_v61 }
  0x5d   : > { %1692 = vmatpush.bf16.msra.mxu1 %v2861_v14  ;;  %899 = vmatmul.bf16.gmra.mxu3 %v2217_v4  ;;  %v2004_v14 = vor.u32 %v2634_v9, %v2003_v8  ;;  %v2277_v4 = vor.u32 %v2673_v63, %v2276_v62  ;;  %v2651_v8 = vld [vmem:[%s2818_s29 + $0xf4] sm:$0xf]  ;;  %v2194_v9 = vld [vmem:[%s2818_s29 + $0xfc] sm:$0xf0] }
  0x61   : > { %1693 = vmatpush.bf16.msra.mxu1 %v2875_v16  ;;  %v2229_v16 = vor.u32 %v2661_v13, %v2228_v12  ;;  %v2197_v13 = vor.u32 %v2651_v8, %v2194_v9 }
  0x65   : > { %1694 = vmatpush.bf16.msra.mxu1 %v2891_v21  ;;  %2138 = vmatmul.msk.bf16.gmra.mxu2 %vm487_vm0, %v2024_v7  ;;  %v2637_v21 = vld [vmem:[%s2818_s29 + $0x80] sm:$0xf0] }
  0x66   : > { %v2016_v26 = vor.u32 %v2637_v21, %v2015_v20  ;;  %v2676_v20 = vld [vmem:[%s2818_s29 + $0x1b8] sm:$0xf0]  ;;  %v2675_v21 = vld [vmem:[%s2818_s29 + $0x1b4] sm:$0xf] }
  0x69   : > { %1695 = vmatpush.bf16.msra.mxu1 %v2902_v23  ;;  %v2017_v23 = vld [vmem:[%s2818_s29 + $0x84] sm:$0xf0] }
  0x6a   : > { %v2020_v27 = vor.u32 %v2636_v22, %v2017_v23  ;;  %v2335_v22 = vld [vmem:[%s2818_s29 + $0x1bc] sm:$0xf0] }
  0x6b   : > { %543 = vmatmul.bf16.gmra.mxu0 %v2004_v14 }
  0x6c   : > { %597 = vmatmul.bf16.gmra.mxu1 %v2008_v15 }
  0x6d   : > { %904 = vmatmul.bf16.gmra.mxu3 %v2229_v16 }
  0x75   : > { %2139 = vmatmul.msk.bf16.gmra.mxu2 %vm487_vm0, %v2036_v19  ;;  %v2333_v19 = vld [vmem:[%s2818_s29 + $0x1b0] sm:$0xf] }
  0x7b   : > { %548 = vmatmul.bf16.gmra.mxu0 %v2016_v26 }
  0x7c   : > { %602 = vmatmul.bf16.gmra.mxu1 %v2020_v27  ;;  %v2334_v27 = vor.u32 %v2676_v20, %v2333_v19  ;;  %v2660_v19 = vld [vmem:[%s2818_s29 + $0x13c] sm:$0xf]  ;;  %v2230_v20 = vld [vmem:[%s2818_s29 + $0x144] sm:$0xf0] }
  0x7d   : > { %909 = vmatmul.bf16.gmra.mxu3 %v2241_v28  ;;  %v2338_v28 = vor.u32 %v2675_v21, %v2335_v22 }
  0x85   : > { %2140 = vmatmul.msk.bf16.gmra.mxu2 %vm487_vm0, %v2048_v31 }
  0x8b   : > { %553 = vmatmul.bf16.gmra.mxu0 %v2028_v38 }
  0x8c   : > { %607 = vmatmul.bf16.gmra.mxu1 %v2032_v39 }
  0x8d   : > { %914 = vmatmul.bf16.gmra.mxu3 %v2253_v40 }
  0x95   : > { %2141 = vmatmul.msk.bf16.gmra.mxu2 %vm487_vm0, %v2060_v43  ;;  %v2345_v43 = vld [vmem:[%s2818_s29 + $0x1c8] sm:$0xf] }
  0x98   : > { %v632_v50 = vpop.f32.mrf.mxu2 }
  0x9b   : > { %558 = vmatmul.bf16.gmra.mxu0 %v2040_v51  ;;  %v2346_v51 = vor.u32 %v2679_v44, %v2345_v43 }
  0x9c   : > { %612 = vmatmul.bf16.gmra.mxu1 %v2044_v52  ;;  %v2350_v52 = vor.u32 %v2678_v45, %v2347_v46 }
  0x9d   : > { %919 = vmatmul.bf16.gmra.mxu3 %v2265_v53 }
  0xa0   : > { %v634_v56 = vpop.f32.mrf.mxu2 }
  0xa5   : > { %938 = vmatmul.bf16.vlgmr.msrb.gmra.mxu2 %v2185_v57  ;;  %v2218_v57 = vld [vmem:[%s2818_s29 + $0x12c] sm:$0xf0] }
  0xa8   : > { %v637_v0 = vpop.f32.mrf.mxu2  ;;  %v524_v2 = vpop.f32.mrf.mxu0 }
  0xa9   : > { %v578_v5 = vpop.f32.mrf.mxu1 }
  0xaa   : > { %v579_v6 = vadd.f32 %v578_v5, %v524_v2  ;;  %v2656_v2 = vld [vmem:[%s2818_s29 + $0x118] sm:$0xf0]  ;;  %v2681_v5 = vld [vmem:[%s2818_s29 + $0x1e4] sm:$0xf] }
  0xab   : > { %563 = vmatmul.bf16.gmra.mxu0 %v2052_v1  ;;  %v2212_v1 = vld [vmem:[%s2818_s29 + $0x110] sm:$0xf] }
  0xac   : > { %v3029_v7 = vadd.f32 %v632_v50, %v579_v6  ;;  %617 = vmatmul.bf16.gmra.mxu1 %v2056_v3  ;;  %v2357_v3 = vld [vmem:[%s2818_s29 + $0x1e0] sm:$0xf]  ;;  %v2359_v6 = vld [vmem:[%s2818_s29 + $0x1ec] sm:$0xf0] }
  0xad   : > { %924 = vmatmul.bf16.gmra.mxu3 %v2277_v4  ;;  %v2682_v4 = vld [vmem:[%s2818_s29 + $0x1e8] sm:$0xf0] }
  0xb0   : > { %v639_v10 = vpop.f32.mrf.mxu2  ;;  %v3033_v11 = vpop.f32.mrf.mxu3 }
  0xb1   : > { %v526_v12 = vpop.f32.mrf.mxu0  ;;  %v580_v14 = vpop.f32.mrf.mxu1 }
  0xb2   : > { %v581_v15 = vadd.f32 %v580_v14, %v526_v12  ;;  %v2362_v14 = vor.u32 %v2681_v5, %v2359_v6 }
  0xb4   : > { %v3035_v16 = vadd.f32 %v634_v56, %v581_v15  ;;  %v2657_v56 = vld [vmem:[%s2818_s29 + $0x124] sm:$0xf] }
  0xb5   : > { %943 = vmatmul.bf16.gmra.mxu2 %v2197_v13  ;;  %v2221_v61 = vor.u32 %v2657_v56, %v2218_v57  ;;  %v2358_v13 = vor.u32 %v2682_v4, %v2357_v3 }
  0xb8   : > { %v642_v23 = vpop.f32.mrf.mxu2  ;;  %v3043_v24 = vpop.f32.mrf.mxu3 }
  0xb9   : > { %v529_v26 = vpop.f32.mrf.mxu0  ;;  %v583_v29 = vpop.f32.mrf.mxu1 }
  0xba   : > { %v584_v30 = vadd.f32 %v583_v29, %v529_v26  ;;  %v2224_v29 = vld [vmem:[%s2818_s29 + $0x128] sm:$0xf] }
  0xbb   : > { %2286 = vmatmul.msk.bf16.vlgmr.msrb.gmra.mxu0 %vm487_vm0, %v2189_v25  ;;  %v2233_v25 = vor.u32 %v2660_v19, %v2230_v20 }
  0xbc   : > { %v3046_v31 = vadd.f32 %v637_v0, %v584_v30  ;;  %1263 = vmatmul.bf16.vlgmr.msrb.gmra.mxu1 %v2334_v27  ;;  %v2659_v30 = vld [vmem:[%s2818_s29 + $0x130] sm:$0xf0] }
  0xbd   : > { %1317 = vmatmul.bf16.vlgmr.msrb.gmra.mxu3 %v2338_v28 }
  0xc0   : > { %v644_v34 = vpop.f32.mrf.mxu2  ;;  %v3050_v35 = vpop.f32.mrf.mxu3 }
  0xc1   : > { %v531_v36 = vpop.f32.mrf.mxu0  ;;  %v585_v38 = vpop.f32.mrf.mxu1 }
  0xc2   : > { %v586_v39 = vadd.f32 %v585_v38, %v531_v36  ;;  %v2371_v36 = vld [vmem:[%s2818_s29 + $0x204] sm:$0xf0] }
  0xc4   : > { %v3052_v40 = vadd.f32 %v639_v10, %v586_v39  ;;  %v2213_v10 = vor.u32 %v2656_v2, %v2212_v1  ;;  %v2225_v39 = vor.u32 %v2659_v30, %v2224_v29  ;;  %v2383_v1 = vld [vmem:[%s2818_s29 + $0x21c] sm:$0xf0]  ;;  %v2665_v29 = vld [vmem:[%s2818_s29 + $0x160] sm:$0xf0]  ;;  %v2393_v30 = vld [vmem:[%s2818_s29 + $0x228] sm:$0xf] }
  0xc5   : > { %948 = vmatmul.bf16.gmra.mxu2 %v2209_v37 }
  0xc8   : > { %v647_v47 = vpop.f32.mrf.mxu2  ;;  %v3060_v48 = vpop.f32.mrf.mxu3 }
  0xc9   : > { %v534_v50 = vpop.f32.mrf.mxu0  ;;  %v588_v53 = vpop.f32.mrf.mxu1 }
  0xca   : > { %v589_v54 = vadd.f32 %v588_v53, %v534_v50 }
  0xcb   : > { %2287 = vmatmul.msk.bf16.gmra.mxu0 %vm487_vm0, %v2201_v49  ;;  %v2242_v49 = vld [vmem:[%s2818_s29 + $0x15c] sm:$0xf0] }
  0xcc   : > { %v3063_v55 = vadd.f32 %v642_v23, %v589_v54  ;;  %1268 = vmatmul.bf16.gmra.mxu1 %v2346_v51 }
  0xcd   : > { %1322 = vmatmul.bf16.gmra.mxu3 %v2350_v52 }
  0xd0   : > { %v649_v58 = vpop.f32.mrf.mxu2  ;;  %v3067_v59 = vpop.f32.mrf.mxu3 }
  0xd1   : > { %v536_v60 = vpop.f32.mrf.mxu0  ;;  %v590_v62 = vpop.f32.mrf.mxu1 }
  0xd2   : > { %v591_v63 = vadd.f32 %v590_v62, %v536_v60  ;;  %v2662_v60 = vld [vmem:[%s2818_s29 + $0x148] sm:$0xf0]  ;;  %v2688_v62 = vld [vmem:[%s2818_s29 + $0x218] sm:$0xf0] }
  0xd4   : > { %v3069_v0 = vadd.f32 %v644_v34, %v591_v63  ;;  %v2684_v34 = vld [vmem:[%s2818_s29 + $0x1fc] sm:$0xf]  ;;  %v2687_v63 = vld [vmem:[%s2818_s29 + $0x214] sm:$0xf] }
  0xd5   : > { %953 = vmatmul.bf16.gmra.mxu2 %v2221_v61  ;;  %v2374_v43 = vor.u32 %v2684_v34, %v2371_v36  ;;  %v2381_v61 = vld [vmem:[%s2818_s29 + $0x210] sm:$0xf]  ;;  %v2395_v34 = vld [vmem:[%s2818_s29 + $0x234] sm:$0xf0] }
  0xd6   : > { %v2382_v6 = vor.u32 %v2688_v62, %v2381_v61  ;;  %v2260_v62 = vld [vmem:[%s2818_s29 + $0x170] sm:$0xf] }
  0xd8   : > { %v652_v8 = vpop.f32.mrf.mxu2  ;;  %v3077_v9 = vpop.f32.mrf.mxu3 }
  0xd9   : > { %v539_v12 = vpop.f32.mrf.mxu0  ;;  %v593_v15 = vpop.f32.mrf.mxu1 }
  0xda   : > { %v594_v17 = vadd.f32 %v593_v15, %v539_v12  ;;  %v2254_v15 = vld [vmem:[%s2818_s29 + $0x174] sm:$0xf0] }
  0xdb   : > { %2288 = vmatmul.msk.bf16.gmra.mxu0 %vm487_vm0, %v2213_v10 }
  0xdc   : > { %v3080_v18 = vadd.f32 %v647_v47, %v594_v17  ;;  %1273 = vmatmul.bf16.gmra.mxu1 %v2358_v13  ;;  %v2663_v47 = vld [vmem:[%s2818_s29 + $0x154] sm:$0xf] }
  0xdd   : > { %1327 = vmatmul.bf16.gmra.mxu3 %v2362_v14  ;;  %v2245_v53 = vor.u32 %v2663_v47, %v2242_v49  ;;  %v2666_v14 = vld [vmem:[%s2818_s29 + $0x16c] sm:$0xf]  ;;  %v2669_v49 = vld [vmem:[%s2818_s29 + $0x184] sm:$0xf] }
  0xe0   : > { %v654_v21 = vpop.f32.mrf.mxu2  ;;  %v3084_v22 = vpop.f32.mrf.mxu3 }
  0xe1   : > { %v541_v23 = vpop.f32.mrf.mxu0  ;;  %v595_v26 = vpop.f32.mrf.mxu1 }
  0xe2   : > { %v596_v27 = vadd.f32 %v595_v26, %v541_v23 }
  0xe4   : > { %v3086_v28 = vadd.f32 %v649_v58, %v596_v27  ;;  %v2236_v58 = vld [vmem:[%s2818_s29 + $0x140] sm:$0xf]  ;;  %v2248_v27 = vld [vmem:[%s2818_s29 + $0x158] sm:$0xf] }
  0xe5   : > { %958 = vmatmul.bf16.gmra.mxu2 %v2233_v25  ;;  %v2237_v4 = vor.u32 %v2662_v60, %v2236_v58 }
  0xe8   : > { %v657_v37 = vpop.f32.mrf.mxu2  ;;  %v3094_v38 = vpop.f32.mrf.mxu3 }
  0xe9   : > { %v544_v41 = vpop.f32.mrf.mxu0  ;;  %v598_v44 = vpop.f32.mrf.mxu1 }
  0xea   : > { %v599_v45 = vadd.f32 %v598_v44, %v544_v41 }
  0xeb   : > { %2289 = vmatmul.msk.bf16.gmra.mxu0 %vm487_vm0, %v2225_v39  ;;  %v2249_v39 = vor.u32 %v2665_v29, %v2248_v27 }
  0xec   : > { %v3097_v46 = vadd.f32 %v652_v8, %v599_v45  ;;  %1278 = vmatmul.bf16.gmra.mxu1 %v2370_v42  ;;  %v2386_v8 = vor.u32 %v2687_v63, %v2383_v1  ;;  %v2394_v42 = vor.u32 %v2691_v32, %v2393_v30  ;;  %v2668_v63 = vld [vmem:[%s2818_s29 + $0x178] sm:$0xf0]  ;;  %v2405_v1 = vld [vmem:[%s2818_s29 + $0x240] sm:$0xf] }
  0xed   : > { %1332 = vmatmul.bf16.gmra.mxu3 %v2374_v43  ;;  %v2398_v43 = vor.u32 %v2690_v33, %v2395_v34 }
  0xf0   : > { %v659_v50 = vpop.f32.mrf.mxu2  ;;  %v3101_v51 = vpop.f32.mrf.mxu3 }
  0xf1   : > { %v546_v52 = vpop.f32.mrf.mxu0  ;;  %v600_v54 = vpop.f32.mrf.mxu1 }
  0xf2   : > { %v601_v56 = vadd.f32 %v600_v54, %v546_v52 }
  0xf4   : > { %v3103_v57 = vadd.f32 %v654_v21, %v601_v56  ;;  %v2257_v21 = vor.u32 %v2666_v14, %v2254_v15 }
  0xf5   : > { %963 = vmatmul.bf16.gmra.mxu2 %v2245_v53 }
  0xf8   : > { %v662_v2 = vpop.f32.mrf.mxu2  ;;  %v3111_v3 = vpop.f32.mrf.mxu3 }
  0xf9   : > { %v549_v5 = vpop.f32.mrf.mxu0  ;;  %v603_v10 = vpop.f32.mrf.mxu1 }
  0xfa   : > { %v604_v12 = vadd.f32 %v603_v10, %v549_v5  ;;  %v2407_v5 = vld [vmem:[%s2818_s29 + $0x24c] sm:$0xf0]  ;;  %v2261_v10 = vor.u32 %v2668_v63, %v2260_v62 }
  0xfb   : > { %2290 = vmatmul.msk.bf16.gmra.mxu0 %vm487_vm0, %v2237_v4  ;;  %v2693_v4 = vld [vmem:[%s2818_s29 + $0x244] sm:$0xf] }
  0xfc   : > { %v3114_v13 = vadd.f32 %v657_v37, %v604_v12  ;;  %1283 = vmatmul.bf16.gmra.mxu1 %v2382_v6  ;;  %v2410_v15 = vor.u32 %v2693_v4, %v2407_v5 }
  0xfd   : > { %1337 = vmatmul.bf16.gmra.mxu3 %v2386_v8 }
 0x100   : > { %v664_v17 = vpop.f32.mrf.mxu2  ;;  %v3118_v19 = vpop.f32.mrf.mxu3 }
 0x101   : > { %v551_v20 = vpop.f32.mrf.mxu0  ;;  %v605_v23 = vpop.f32.mrf.mxu1 }
 0x102   : > { %v606_v25 = vadd.f32 %v605_v23, %v551_v20  ;;  %v2672_v23 = vld [vmem:[%s2818_s29 + $0x19c] sm:$0xf] }
 0x104   : > { %v3120_v26 = vadd.f32 %v659_v50, %v606_v25  ;;  %v2266_v50 = vld [vmem:[%s2818_s29 + $0x18c] sm:$0xf0]  ;;  %v2278_v25 = vld [vmem:[%s2818_s29 + $0x1a4] sm:$0xf0] }
 0x105   : > { %968 = vmatmul.bf16.gmra.mxu2 %v2257_v21  ;;  %v2269_v56 = vor.u32 %v2669_v49, %v2266_v50  ;;  %v2281_v32 = vor.u32 %v2672_v23, %v2278_v25  ;;  %v2429_v23 = vld [vmem:[%s2818_s29 + $0x270] sm:$0xf]  ;;  %v2700_v25 = vld [vmem:[%s2818_s29 + $0x278] sm:$0xf0] }
 0x106   : > { %3549 = vst [vmem:[#allocation2_spill] sm:$0xff] %v3120_v26  ;;  %v2566_v26 = vld [vmem:[%s2818_s29 + $0x320] sm:$0xf] }
 0x108   : > { %v667_v36 = vpop.f32.mrf.mxu2  ;;  %v3128_v37 = vpop.f32.mrf.mxu3 }
 0x109   : > { %v554_v41 = vpop.f32.mrf.mxu0  ;;  %v608_v44 = vpop.f32.mrf.mxu1 }
 0x10a   : > { %v609_v45 = vadd.f32 %v608_v44, %v554_v41  ;;  %v2272_v41 = vld [vmem:[%s2818_s29 + $0x188] sm:$0xf]  ;;  %v2696_v44 = vld [vmem:[%s2818_s29 + $0x25c] sm:$0xf] }
 0x10b   : > { %2291 = vmatmul.msk.bf16.gmra.mxu0 %vm487_vm0, %v2249_v39 }
 0x10c   : > { %v3131_v47 = vadd.f32 %v662_v2, %v609_v45  ;;  %1288 = vmatmul.bf16.gmra.mxu1 %v2394_v42  ;;  %v2694_v2 = vld [vmem:[%s2818_s29 + $0x248] sm:$0xf0]  ;;  %v2417_v42 = vld [vmem:[%s2818_s29 + $0x258] sm:$0xf]  ;;  %v2419_v45 = vld [vmem:[%s2818_s29 + $0x264] sm:$0xf0] }
 0x10d   : > { %1342 = vmatmul.bf16.gmra.mxu3 %v2398_v43  ;;  %v2406_v14 = vor.u32 %v2694_v2, %v2405_v1  ;;  %v2697_v43 = vld [vmem:[%s2818_s29 + $0x260] sm:$0xf0]  ;;  %v2341_v1 = vld [vmem:[%s2818_s29 + $0x1b8] sm:$0xf] }
 0x10e   : > { %v2677_v2 = vld [vmem:[%s2818_s29 + $0x1c0] sm:$0xf0] }
 0x110   : > { %v669_v52 = vpop.f32.mrf.mxu2  ;;  %v3135_v53 = vpop.f32.mrf.mxu3 }
 0x111   : > { %v556_v54 = vpop.f32.mrf.mxu0  ;;  %v610_v58 = vpop.f32.mrf.mxu1 }
 0x112   : > { %v611_v60 = vadd.f32 %v610_v58, %v556_v54  ;;  %v2418_v58 = vor.u32 %v2697_v43, %v2417_v42  ;;  %v2430_v43 = vor.u32 %v2700_v25, %v2429_v23  ;;  %v2494_v23 = vld [vmem:[%s2818_s29 + $0x290] sm:$0xf] }
 0x114   : > { %v3137_v61 = vadd.f32 %v664_v17, %v611_v60  ;;  %v2422_v60 = vor.u32 %v2696_v44, %v2419_v45 }
 0x115   : > { %973 = vmatmul.bf16.gmra.mxu2 %v2269_v56 }
 0x116   : > { %3550 = vst [vmem:[#allocation3_spill] sm:$0xff] %v3137_v61  ;;  %v2578_v61 = vld [vmem:[%s2818_s29 + $0x338] sm:$0xf] }
 0x118   : > { %v672_v6 = vpop.f32.mrf.mxu2  ;;  %v3145_v8 = vpop.f32.mrf.mxu3 }
 0x119   : > { %v559_v12 = vpop.f32.mrf.mxu0  ;;  %v613_v20 = vpop.f32.mrf.mxu1 }
 0x11a   : > { %v614_v17 = vadd.f32 %v613_v20, %v559_v12  ;;  %v2342_v12 = vor.u32 %v2677_v2, %v2341_v1 }
 0x11b   : > { %2292 = vmatmul.msk.bf16.gmra.mxu0 %vm487_vm0, %v2261_v10 }
 0x11c   : > { %v3148_v21 = vadd.f32 %v667_v36, %v614_v17  ;;  %1293 = vmatmul.bf16.gmra.mxu1 %v2406_v14  ;;  %v2671_v36 = vld [vmem:[%s2818_s29 + $0x190] sm:$0xf0]  ;;  %v2674_v17 = vld [vmem:[%s2818_s29 + $0x1a8] sm:$0xf0] }
 0x11d   : > { %1347 = vmatmul.bf16.gmra.mxu3 %v2410_v15  ;;  %v2273_v54 = vor.u32 %v2671_v36, %v2272_v41 }
 0x11e   : > { %3551 = vst [vmem:[#allocation4_spill] sm:$0xff] %v3148_v21 }
 0x120   : > { %v674_v27 = vpop.f32.mrf.mxu2  ;;  %v3152_v29 = vpop.f32.mrf.mxu3 }
 0x121   : > { %v561_v30 = vpop.f32.mrf.mxu0  ;;  %v615_v33 = vpop.f32.mrf.mxu1 }
 0x122   : > { %v616_v34 = vadd.f32 %v615_v33, %v561_v30  ;;  %v2699_v30 = vld [vmem:[%s2818_s29 + $0x274] sm:$0xf] }
 0x124   : > { %v3154_v39 = vadd.f32 %v669_v52, %v616_v34 }
 0x125   : > { %978 = vmatmul.bf16.gmra.mxu2 %v2281_v32  ;;  %v2431_v32 = vld [vmem:[%s2818_s29 + $0x27c] sm:$0xf0] }
 0x126   : > { %3552 = vst [vmem:[#allocation5_spill] sm:$0xff] %v3154_v39 }
 0x128   : > { %v3162_v49 = vpop.f32.mrf.mxu3  ;;  %v939_v50 = vpop.f32.mrf.mxu2 }
 0x129   : > { %v564_v56 = vpop.f32.mrf.mxu0  ;;  %v618_v62 = vpop.f32.mrf.mxu1  ;;  %v940_v33 = vadd.f32 %v939_v50, %v3033_v11  ;;  %v2353_v11 = vld [vmem:[%s2818_s29 + $0x1d0] sm:$0xf]  ;;  %v2680_v50 = vld [vmem:[%s2818_s29 + $0x1d8] sm:$0xf0] }
 0x12a   : > { %v619_v52 = vadd.f32 %v618_v62, %v564_v56  ;;  %v2354_v1 = vor.u32 %v2680_v50, %v2353_v11 }
 0x12b   : > { %2293 = vmatmul.msk.bf16.gmra.mxu0 %vm487_vm0, %v2273_v54 }
 0x12c   : > { %v3165_v63 = vadd.f32 %v672_v6, %v619_v52  ;;  %1298 = vmatmul.bf16.gmra.mxu1 %v2418_v58  ;;  %v2284_v6 = vld [vmem:[%s2818_s29 + $0x1a0] sm:$0xf] }
 0x12d   : > { %1352 = vmatmul.bf16.gmra.mxu3 %v2422_v60  ;;  %v2285_v36 = vor.u32 %v2674_v17, %v2284_v6  ;;  %v2702_v6 = vld [vmem:[%s2818_s29 + $0x28c] sm:$0xf]  ;;  %v2488_v17 = vld [vmem:[%s2818_s29 + $0x294] sm:$0xf0] }
 0x130   : > { %v3169_v4 = vpop.f32.mrf.mxu3  ;;  %v941_v5 = vpop.f32.mrf.mxu2 }
 0x131   : > { %v566_v10 = vpop.f32.mrf.mxu0  ;;  %v620_v14 = vpop.f32.mrf.mxu1  ;;  %v942_v56 = vadd.f32 %v941_v5, %v3043_v24  ;;  %v2704_v24 = vld [vmem:[%s2818_s29 + $0x298] sm:$0xf0] }
 0x132   : > { %v621_v15 = vadd.f32 %v620_v14, %v566_v10  ;;  %v2486_v14 = vld [vmem:[%s2818_s29 + $0x288] sm:$0xf] }
 0x134   : > { %v3171_v20 = vadd.f32 %v674_v27, %v621_v15  ;;  %v2434_v27 = vor.u32 %v2699_v30, %v2431_v32  ;;  %v2703_v15 = vld [vmem:[%s2818_s29 + $0x290] sm:$0xf0] }
 0x135   : > { %2439 = vmatmul.msk.bf16.vlgmr.msra.gmra.mxu2 %vm487_vm0, %v2342_v12  ;;  %v2487_v32 = vor.u32 %v2703_v15, %v2486_v14  ;;  %v2542_v12 = vld [vmem:[%s2818_s29 + $0x2f0] sm:$0xf] }
 0x138   : > { %v3181_v34 = vpop.f32.mrf.mxu3  ;;  %v944_v41 = vpop.f32.mrf.mxu2 }
 0x139   : > { %v993_v42 = vpop.f32.mrf.mxu0  ;;  %v1264_v45 = vpop.f32.mrf.mxu1  ;;  %v945_v5 = vadd.f32 %v944_v41, %v3050_v35  ;;  %v2365_v35 = vld [vmem:[%s2818_s29 + $0x1e8] sm:$0xf]  ;;  %v2683_v41 = vld [vmem:[%s2818_s29 + $0x1f0] sm:$0xf0] }
 0x13a   : > { %v3183_v44 = vadd.f32 %v993_v42, %v940_v33  ;;  %v2491_v42 = vor.u32 %v2702_v6, %v2488_v17  ;;  %v2498_v17 = vld [vmem:[%s2818_s29 + $0x2a0] sm:$0xf]  ;;  %v2530_v6 = vld [vmem:[%s2818_s29 + $0x2d8] sm:$0xf] }
 0x13b   : > { %2294 = vmatmul.msk.bf16.gmra.mxu0 %vm487_vm0, %v2285_v36 }
 0x13c   : > { %1303 = vmatmul.bf16.gmra.mxu1 %v2430_v43  ;;  %v2495_v43 = vor.u32 %v2704_v24, %v2494_v23  ;;  %v2706_v23 = vld [vmem:[%s2818_s29 + $0x2a8] sm:$0xf0]  ;;  %v2705_v24 = vld [vmem:[%s2818_s29 + $0x2a4] sm:$0xf]  ;;  %v3558_v39 = vmax.f32 %v3029_v7, %v3183_v44 }
 0x13d   : > { %1357 = vmatmul.bf16.gmra.mxu3 %v2434_v27 }
 0x140   : > { %v946_v58 = vpop.f32.mrf.mxu2  ;;  %v1318_v60 = vpop.f32.mrf.mxu3 }
 0x141   : > { %v3191_v62 = vadd.f32 %v1318_v60, %v1264_v45  ;;  %v995_v52 = vpop.f32.mrf.mxu0  ;;  %v1266_v10 = vpop.f32.mrf.mxu1  ;;  %v947_v50 = vadd.f32 %v946_v58, %v3060_v48  ;;  %v2707_v48 = vld [vmem:[%s2818_s29 + $0x2b0] sm:$0xf0] }
 0x142   : > { %v3193_v2 = vadd.f32 %v995_v52, %v942_v56 }
 0x145   : > { %2440 = vmatmul.msk.bf16.gmra.mxu2 %vm487_vm0, %v2354_v1 }
 0x148   : > { %v949_v25 = vpop.f32.mrf.mxu2  ;;  %v1320_v30 = vpop.f32.mrf.mxu3 }
 0x149   : > { %v3205_v33 = vadd.f32 %v1320_v30, %v1266_v10  ;;  %v998_v36 = vpop.f32.mrf.mxu0  ;;  %v1269_v45 = vpop.f32.mrf.mxu1  ;;  %v2366_v10 = vor.u32 %v2683_v41, %v2365_v35  ;;  %v2506_v30 = vld [vmem:[%s2818_s29 + $0x2a8] sm:$0xf]  ;;  %v950_v58 = vadd.f32 %v949_v25, %v3067_v59  ;;  %v2377_v59 = vld [vmem:[%s2818_s29 + $0x200] sm:$0xf]  ;;  %v2686_v25 = vld [vmem:[%s2818_s29 + $0x208] sm:$0xf0] }
 0x14a   : > { %v3207_v27 = vadd.f32 %v998_v36, %v945_v5  ;;  %v2500_v5 = vld [vmem:[%s2818_s29 + $0x2ac] sm:$0xf0]  ;;  %v2507_v41 = vor.u32 %v2707_v48, %v2506_v30 }
 0x14b   : > { %1642 = vmatmul.bf16.vlgmr.msra.gmra.mxu0 %v2487_v32  ;;  %v2503_v35 = vor.u32 %v2705_v24, %v2500_v5  ;;  %v2378_v5 = vor.u32 %v2686_v25, %v2377_v59 }
 0x14c   : > { %1696 = vmatmul.bf16.vlgmr.msra.gmra.mxu1 %v2491_v42  ;;  %v2499_v42 = vor.u32 %v2706_v23, %v2498_v17 }
 0x14d   : > { %2592 = vmatmul.msk.bf16.vlgmr.msra.gmra.mxu3 %vm487_vm0, %v2495_v43 }
 0x150   : > { %v951_v56 = vpop.f32.mrf.mxu2  ;;  %v1323_v60 = vpop.f32.mrf.mxu3 }
 0x151   : > { %v3215_v52 = vadd.f32 %v1323_v60, %v1269_v45  ;;  %v1000_v1 = vpop.f32.mrf.mxu0  ;;  %v1271_v15 = vpop.f32.mrf.mxu1 }
 0x152   : > { %v3217_v14 = vadd.f32 %v1000_v1, %v947_v50 }
 0x155   : > { %2441 = vmatmul.msk.bf16.gmra.mxu2 %vm487_vm0, %v2366_v10  ;;  %v952_v10 = vadd.f32 %v951_v56, %v3077_v9  ;;  %v2710_v9 = vld [vmem:[%s2818_s29 + $0x2c8] sm:$0xf0] }
 0x158   : > { %v954_v32 = vpop.f32.mrf.mxu2  ;;  %v1325_v36 = vpop.f32.mrf.mxu3 }
 0x159   : > { %v3229_v43 = vadd.f32 %v1325_v36, %v1271_v15  ;;  %v1003_v45 = vpop.f32.mrf.mxu0  ;;  %v1274_v60 = vpop.f32.mrf.mxu1  ;;  %v2510_v36 = vld [vmem:[%s2818_s29 + $0x2b8] sm:$0xf]  ;;  %v955_v56 = vadd.f32 %v954_v32, %v3084_v22  ;;  %v2689_v32 = vld [vmem:[%s2818_s29 + $0x220] sm:$0xf0] }
 0x15a   : > { %v3231_v50 = vadd.f32 %v1003_v45, %v950_v58  ;;  %v2708_v45 = vld [vmem:[%s2818_s29 + $0x2bc] sm:$0xf]  ;;  %v2389_v22 = vld [vmem:[%s2818_s29 + $0x218] sm:$0xf] }
 0x15b   : > { %1647 = vmatmul.bf16.gmra.mxu0 %v2499_v42  ;;  %v2709_v42 = vld [vmem:[%s2818_s29 + $0x2c0] sm:$0xf0] }
 0x15c   : > { %1701 = vmatmul.bf16.gmra.mxu1 %v2503_v35  ;;  %v2512_v35 = vld [vmem:[%s2818_s29 + $0x2c4] sm:$0xf0]  ;;  %v2511_v25 = vor.u32 %v2709_v42, %v2510_v36 }
 0x15d   : > { %2593 = vmatmul.msk.bf16.gmra.mxu3 %vm487_vm0, %v2507_v41  ;;  %v2518_v41 = vld [vmem:[%s2818_s29 + $0x2c0] sm:$0xf] }
 0x15e   : > { %v2519_v58 = vor.u32 %v2710_v9, %v2518_v41  ;;  %v2390_v41 = vor.u32 %v2689_v32, %v2389_v22 }
 0x160   : > { %v956_v15 = vpop.f32.mrf.mxu2  ;;  %v1328_v17 = vpop.f32.mrf.mxu3 }
 0x161   : > { %v3239_v23 = vadd.f32 %v1328_v17, %v1274_v60  ;;  %v1005_v24 = vpop.f32.mrf.mxu0  ;;  %v1276_v48 = vpop.f32.mrf.mxu1 }
 0x162   : > { %v3241_v30 = vadd.f32 %v1005_v24, %v952_v10  ;;  %v2515_v24 = vor.u32 %v2708_v45, %v2512_v35 }
 0x165   : > { %2442 = vmatmul.msk.bf16.gmra.mxu2 %vm487_vm0, %v2378_v5 }
 0x168   : > { %v959_v60 = vpop.f32.mrf.mxu2  ;;  %v1330_v59 = vpop.f32.mrf.mxu3 }
 0x169   : > { %v3253_v10 = vadd.f32 %v1330_v59, %v1276_v48  ;;  %v1008_v17 = vpop.f32.mrf.mxu0  ;;  %v1279_v5 = vpop.f32.mrf.mxu1  ;;  %v957_v48 = vadd.f32 %v956_v15, %v3094_v38  ;;  %v2713_v38 = vld [vmem:[%s2818_s29 + $0x2e0] sm:$0xf0]  ;;  %v960_v15 = vadd.f32 %v959_v60, %v3101_v51  ;;  %v2401_v51 = vld [vmem:[%s2818_s29 + $0x230] sm:$0xf]  ;;  %v2692_v60 = vld [vmem:[%s2818_s29 + $0x238] sm:$0xf0] }
 0x16a   : > { %v3255_v1 = vadd.f32 %v1008_v17, %v955_v56  ;;  %v2711_v17 = vld [vmem:[%s2818_s29 + $0x2d4] sm:$0xf]  ;;  %v2531_v59 = vor.u32 %v2713_v38, %v2530_v6 }
 0x16b   : > { %1652 = vmatmul.bf16.gmra.mxu0 %v2511_v25  ;;  %v2712_v25 = vld [vmem:[%s2818_s29 + $0x2d8] sm:$0xf0] }
 0x16c   : > { %1706 = vmatmul.bf16.gmra.mxu1 %v2515_v24  ;;  %v2524_v24 = vld [vmem:[%s2818_s29 + $0x2dc] sm:$0xf0] }
 0x16d   : > { %2594 = vmatmul.msk.bf16.gmra.mxu3 %vm487_vm0, %v2519_v58  ;;  %v2522_v58 = vld [vmem:[%s2818_s29 + $0x2d0] sm:$0xf] }
 0x16e   : > { %v2523_v32 = vor.u32 %v2712_v25, %v2522_v58 }
 0x170   : > { %v961_v36 = vpop.f32.mrf.mxu2  ;;  %v1333_v42 = vpop.f32.mrf.mxu3 }
 0x171   : > { %v3263_v45 = vadd.f32 %v1333_v42, %v1279_v5  ;;  %v1010_v35 = vpop.f32.mrf.mxu0  ;;  %v1281_v56 = vpop.f32.mrf.mxu1  ;;  %v962_v6 = vadd.f32 %v961_v36, %v3111_v3  ;;  %v2716_v3 = vld [vmem:[%s2818_s29 + $0x2f8] sm:$0xf0] }
 0x172   : > { %v3265_v9 = vadd.f32 %v1010_v35, %v957_v48  ;;  %v2527_v35 = vor.u32 %v2711_v17, %v2524_v24  ;;  %v2402_v24 = vor.u32 %v2692_v60, %v2401_v51 }
 0x175   : > { %2443 = vmatmul.msk.bf16.gmra.mxu2 %vm487_vm0, %v2390_v41 }
 0x178   : > { %v964_v5 = vpop.f32.mrf.mxu2  ;;  %v1335_v22 = vpop.f32.mrf.mxu3 }
 0x179   : > { %v3277_v48 = vadd.f32 %v1335_v22, %v1281_v56  ;;  %v1013_v42 = vpop.f32.mrf.mxu0  ;;  %v1284_v41 = vpop.f32.mrf.mxu1  ;;  %v965_v36 = vadd.f32 %v964_v5, %v3118_v19  ;;  %v2543_v22 = vor.u32 %v2716_v3, %v2542_v12  ;;  %v2413_v19 = vld [vmem:[%s2818_s29 + $0x248] sm:$0xf]  ;;  %v2695_v5 = vld [vmem:[%s2818_s29 + $0x250] sm:$0xf0] }
 0x17a   : > { %v3279_v11 = vadd.f32 %v1013_v42, %v960_v15  ;;  %v2714_v42 = vld [vmem:[%s2818_s29 + $0x2ec] sm:$0xf] }
 0x17b   : > { %1657 = vmatmul.bf16.gmra.mxu0 %v2523_v32  ;;  %v2715_v32 = vld [vmem:[%s2818_s29 + $0x2f0] sm:$0xf0] }
 0x17c   : > { %1711 = vmatmul.bf16.gmra.mxu1 %v2527_v35  ;;  %v2536_v35 = vld [vmem:[%s2818_s29 + $0x2f4] sm:$0xf0] }
 0x17d   : > { %2595 = vmatmul.msk.bf16.gmra.mxu3 %vm487_vm0, %v2531_v59  ;;  %v2534_v59 = vld [vmem:[%s2818_s29 + $0x2e8] sm:$0xf] }
 0x17e   : > { %v2535_v60 = vor.u32 %v2715_v32, %v2534_v59 }
 0x180   : > { %v966_v56 = vpop.f32.mrf.mxu2  ;;  %v1338_v58 = vpop.f32.mrf.mxu3 }
 0x181   : > { %v3287_v25 = vadd.f32 %v1338_v58, %v1284_v41  ;;  %v1015_v17 = vpop.f32.mrf.mxu0  ;;  %v1286_v15 = vpop.f32.mrf.mxu1  ;;  %v967_v12 = vadd.f32 %v966_v56, %v3128_v37  ;;  %v2719_v37 = vld [vmem:[%s2818_s29 + $0x310] sm:$0xf0] }
 0x182   : > { %v3289_v38 = vadd.f32 %v1015_v17, %v962_v6  ;;  %v2539_v17 = vor.u32 %v2714_v42, %v2536_v35  ;;  %v2414_v35 = vor.u32 %v2695_v5, %v2413_v19 }
 0x184   : > { %3553 = vst [vmem:[#allocation6_spill] sm:$0xff] %v3289_v38  ;;  %v2554_v38 = vld [vmem:[%s2818_s29 + $0x308] sm:$0xf] }
 0x185   : > { %2444 = vmatmul.msk.bf16.gmra.mxu2 %vm487_vm0, %v2402_v24 }
 0x188   : > { %v969_v41 = vpop.f32.mrf.mxu2  ;;  %v1340_v51 = vpop.f32.mrf.mxu3 }
 0x189   : > { %v3301_v6 = vadd.f32 %v1340_v51, %v1286_v15  ;;  %v1018_v58 = vpop.f32.mrf.mxu0  ;;  %v1289_v24 = vpop.f32.mrf.mxu1  ;;  %v970_v56 = vadd.f32 %v969_v41, %v3135_v53  ;;  %v2555_v51 = vor.u32 %v2719_v37, %v2554_v38  ;;  %v2425_v53 = vld [vmem:[%s2818_s29 + $0x260] sm:$0xf]  ;;  %v2698_v41 = vld [vmem:[%s2818_s29 + $0x268] sm:$0xf0] }
 0x18a   : > { %v3303_v54 = vadd.f32 %v1018_v58, %v965_v36  ;;  %v2717_v58 = vld [vmem:[%s2818_s29 + $0x304] sm:$0xf] }
 0x18b   : > { %1662 = vmatmul.bf16.gmra.mxu0 %v2535_v60  ;;  %v2718_v60 = vld [vmem:[%s2818_s29 + $0x308] sm:$0xf0] }
 0x18c   : > { %1716 = vmatmul.bf16.gmra.mxu1 %v2539_v17  ;;  %v2548_v17 = vld [vmem:[%s2818_s29 + $0x30c] sm:$0xf0] }
 0x18d   : > { %2596 = vmatmul.msk.bf16.gmra.mxu3 %vm487_vm0, %v2543_v22  ;;  %v2546_v22 = vld [vmem:[%s2818_s29 + $0x300] sm:$0xf] }
 0x18e   : > { %v2547_v5 = vor.u32 %v2718_v60, %v2546_v22 }
 0x190   : > { %v971_v15 = vpop.f32.mrf.mxu2  ;;  %v1343_v59 = vpop.f32.mrf.mxu3 }
 0x191   : > { %v3311_v32 = vadd.f32 %v1343_v59, %v1289_v24  ;;  %v1020_v42 = vpop.f32.mrf.mxu0  ;;  %v1291_v36 = vpop.f32.mrf.mxu1  ;;  %v972_v38 = vadd.f32 %v971_v15, %v3145_v8  ;;  %v2722_v8 = vld [vmem:[%s2818_s29 + $0x328] sm:$0xf0] }
 0x192   : > { %v3313_v3 = vadd.f32 %v1020_v42, %v967_v12  ;;  %v2551_v42 = vor.u32 %v2717_v58, %v2548_v17  ;;  %v2426_v17 = vor.u32 %v2698_v41, %v2425_v53 }
 0x194   : > { %3554 = vst [vmem:[#allocation7_spill] sm:$0xff] %v3313_v3 }
 0x195   : > { %2445 = vmatmul.msk.bf16.gmra.mxu2 %vm487_vm0, %v2414_v35 }
 0x198   : > { %v974_v24 = vpop.f32.mrf.mxu2  ;;  %v1345_v19 = vpop.f32.mrf.mxu3 }
 0x199   : > { %v3325_v12 = vadd.f32 %v1345_v19, %v1291_v36  ;;  %v1023_v59 = vpop.f32.mrf.mxu0  ;;  %v1294_v35 = vpop.f32.mrf.mxu1  ;;  %v975_v15 = vadd.f32 %v974_v24, %v3152_v29  ;;  %v2567_v19 = vor.u32 %v2722_v8, %v2566_v26  ;;  %v2437_v29 = vld [vmem:[%s2818_s29 + $0x278] sm:$0xf]  ;;  %v2701_v24 = vld [vmem:[%s2818_s29 + $0x280] sm:$0xf0] }
 0x19a   : > { %v3327_v3 = vadd.f32 %v1023_v59, %v970_v56  ;;  %v2720_v59 = vld [vmem:[%s2818_s29 + $0x31c] sm:$0xf] }
 0x19b   : > { %1667 = vmatmul.bf16.gmra.mxu0 %v2547_v5  ;;  %v2721_v5 = vld [vmem:[%s2818_s29 + $0x320] sm:$0xf0] }
 0x19c   : > { %1721 = vmatmul.bf16.gmra.mxu1 %v2551_v42  ;;  %v2560_v42 = vld [vmem:[%s2818_s29 + $0x324] sm:$0xf0] }
 0x19d   : > { %2597 = vmatmul.msk.bf16.gmra.mxu3 %vm487_vm0, %v2555_v51  ;;  %v2558_v51 = vld [vmem:[%s2818_s29 + $0x318] sm:$0xf] }
 0x19e   : > { %v2559_v41 = vor.u32 %v2721_v5, %v2558_v51 }
 0x1a0   : > { %v976_v36 = vpop.f32.mrf.mxu2  ;;  %v1348_v22 = vpop.f32.mrf.mxu3 }
 0x1a1   : > { %v3335_v60 = vadd.f32 %v1348_v22, %v1294_v35  ;;  %v1025_v58 = vpop.f32.mrf.mxu0  ;;  %v1296_v56 = vpop.f32.mrf.mxu1  ;;  %v977_v26 = vadd.f32 %v976_v36, %v3162_v49  ;;  %v2725_v49 = vld [vmem:[%s2818_s29 + $0x340] sm:$0xf0] }
 0x1a2   : > { %v3337_v37 = vadd.f32 %v1025_v58, %v972_v38  ;;  %v2563_v58 = vor.u32 %v2720_v59, %v2560_v42  ;;  %v2438_v42 = vor.u32 %v2701_v24, %v2437_v29 }
 0x1a4   : > { %3555 = vst [vmem:[#allocation8_spill] sm:$0xff] %v3337_v37 }
 0x1a5   : > { %2446 = vmatmul.msk.bf16.gmra.mxu2 %vm487_vm0, %v2426_v17 }
 0x1a8   : > { %v979_v35 = vpop.f32.mrf.mxu2  ;;  %v1350_v53 = vpop.f32.mrf.mxu3 }
 0x1a9   : > { %v3349_v38 = vadd.f32 %v1350_v53, %v1296_v56  ;;  %v1028_v22 = vpop.f32.mrf.mxu0  ;;  %v1299_v17 = vpop.f32.mrf.mxu1  ;;  %v980_v36 = vadd.f32 %v979_v35, %v3169_v4  ;;  %v2579_v53 = vor.u32 %v2725_v49, %v2578_v61  ;;  %v2590_v49 = vld [vmem:[%s2818_s29 + $0x350] sm:$0xf] }
 0x1aa   : > { %v3351_v37 = vadd.f32 %v1028_v22, %v975_v15  ;;  %v2723_v22 = vld [vmem:[%s2818_s29 + $0x334] sm:$0xf] }
 0x1ab   : > { %1672 = vmatmul.bf16.gmra.mxu0 %v2559_v41  ;;  %v2724_v41 = vld [vmem:[%s2818_s29 + $0x338] sm:$0xf0] }
 0x1ac   : > { %3556 = vst [vmem:[#allocation9_spill] sm:$0xff] %v3351_v37  ;;  %1726 = vmatmul.bf16.gmra.mxu1 %v2563_v58  ;;  %v2572_v58 = vld [vmem:[%s2818_s29 + $0x33c] sm:$0xf0] }
 0x1ad   : > { %2598 = vmatmul.msk.bf16.gmra.mxu3 %vm487_vm0, %v2567_v19  ;;  %v2570_v19 = vld [vmem:[%s2818_s29 + $0x330] sm:$0xf] }
 0x1ae   : > { %v2571_v37 = vor.u32 %v2724_v41, %v2570_v19 }
 0x1b0   : > { %v981_v56 = vpop.f32.mrf.mxu2  ;;  %v1353_v51 = vpop.f32.mrf.mxu3 }
 0x1b1   : > { %v3359_v5 = vadd.f32 %v1353_v51, %v1299_v17  ;;  %v1030_v59 = vpop.f32.mrf.mxu0  ;;  %v1301_v15 = vpop.f32.mrf.mxu1  ;;  %v982_v61 = vadd.f32 %v981_v56, %v3181_v34  ;;  %v2726_v34 = vld [vmem:[%s2818_s29 + $0x34c] sm:$0xf]  ;;  %v2584_v56 = vld [vmem:[%s2818_s29 + $0x354] sm:$0xf0] }
 0x1b2   : > { %v3361_v8 = vadd.f32 %v1030_v59, %v977_v26  ;;  %v2575_v59 = vor.u32 %v2723_v22, %v2572_v58  ;;  %v2582_v22 = vld [vmem:[%s2818_s29 + $0x348] sm:$0xf]  ;;  %v2727_v58 = vld [vmem:[%s2818_s29 + $0x350] sm:$0xf0] }
 0x1b4   : > { %3557 = vst [vmem:[#allocation10_spill] sm:$0xff] %v3361_v8 }
 0x1b5   : > { %2447 = vmatmul.msk.bf16.gmra.mxu2 %vm487_vm0, %v2438_v42 }
 0x1b8   : > { %v1355_v17 = vpop.f32.mrf.mxu3  ;;  %v1372_v51 = vpop.f32.mrf.mxu2 }
 0x1b9   : > { %v3373_v29 = vadd.f32 %v1355_v17, %v1301_v15  ;;  %v1373_v24 = vadd.f32 %v1372_v51, %v3191_v62  ;;  %v1033_v26 = vpop.f32.mrf.mxu0  ;;  %v1304_v42 = vpop.f32.mrf.mxu1 }
 0x1ba   : > { %v3376_v8 = vadd.f32 %v1033_v26, %v980_v36  ;;  %v2728_v36 = vld [vmem:[%s2818_s29 + $0x358] sm:$0xf0] }
 0x1bb   : > { %v1417_v21 = vmax.f32 %v3558_v39, %v1373_v24  ;;  %1677 = vmatmul.bf16.gmra.mxu0 %v2571_v37  ;;  %v3559_v37 = vmax.f32 %v3035_v16, %v3193_v2  ;;  %v2591_v16 = vor.u32 %v2728_v36, %v2590_v49 }
 0x1bc   : > { %v1054_v4 = vmax.f32 %v3165_v63, %v3376_v8  ;;  %1731 = vmatmul.bf16.gmra.mxu1 %v2575_v59 }
 0x1bd   : > { %2599 = vmatmul.msk.bf16.gmra.mxu3 %vm487_vm0, %v2579_v53 }
 0x1c0   : > { %v1358_v62 = vpop.f32.mrf.mxu3  ;;  %v1374_v35 = vpop.f32.mrf.mxu2 }
 0x1c1   : > { %v3385_v15 = vadd.f32 %v1358_v62, %v1304_v42  ;;  %v1375_v7 = vadd.f32 %v1374_v35, %v3205_v33  ;;  %v1035_v39 = vpop.f32.mrf.mxu0  ;;  %v1306_v19 = vpop.f32.mrf.mxu1  ;;  %v2583_v33 = vor.u32 %v2727_v58, %v2582_v22  ;;  %v2587_v42 = vor.u32 %v2726_v34, %v2584_v56 }
 0x1c2   : > { %v3388_v44 = vadd.f32 %v1035_v39, %v982_v61  ;;  %v3560_v61 = vmax.f32 %v3046_v31, %v3207_v27  ;;  %v3561_v31 = vmax.f32 %v3052_v40, %v3217_v14 }
 0x1c3   : > { %v1418_v41 = vmax.f32 %v3559_v37, %v1375_v7 }
 0x1c4   : > { %v1055_v53 = vmax.f32 %v3171_v20, %v3388_v44 }
 0x1c8   : > { %v1360_v17 = vpop.f32.mrf.mxu3  ;;  %v1377_v51 = vpop.f32.mrf.mxu2 }
 0x1c9   : > { %v3401_v24 = vadd.f32 %v1360_v17, %v1306_v19  ;;  %v1378_v26 = vadd.f32 %v1377_v51, %v3215_v52  ;;  %v1643_v59 = vpop.f32.mrf.mxu0  ;;  %v1697_v2 = vpop.f32.mrf.mxu1  ;;  %v3412_v52 = vld [vmem:[%s3538_s2] ss:$0 sm:$0xff] }
 0x1ca   : > { %v1698_v35 = vadd.f32 %v1697_v2, %v1643_v59 }
 0x1cb   : > { %v1419_v62 = vmax.f32 %v3560_v61, %v1378_v26  ;;  %1682 = vmatmul.bf16.gmra.mxu0 %v2583_v33  ;;  %v3562_v26 = vmax.f32 %v3063_v55, %v3231_v50  ;;  %v3563_v55 = vmax.f32 %v3069_v0, %v3241_v30  ;;  %v3564_v0 = vmax.f32 %v3080_v18, %v3255_v1 }
 0x1cc   : > { %1736 = vmatmul.bf16.gmra.mxu1 %v2587_v42  ;;  %v3565_v18 = vmax.f32 %v3086_v28, %v3265_v9  ;;  %v3566_v28 = vmax.f32 %v3097_v46, %v3279_v11 }
 0x1cd   : > { %2600 = vmatmul.msk.bf16.gmra.mxu3 %vm487_vm0, %v2591_v16 }
 0x1d0   : > { %v1379_v7 = vpop.f32.mrf.mxu2  ;;  %v1751_v39 = vpop.f32.mrf.mxu3 }
 0x1d1   : > { %v1380_v19 = vadd.f32 %v1379_v7, %v3229_v43  ;;  %v1752_v37 = vadd.f32 %v1751_v39, %v1698_v35  ;;  %v1645_v22 = vpop.f32.mrf.mxu0  ;;  %v1699_v58 = vpop.f32.mrf.mxu1 }
 0x1d2   : > { %v1700_v36 = vadd.f32 %v1699_v58, %v1645_v22 }
 0x1d3   : > { %v1420_v27 = vmax.f32 %v3561_v31, %v1380_v19  ;;  %v1796_v34 = vmax.f32 %v1417_v21, %v1752_v37 }
 0x1d5   : > { %v1818_v56 = vadd.f32 %v3412_v52, %v1796_v34 }
 0x1d7   : > { %v1836_v49 = vmax.f32 %v1818_v56, 0.0 }
 0x1d8   : > { %v1382_v43 = vpop.f32.mrf.mxu2  ;;  %v1753_v17 = vpop.f32.mrf.mxu3 }
 0x1d9   : > { %v1854_v51 = vpack.c.bf16 %v1836_v49, %v1836_v49  ;;  %v1383_v33 = vadd.f32 %v1382_v43, %v3239_v23  ;;  %v1754_v40 = vadd.f32 %v1753_v17, %v1700_v36  ;;  %v1648_v21 = vpop.f32.mrf.mxu0  ;;  %v1702_v14 = vpop.f32.mrf.mxu1 }
 0x1da   : > { %v1703_v2 = vadd.f32 %v1702_v14, %v1648_v21 }
 0x1db   : > { %1873 = vst.msk [vmem:[%s3422_s7] sm:$0xf] %vm1872_vm1, %v1854_v51  ;;  %v1421_v59 = vmax.f32 %v3562_v26, %v1383_v33  ;;  %v1797_v42 = vmax.f32 %v1418_v41, %v1754_v40 }
 0x1dd   : > { %v1819_v16 = vadd.f32 %v3412_v52, %v1797_v42 }
 0x1df   : > { %v1837_v61 = vmax.f32 %v1819_v16, 0.0 }
 0x1e0   : > { %v1384_v35 = vpop.f32.mrf.mxu2  ;;  %v1756_v7 = vpop.f32.mrf.mxu3 }
 0x1e1   : > { %v1855_v39 = vpack.c.bf16 %v1837_v61, %v1837_v61  ;;  %v1385_v23 = vadd.f32 %v1384_v35, %v3253_v10  ;;  %v1757_v19 = vadd.f32 %v1756_v7, %v1703_v2  ;;  %v1650_v37 = vpop.f32.mrf.mxu0  ;;  %v1704_v22 = vpop.f32.mrf.mxu1 }
 0x1e2   : > { %v1705_v34 = vadd.f32 %v1704_v22, %v1650_v37 }
 0x1e3   : > { %1874 = vst.msk [vmem:[%s3422_s7 + $0x4] sm:$0xf] %vm1872_vm1, %v1855_v39  ;;  %v1422_v50 = vmax.f32 %v3563_v55, %v1385_v23  ;;  %v1798_v41 = vmax.f32 %v1419_v62, %v1757_v19 }
 0x1e5   : > { %v1820_v58 = vadd.f32 %v3412_v52, %v1798_v41 }
 0x1e7   : > { %v1838_v31 = vmax.f32 %v1820_v58, 0.0 }
 0x1e8   : > { %v1387_v56 = vpop.f32.mrf.mxu2  ;;  %v1758_v49 = vpop.f32.mrf.mxu3 }
 0x1e9   : > { %v1856_v36 = vpack.c.bf16 %v1838_v31, %v1838_v31  ;;  %v1388_v10 = vadd.f32 %v1387_v56, %v3263_v45  ;;  %v1759_v43 = vadd.f32 %v1758_v49, %v1705_v34  ;;  %v1653_v17 = vpop.f32.mrf.mxu0  ;;  %v1707_v51 = vpop.f32.mrf.mxu1 }
 0x1ea   : > { %v1708_v40 = vadd.f32 %v1707_v51, %v1653_v17  ;;  %v3567_v51 = vld [vmem:[#allocation6_spill] sm:$0xff] }
 0x1eb   : > { %1875 = vst.msk [vmem:[%s3422_s7 + $0x8] sm:$0xf] %vm1872_vm1, %v1856_v36  ;;  %v1423_v30 = vmax.f32 %v3564_v0, %v1388_v10  ;;  %v1799_v62 = vmax.f32 %v1420_v27, %v1759_v43  ;;  %v3568_v46 = vmax.f32 %v3103_v57, %v3567_v51  ;;  %v3569_v57 = vmax.f32 %v3114_v13, %v3303_v54 }
 0x1ed   : > { %v1821_v33 = vadd.f32 %v3412_v52, %v1799_v62 }
 0x1ef   : > { %v1839_v21 = vmax.f32 %v1821_v33, 0.0 }
 0x1f0   : > { %v1389_v14 = vpop.f32.mrf.mxu2  ;;  %v1761_v26 = vpop.f32.mrf.mxu3 }
 0x1f1   : > { %v1857_v42 = vpack.c.bf16 %v1839_v21, %v1839_v21  ;;  %v1390_v45 = vadd.f32 %v1389_v14, %v3277_v48  ;;  %v1762_v16 = vadd.f32 %v1761_v26, %v1708_v40  ;;  %v1655_v2 = vpop.f32.mrf.mxu0  ;;  %v1709_v61 = vpop.f32.mrf.mxu1 }
 0x1f2   : > { %v1710_v39 = vadd.f32 %v1709_v61, %v1655_v2 }
 0x1f3   : > { %1876 = vst.msk [vmem:[%s3422_s7 + $0xc] sm:$0xf] %vm1872_vm1, %v1857_v42  ;;  %v1424_v1 = vmax.f32 %v3565_v18, %v1390_v45  ;;  %v1800_v27 = vmax.f32 %v1421_v59, %v1762_v16 }
 0x1f5   : > { %v1822_v35 = vadd.f32 %v3412_v52, %v1800_v27 }
 0x1f7   : > { %v1840_v7 = vmax.f32 %v1822_v35, 0.0 }
 0x1f8   : > { %v1392_v23 = vpop.f32.mrf.mxu2  ;;  %v1763_v19 = vpop.f32.mrf.mxu3 }
 0x1f9   : > { %v1858_v37 = vpack.c.bf16 %v1840_v7, %v1840_v7  ;;  %v1393_v48 = vadd.f32 %v1392_v23, %v3287_v25  ;;  %v1764_v22 = vadd.f32 %v1763_v19, %v1710_v39  ;;  %v1658_v55 = vpop.f32.mrf.mxu0  ;;  %v1712_v41 = vpop.f32.mrf.mxu1 }
 0x1fa   : > { %v1713_v31 = vadd.f32 %v1712_v41, %v1658_v55 }
 0x1fb   : > { %1877 = vst.msk [vmem:[%s3422_s7 + $0x10] sm:$0xf] %vm1872_vm1, %v1858_v37  ;;  %v1425_v9 = vmax.f32 %v3566_v28, %v1393_v48  ;;  %v1801_v59 = vmax.f32 %v1422_v50, %v1764_v22  ;;  %v3570_v37 = vld [vmem:[#allocation2_spill] sm:$0xff]  ;;  %v3571_v48 = vld [vmem:[#allocation7_spill] sm:$0xff] }
 0x1fc   : > { %v3572_v13 = vmax.f32 %v3570_v37, %v3571_v48 }
 0x1fd   : > { %v1823_v58 = vadd.f32 %v3412_v52, %v1801_v59 }
 0x1ff   : > { %v1841_v34 = vmax.f32 %v1823_v58, 0.0 }
 0x200   : > { %v1394_v56 = vpop.f32.mrf.mxu2  ;;  %v1766_v49 = vpop.f32.mrf.mxu3 }
 0x201   : > { %v1859_v36 = vpack.c.bf16 %v1841_v34, %v1841_v34  ;;  %v1395_v25 = vadd.f32 %v1394_v56, %v3301_v6  ;;  %v1767_v10 = vadd.f32 %v1766_v49, %v1713_v31  ;;  %v1660_v43 = vpop.f32.mrf.mxu0  ;;  %v1714_v17 = vpop.f32.mrf.mxu1  ;;  %v3573_v49 = vmax.f32 %v3131_v47, %v3327_v3 }
 0x202   : > { %v1715_v33 = vadd.f32 %v1714_v17, %v1660_v43 }
 0x203   : > { %1878 = vst.msk [vmem:[%s3422_s7 + $0x14] sm:$0xf] %vm1872_vm1, %v1859_v36  ;;  %v1426_v11 = vmax.f32 %v3568_v46, %v1395_v25  ;;  %v1802_v50 = vmax.f32 %v1423_v30, %v1767_v10 }
 0x205   : > { %v1824_v0 = vadd.f32 %v3412_v52, %v1802_v50 }
 0x207   : > { %v1842_v62 = vmax.f32 %v1824_v0, 0.0 }
 0x208   : > { %v1397_v40 = vpop.f32.mrf.mxu2  ;;  %v1768_v21 = vpop.f32.mrf.mxu3 }
 0x209   : > { %v1860_v14 = vpack.c.bf16 %v1842_v62, %v1842_v62  ;;  %v1398_v6 = vadd.f32 %v1397_v40, %v3311_v32  ;;  %v1769_v26 = vadd.f32 %v1768_v21, %v1715_v33  ;;  %v1663_v42 = vpop.f32.mrf.mxu0  ;;  %v1717_v45 = vpop.f32.mrf.mxu1  ;;  %v3574_v33 = vld [vmem:[#allocation3_spill] sm:$0xff]  ;;  %v3575_v40 = vld [vmem:[#allocation8_spill] sm:$0xff] }
 0x20a   : > { %v1718_v61 = vadd.f32 %v1717_v45, %v1663_v42  ;;  %v3576_v47 = vmax.f32 %v3574_v33, %v3575_v40 }
 0x20b   : > { %1879 = vst.msk [vmem:[%s3422_s7 + $0x18] sm:$0xf] %vm1872_vm1, %v1860_v14  ;;  %v1427_v16 = vmax.f32 %v3569_v57, %v1398_v6  ;;  %v1803_v30 = vmax.f32 %v1424_v1, %v1769_v26 }
 0x20d   : > { %v1825_v2 = vadd.f32 %v3412_v52, %v1803_v30 }
 0x20f   : > { %v1843_v18 = vmax.f32 %v1825_v2, 0.0 }
 0x210   : > { %v1399_v27 = vpop.f32.mrf.mxu2  ;;  %v1771_v35 = vpop.f32.mrf.mxu3 }
 0x211   : > { %v1861_v7 = vpack.c.bf16 %v1843_v18, %v1843_v18  ;;  %v1400_v32 = vadd.f32 %v1399_v27, %v3325_v12  ;;  %v1772_v39 = vadd.f32 %v1771_v35, %v1718_v61  ;;  %v1665_v23 = vpop.f32.mrf.mxu0  ;;  %v1719_v19 = vpop.f32.mrf.mxu1  ;;  %v3577_v61 = vld [vmem:[#allocation4_spill] sm:$0xff]  ;;  %v3578_v18 = vld [vmem:[#allocation9_spill] sm:$0xff] }
 0x212   : > { %v1720_v41 = vadd.f32 %v1719_v19, %v1665_v23  ;;  %v3579_v27 = vmax.f32 %v3577_v61, %v3578_v18 }
 0x213   : > { %1880 = vst.msk [vmem:[%s3422_s7 + $0x1c] sm:$0xf] %vm1872_vm1, %v1861_v7  ;;  %v1428_v54 = vmax.f32 %v3572_v13, %v1400_v32  ;;  %v1804_v1 = vmax.f32 %v1425_v9, %v1772_v39 }
 0x215   : > { %v1826_v22 = vadd.f32 %v3412_v52, %v1804_v1 }
 0x217   : > { %v1844_v55 = vmax.f32 %v1826_v22, 0.0  ;;  %v3580_v22 = vld [vmem:[#allocation5_spill] sm:$0xff] }
 0x218   : > { %v1402_v28 = vpop.f32.mrf.mxu2  ;;  %v1773_v59 = vpop.f32.mrf.mxu3 }
 0x219   : > { %v1862_v58 = vpack.c.bf16 %v1844_v55, %v1844_v55  ;;  %v1403_v12 = vadd.f32 %v1402_v28, %v3335_v60  ;;  %v1774_v31 = vadd.f32 %v1773_v59, %v1720_v41  ;;  %v1668_v34 = vpop.f32.mrf.mxu0  ;;  %v1722_v56 = vpop.f32.mrf.mxu1  ;;  %v3581_v55 = vld [vmem:[#allocation10_spill] sm:$0xff] }
 0x21a   : > { %v1723_v10 = vadd.f32 %v1722_v56, %v1668_v34  ;;  %v3582_v41 = vmax.f32 %v3580_v22, %v3581_v55 }
 0x21b   : > { %1881 = vst.msk [vmem:[%s3422_s7 + $0x20] sm:$0xf] %vm1872_vm1, %v1862_v58  ;;  %v1429_v36 = vmax.f32 %v3573_v49, %v1403_v12  ;;  %v1805_v9 = vmax.f32 %v1426_v11, %v1774_v31 }
 0x21d   : > { %v1827_v25 = vadd.f32 %v3412_v52, %v1805_v9 }
 0x21f   : > { %v1845_v43 = vmax.f32 %v1827_v25, 0.0 }
 0x220   : > { %v1404_v17 = vpop.f32.mrf.mxu2  ;;  %v1776_v51 = vpop.f32.mrf.mxu3 }
 0x221   : > { %v1863_v46 = vpack.c.bf16 %v1845_v43, %v1845_v43  ;;  %v1405_v60 = vadd.f32 %v1404_v17, %v3349_v38  ;;  %v1777_v50 = vadd.f32 %v1776_v51, %v1723_v10  ;;  %v1670_v0 = vpop.f32.mrf.mxu0  ;;  %v1724_v62 = vpop.f32.mrf.mxu1 }
 0x222   : > { %v1725_v6 = vadd.f32 %v1724_v62, %v1670_v0 }
 0x223   : > { %1882 = vst.msk [vmem:[%s3422_s7 + $0x24] sm:$0xf] %vm1872_vm1, %v1863_v46  ;;  %v1430_v3 = vmax.f32 %v3576_v47, %v1405_v60  ;;  %v1806_v11 = vmax.f32 %v1427_v16, %v1777_v50 }
 0x225   : > { %v1828_v21 = vadd.f32 %v3412_v52, %v1806_v11 }
 0x227   : > { %v1846_v14 = vmax.f32 %v1828_v21, 0.0 }
 0x228   : > { %v1407_v26 = vpop.f32.mrf.mxu2  ;;  %v1778_v42 = vpop.f32.mrf.mxu3 }
 0x229   : > { %v1864_v45 = vpack.c.bf16 %v1846_v14, %v1846_v14  ;;  %v1408_v38 = vadd.f32 %v1407_v26, %v3359_v5  ;;  %v1779_v57 = vadd.f32 %v1778_v42, %v1725_v6  ;;  %v1673_v30 = vpop.f32.mrf.mxu0  ;;  %v1727_v2 = vpop.f32.mrf.mxu1 }
 0x22a   : > { %v1728_v32 = vadd.f32 %v1727_v2, %v1673_v30 }
 0x22b   : > { %1883 = vst.msk [vmem:[%s3422_s7 + $0x28] sm:$0xf] %vm1872_vm1, %v1864_v45  ;;  %v1431_v35 = vmax.f32 %v3579_v27, %v1408_v38  ;;  %v1807_v16 = vmax.f32 %v1428_v54, %v1779_v57 }
 0x22d   : > { %v1829_v7 = vadd.f32 %v3412_v52, %v1807_v16 }
 0x22f   : > { %v1847_v39 = vmax.f32 %v1829_v7, 0.0 }
 0x230   : > { %v1409_v23 = vpop.f32.mrf.mxu2  ;;  %v1781_v19 = vpop.f32.mrf.mxu3 }
 0x231   : > { %v1865_v37 = vpack.c.bf16 %v1847_v39, %v1847_v39  ;;  %v1410_v5 = vadd.f32 %v1409_v23, %v3373_v29  ;;  %v1782_v48 = vadd.f32 %v1781_v19, %v1728_v32  ;;  %v1675_v13 = vpop.f32.mrf.mxu0  ;;  %v1729_v1 = vpop.f32.mrf.mxu1 }
 0x232   : > { %v1730_v12 = vadd.f32 %v1729_v1, %v1675_v13 }
 0x233   : > { %1884 = vst.msk [vmem:[%s3422_s7 + $0x2c] sm:$0xf] %vm1872_vm1, %v1865_v37  ;;  %v1432_v28 = vmax.f32 %v3582_v41, %v1410_v5  ;;  %v1808_v54 = vmax.f32 %v1429_v36, %v1782_v48 }
 0x235   : > { %v1830_v59 = vadd.f32 %v3412_v52, %v1808_v54 }
 0x237   : > { %v1848_v58 = vmax.f32 %v1830_v59, 0.0 }
 0x238   : > { %v1412_v31 = vpop.f32.mrf.mxu2  ;;  %v1783_v34 = vpop.f32.mrf.mxu3 }
 0x239   : > { %v1866_v56 = vpack.c.bf16 %v1848_v58, %v1848_v58  ;;  %v1413_v29 = vadd.f32 %v1412_v31, %v3385_v15  ;;  %v1784_v49 = vadd.f32 %v1783_v34, %v1730_v12  ;;  %v1678_v9 = vpop.f32.mrf.mxu0  ;;  %v1732_v25 = vpop.f32.mrf.mxu1 }
 0x23a   : > { %v1733_v17 = vadd.f32 %v1732_v25, %v1678_v9 }
 0x23b   : > { %1885 = vst.msk [vmem:[%s3422_s7 + $0x30] sm:$0xf] %vm1872_vm1, %v1866_v56  ;;  %v1433_v10 = vmax.f32 %v1054_v4, %v1413_v29  ;;  %v1809_v36 = vmax.f32 %v1430_v3, %v1784_v49 }
 0x23d   : > { %v1831_v43 = vadd.f32 %v3412_v52, %v1809_v36 }
 0x23f   : > { %v1849_v51 = vmax.f32 %v1831_v43, 0.0 }
 0x240   : > { %v1414_v46 = vpop.f32.mrf.mxu2  ;;  %v1786_v60 = vpop.f32.mrf.mxu3 }
 0x241   : > { %v1867_v50 = vpack.c.bf16 %v1849_v51, %v1849_v51  ;;  %v1415_v15 = vadd.f32 %v1414_v46, %v3401_v24  ;;  %v1787_v0 = vadd.f32 %v1786_v60, %v1733_v17  ;;  %v1680_v62 = vpop.f32.mrf.mxu0  ;;  %v1734_v33 = vpop.f32.mrf.mxu1 }
 0x242   : > { %v1735_v47 = vadd.f32 %v1734_v33, %v1680_v62 }
 0x243   : > { %1886 = vst.msk [vmem:[%s3422_s7 + $0x34] sm:$0xf] %vm1872_vm1, %v1867_v50  ;;  %v1434_v63 = vmax.f32 %v1055_v53, %v1415_v15  ;;  %v1810_v8 = vmax.f32 %v1431_v35, %v1787_v0 }
 0x245   : > { %v1832_v4 = vadd.f32 %v3412_v52, %v1810_v8 }
 0x247   : > { %v1850_v40 = vmax.f32 %v1832_v4, 0.0 }
 0x248   : > { %v1788_v3 = vpop.f32.mrf.mxu3 }
 0x249   : > { %v1868_v11 = vpack.c.bf16 %v1850_v40, %v1850_v40  ;;  %v1789_v21 = vadd.f32 %v1788_v3, %v1735_v47  ;;  %v1683_v14 = vpop.f32.mrf.mxu0  ;;  %v1737_v24 = vpop.f32.mrf.mxu1 }
 0x24a   : > { %v1738_v42 = vadd.f32 %v1737_v24, %v1683_v14 }
 0x24b   : > { %1887 = vst.msk [vmem:[%s3422_s7 + $0x38] sm:$0xf] %vm1872_vm1, %v1868_v11  ;;  %v1811_v6 = vmax.f32 %v1432_v28, %v1789_v21 }
 0x24d   : > { %v1833_v26 = vadd.f32 %v3412_v52, %v1811_v6 }
 0x24f   : > { %v1851_v20 = vmax.f32 %v1833_v26, 0.0 }
 0x250   : > { %v1791_v44 = vpop.f32.mrf.mxu3 }
 0x251   : > { %v1869_v53 = vpack.c.bf16 %v1851_v20, %v1851_v20  ;;  %v1792_v45 = vadd.f32 %v1791_v44, %v1738_v42  ;;  %v1685_v57 = vpop.f32.mrf.mxu0  ;;  %v1739_v30 = vpop.f32.mrf.mxu1 }
 0x252   : > { %v1740_v18 = vadd.f32 %v1739_v30, %v1685_v57 }
 0x253   : > { %1888 = vst.msk [vmem:[%s3422_s7 + $0x3c] sm:$0xf] %vm1872_vm1, %v1869_v53  ;;  %v1812_v38 = vmax.f32 %v1433_v10, %v1792_v45 }
 0x255   : > { %v1834_v2 = vadd.f32 %v3412_v52, %v1812_v38 }
 0x257   : > { %v1852_v61 = vmax.f32 %v1834_v2, 0.0 }
 0x258   : > { %v1793_v27 = vpop.f32.mrf.mxu3 }
 0x259   : > { %v1870_v35 = vpack.c.bf16 %v1852_v61, %v1852_v61  ;;  %v1794_v16 = vadd.f32 %v1793_v27, %v1740_v18 }
 0x25b   : > { %1889 = vst.msk [vmem:[%s3422_s7 + $0x40] sm:$0xf] %vm1872_vm1, %v1870_v35  ;;  %v1813_v7 = vmax.f32 %v1434_v63, %v1794_v16 }
 0x25d   : > { %v1835_v32 = vadd.f32 %v3412_v52, %v1813_v7 }
 0x25f   : > { %v1853_v39 = vmax.f32 %v1835_v32, 0.0 }
 0x261   : > { %v1871_v23 = vpack.c.bf16 %v1853_v39, %v1853_v39 }
 0x263   : > { %1890 = vst.msk [vmem:[%s3422_s7 + $0x44] sm:$0xf] %vm1872_vm1, %v1871_v23 }
 0x264 PF: > { %s13_s12 = sadd.s32 1, %s2746_s12  }
 0x265   : > { %p10_p4 = scmp.ge.s32.totalorder %s13_s12, 4  }
 0x267   :  { %12 = sbr.rel (!%p10_p4) target bundleno = 1 (0x1), region = 65 }

// kernel: net_forward.5
= control target key start
LH: loop header
LB: loop body
LE: loop exit
PB: predicated region body
PF: predicated region fallthrough
CT: control target
= control target key end

     0   :  { %10 = vsyncpa [#allocation4], 0  ;;  %s2701_s18 = smov 0   ;;  %s2924_s0 = inlined_call_operand.vmem [shape: bf16[2,9216], index: 0, kind: input, shape index: {}]   ;;  %s2925_s1 = inlined_call_operand.vmem [shape: bf16[9216,128], index: 1, kind: input, shape index: {}]   ;;  %s2926_s2 = inlined_call_operand.vmem [shape: f32[1,128], index: 2, kind: input, shape index: {}]   ;;  %s2927_s3 = inlined_call_operand.vmem [shape: bf16[128,10], index: 3, kind: input, shape index: {}]   ;;  %s2928_s4 = inlined_call_operand.vmem [shape: f32[1,10], index: 4, kind: input, shape index: {}]   ;;  %s2929_s5 = inlined_call_operand.hbm [shape: f32[2,10], index: 5, kind: output, shape index: {}]  }
   0x1 LB: > { %s2707_s19 = sadd.s32 4294967295, %s2667_s18   ;;  %p1839_p0 = scmp.ge.s32.totalorder %s2667_s18, 1  ;;  %s2667_s18 = sphi %s2701_s18, %s16_s18  }
   0x2   : > { %p194_p1 = scmp.lt.s32.totalorder %s2667_s18, 5 }
   0x4   : > { %p195_p2 = pnand %p1839_p0, %p194_p1 }
   0x5   : > { %s221_s20 = smul.u32 (!%p195_p2), 18, %s2707_s19  ;;  %p1841_p5 = scmp.ne.s32.totalorder (!%p195_p2), %s2707_s19, 0 }
   0x6   : > { %198 = sbr.rel (%p195_p2) target bundleno = 739 (0x2e3), region = 40 }
   0x7   : > { %s226_s21 = smul.u32 (!%p195_p2), 288, %s2707_s19  ;;  %p222_p3 = scmp.lt.s32.totalorder (!%p195_p2), %s221_s20, 71 }
   0x9   : > { %p227_p4 = scmp.lt.s32.totalorder (!%p195_p2), %s226_s21, 1151 }
   0xb   : > { %s2931_s20 = smov (!%p222_p3, %s221_s20), 71  ;;  %s2933_s21 = smov (!%p227_p4, %s226_s21), 1151 }
   0xc   : > { %s2716_s24 = scalar_lea.vmem %s2924_s0, %s2931_s20  ;;  %s1840_s25 = sshll.u32 %s2933_s21, 2 }
   0xd   : > { %s2721_s28 = scalar_lea.vmem %s2925_s1, %s1840_s25  ;;  %235 = sbr.rel (%p1841_p5) target bundleno = 20 (0x14), region = 44 }
  0x12   : > { %v2669_v0 = vmov 0.0  }
  0x13   : > { %236 = vst [vmem:[#allocation2] sm:$0x3] %v2669_v0 }
  0x14 PF: > { %v2462_v1 = vld [vmem:[%s2721_s28 + $0x38] sm:$0xff]  ;;  %v2461_v5 = vld [vmem:[%s2721_s28 + $0x30] sm:$0xff]  ;;  %v2460_v9 = vld [vmem:[%s2721_s28 + $0x28] sm:$0xff]  ;;  %p2418_p6 = scmp.ne.s32.totalorder %s2707_s19, 3 }
  0x15   : > { %v2470_v2 = vld [vmem:[%s2721_s28 + $0x78] sm:$0xff]  ;;  %1435 = vmatpush.bf16.msra.mxu0 %v2462_v1  ;;  %v2469_v6 = vld [vmem:[%s2721_s28 + $0x70] sm:$0xff]  ;;  %v2468_v10 = vld [vmem:[%s2721_s28 + $0x68] sm:$0xff] }
  0x16   : > { %v2478_v3 = vld [vmem:[%s2721_s28 + $0xb8] sm:$0xff]  ;;  %1448 = vmatpush.bf16.msra.mxu1 %v2470_v2  ;;  %v2477_v7 = vld [vmem:[%s2721_s28 + $0xb0] sm:$0xff]  ;;  %v2476_v11 = vld [vmem:[%s2721_s28 + $0xa8] sm:$0xff] }
  0x17   : > { %v2486_v4 = vld [vmem:[%s2721_s28 + $0xf8] sm:$0xff]  ;;  %1461 = vmatpush.bf16.msra.mxu2 %v2478_v3  ;;  %v2485_v8 = vld [vmem:[%s2721_s28 + $0xf0] sm:$0xff]  ;;  %v2484_v12 = vld [vmem:[%s2721_s28 + $0xe8] sm:$0xff] }
  0x18   : > { %1474 = vmatpush.bf16.msra.mxu3 %v2486_v4  ;;  %v2459_v13 = vld [vmem:[%s2721_s28 + $0x20] sm:$0xff]  ;;  %v2458_v17 = vld [vmem:[%s2721_s28 + $0x18] sm:$0xff]  ;;  %v2457_v22 = vld [vmem:[%s2721_s28 + $0x10] sm:$0xff] }
  0x19   : > { %1436 = vmatpush.bf16.msra.mxu0 %v2461_v5  ;;  %v2467_v14 = vld [vmem:[%s2721_s28 + $0x60] sm:$0xff]  ;;  %v2466_v18 = vld [vmem:[%s2721_s28 + $0x58] sm:$0xff]  ;;  %v2465_v23 = vld [vmem:[%s2721_s28 + $0x50] sm:$0xff] }
  0x1a   : > { %1449 = vmatpush.bf16.msra.mxu1 %v2469_v6  ;;  %v2475_v15 = vld [vmem:[%s2721_s28 + $0xa0] sm:$0xff]  ;;  %v2474_v19 = vld [vmem:[%s2721_s28 + $0x98] sm:$0xff]  ;;  %v2473_v24 = vld [vmem:[%s2721_s28 + $0x90] sm:$0xff] }
  0x1b   : > { %1462 = vmatpush.bf16.msra.mxu2 %v2477_v7  ;;  %v2483_v16 = vld [vmem:[%s2721_s28 + $0xe0] sm:$0xff]  ;;  %v2482_v20 = vld [vmem:[%s2721_s28 + $0xd8] sm:$0xff]  ;;  %v2481_v25 = vld [vmem:[%s2721_s28 + $0xd0] sm:$0xff] }
  0x1c   : > { %1475 = vmatpush.bf16.msra.mxu3 %v2485_v8  ;;  %v238_v21 = vld [vmem:[%s2716_s24] sm:$0xff]  ;;  %v2456_v26 = vld [vmem:[%s2721_s28 + $0x8] sm:$0xff]  ;;  %v2494_v33 = vld [vmem:[%s2721_s28 + $0x138] sm:$0xff] }
  0x1d   : > { %1437 = vmatpush.bf16.msra.mxu0 %v2460_v9  ;;  %530 = vst [vmem:[#allocation1] ss:$9 sm:$0xff] %v238_v21  ;;  %v2464_v27 = vld [vmem:[%s2721_s28 + $0x48] sm:$0xff]  ;;  %v2455_v30 = vld [vmem:[%s2721_s28] sm:$0xff]  ;;  %v2502_v34 = vld [vmem:[%s2721_s28 + $0x178] sm:$0xff] }
  0x1e   : > { %1450 = vmatpush.bf16.msra.mxu1 %v2468_v10  ;;  %v2472_v28 = vld [vmem:[%s2721_s28 + $0x88] sm:$0xff]  ;;  %v2463_v31 = vld [vmem:[%s2721_s28 + $0x40] sm:$0xff]  ;;  %v2510_v35 = vld [vmem:[%s2721_s28 + $0x1b8] sm:$0xff] }
  0x1f   : > { %1463 = vmatpush.bf16.msra.mxu2 %v2476_v11  ;;  %v2480_v29 = vld [vmem:[%s2721_s28 + $0xc8] sm:$0xff]  ;;  %v2471_v32 = vld [vmem:[%s2721_s28 + $0x80] sm:$0xff]  ;;  %v2518_v37 = vld [vmem:[%s2721_s28 + $0x1f8] sm:$0xff] }
  0x20   : > { %1476 = vmatpush.bf16.msra.mxu3 %v2484_v12  ;;  %v2479_v36 = vld [vmem:[%s2721_s28 + $0xc0] sm:$0xff]  ;;  %v2493_v39 = vld [vmem:[%s2721_s28 + $0x130] sm:$0xff]  ;;  %v2492_v45 = vld [vmem:[%s2721_s28 + $0x128] sm:$0xff] }
  0x21   : > { %1438 = vmatpush.bf16.msra.mxu0 %v2459_v13  ;;  %v2501_v41 = vld [vmem:[%s2721_s28 + $0x170] sm:$0xff]  ;;  %v239_v50 = vld [vmem:[%s2716_s24 + $0x8] sm:$0xff]  ;;  %v2491_v55 = vld [vmem:[%s2721_s28 + $0x120] sm:$0xff] }
  0x22   : > { %1451 = vmatpush.bf16.msra.mxu1 %v2467_v14  ;;  %v2509_v42 = vld [vmem:[%s2721_s28 + $0x1b0] sm:$0xff]  ;;  %v2500_v52 = vld [vmem:[%s2721_s28 + $0x168] sm:$0xff]  ;;  %v2499_v56 = vld [vmem:[%s2721_s28 + $0x160] sm:$0xff] }
  0x23   : > { %1464 = vmatpush.bf16.msra.mxu2 %v2475_v15  ;;  %v2517_v44 = vld [vmem:[%s2721_s28 + $0x1f0] sm:$0xff]  ;;  %v2508_v53 = vld [vmem:[%s2721_s28 + $0x1a8] sm:$0xff]  ;;  %v2507_v57 = vld [vmem:[%s2721_s28 + $0x1a0] sm:$0xff] }
  0x24   : > { %1477 = vmatpush.bf16.msra.mxu3 %v2483_v16  ;;  %v531_v38 = vld [vmem:[#allocation1] sm:$0xff]  ;;  %v533_v40 = vld [vmem:[#allocation1 + $0x12] sm:$0xff]  ;;  %v532_v43 = vld [vmem:[#allocation1 + $0x9] sm:$0xff] }
  0x25   : > { %1439 = vmatpush.bf16.msra.mxu0 %v2458_v17  ;;  %v534_v46 = vld [vmem:[#allocation1 + $0x1b] sm:$0xff]  ;;  %v2768_v48 = vld [vmem:[#allocation1 + $0x24] sm:$0xff]  ;;  %v2773_v51 = vld [vmem:[#allocation1 + $0x2d] sm:$0xff] }
  0x26   : > { %1452 = vmatpush.bf16.msra.mxu1 %v2466_v18  ;;  %v2766_v47 = vld [vmem:[#allocation1 + $0x36] sm:$0xff]  ;;  %v2770_v49 = vld [vmem:[#allocation1 + $0x3f] sm:$0xff]  ;;  %v2516_v54 = vld [vmem:[%s2721_s28 + $0x1e8] sm:$0xff] }
  0x27   : > { %1465 = vmatpush.bf16.msra.mxu2 %v2474_v19  ;;  %540 = vst [vmem:[#allocation1] ss:$9 sm:$0xff] %v239_v50  ;;  %v2515_v58 = vld [vmem:[%s2721_s28 + $0x1e0] sm:$0xff]  ;;  %v2490_v59 = vld [vmem:[%s2721_s28 + $0x118] sm:$0xff]  ;;  %v2489_v63 = vld [vmem:[%s2721_s28 + $0x110] sm:$0xff] }
  0x28   : > { %1478 = vmatpush.bf16.msra.mxu3 %v2482_v20  ;;  %v2498_v60 = vld [vmem:[%s2721_s28 + $0x158] sm:$0xff]  ;;  %v2497_v0 = vld [vmem:[%s2721_s28 + $0x150] sm:$0xff]  ;;  %v2488_v3 = vld [vmem:[%s2721_s28 + $0x108] sm:$0xff] }
  0x29   : > { %1440 = vmatpush.bf16.msra.mxu0 %v2457_v22  ;;  %v2506_v61 = vld [vmem:[%s2721_s28 + $0x198] sm:$0xff]  ;;  %v2505_v1 = vld [vmem:[%s2721_s28 + $0x190] sm:$0xff]  ;;  %v2496_v4 = vld [vmem:[%s2721_s28 + $0x148] sm:$0xff] }
  0x2a   : > { %1453 = vmatpush.bf16.msra.mxu1 %v2465_v23  ;;  %v2514_v62 = vld [vmem:[%s2721_s28 + $0x1d8] sm:$0xff]  ;;  %v2513_v2 = vld [vmem:[%s2721_s28 + $0x1d0] sm:$0xff]  ;;  %v2504_v5 = vld [vmem:[%s2721_s28 + $0x188] sm:$0xff] }
  0x2b   : > { %1466 = vmatpush.bf16.msra.mxu2 %v2473_v24  ;;  %v2512_v6 = vld [vmem:[%s2721_s28 + $0x1c8] sm:$0xff]  ;;  %v2487_v7 = vld [vmem:[%s2721_s28 + $0x100] sm:$0xff]  ;;  %v2526_v10 = vld [vmem:[%s2721_s28 + $0x238] sm:$0xff] }
  0x2c   : > { %1479 = vmatpush.bf16.msra.mxu3 %v2481_v25  ;;  %v2495_v8 = vld [vmem:[%s2721_s28 + $0x140] sm:$0xff]  ;;  %v2534_v11 = vld [vmem:[%s2721_s28 + $0x278] sm:$0xff]  ;;  %v2525_v15 = vld [vmem:[%s2721_s28 + $0x230] sm:$0xff] }
  0x2d   : > { %1441 = vmatpush.bf16.msra.mxu0 %v2456_v26  ;;  %v2503_v9 = vld [vmem:[%s2721_s28 + $0x180] sm:$0xff]  ;;  %v2542_v12 = vld [vmem:[%s2721_s28 + $0x2b8] sm:$0xff]  ;;  %v2533_v16 = vld [vmem:[%s2721_s28 + $0x270] sm:$0xff] }
  0x2e   : > { %1454 = vmatpush.bf16.msra.mxu1 %v2464_v27  ;;  %v2511_v13 = vld [vmem:[%s2721_s28 + $0x1c0] sm:$0xff]  ;;  %v2550_v14 = vld [vmem:[%s2721_s28 + $0x2f8] sm:$0xff]  ;;  %v2541_v17 = vld [vmem:[%s2721_s28 + $0x2b0] sm:$0xff] }
  0x2f   : > { %1467 = vmatpush.bf16.msra.mxu2 %v2472_v28  ;;  %v2549_v18 = vld [vmem:[%s2721_s28 + $0x2f0] sm:$0xff]  ;;  %v2524_v19 = vld [vmem:[%s2721_s28 + $0x228] sm:$0xff]  ;;  %v2523_v23 = vld [vmem:[%s2721_s28 + $0x220] sm:$0xff] }
  0x30   : > { %1480 = vmatpush.bf16.msra.mxu3 %v2480_v29  ;;  %v2532_v20 = vld [vmem:[%s2721_s28 + $0x268] sm:$0xff]  ;;  %v2531_v24 = vld [vmem:[%s2721_s28 + $0x260] sm:$0xff]  ;;  %v2522_v27 = vld [vmem:[%s2721_s28 + $0x218] sm:$0xff] }
  0x31   : > { %1442 = vmatpush.bf16.msra.mxu0 %v2455_v30  ;;  %v2540_v21 = vld [vmem:[%s2721_s28 + $0x2a8] sm:$0xff]  ;;  %v2539_v25 = vld [vmem:[%s2721_s28 + $0x2a0] sm:$0xff]  ;;  %v2530_v28 = vld [vmem:[%s2721_s28 + $0x258] sm:$0xff] }
  0x32   : > { %1455 = vmatpush.bf16.msra.mxu1 %v2463_v31  ;;  %v2548_v22 = vld [vmem:[%s2721_s28 + $0x2e8] sm:$0xff]  ;;  %v2547_v26 = vld [vmem:[%s2721_s28 + $0x2e0] sm:$0xff]  ;;  %v2538_v29 = vld [vmem:[%s2721_s28 + $0x298] sm:$0xff] }
  0x33   : > { %1468 = vmatpush.bf16.msra.mxu2 %v2471_v32  ;;  %v2546_v30 = vld [vmem:[%s2721_s28 + $0x2d8] sm:$0xff]  ;;  %v2521_v31 = vld [vmem:[%s2721_s28 + $0x210] sm:$0xff] }
  0x34   : > { %1481 = vmatpush.bf16.msra.mxu3 %v2479_v36  ;;  %1443 = vmatmul.bf16.vlgmr.msra.gmra.mxu0 %v531_v38  ;;  %v2529_v32 = vld [vmem:[%s2721_s28 + $0x250] sm:$0xff]  ;;  %v2528_v36 = vld [vmem:[%s2721_s28 + $0x248] sm:$0xff] }
  0x35   : > { %1487 = vmatpush.bf16.msrb.mxu0 %v2494_v33  ;;  %1456 = vmatmul.bf16.vlgmr.msra.gmra.mxu1 %v532_v43  ;;  %v2537_v33 = vld [vmem:[%s2721_s28 + $0x290] sm:$0xff]  ;;  %v2544_v38 = vld [vmem:[%s2721_s28 + $0x2c8] sm:$0xff]  ;;  %v2566_v43 = vld [vmem:[%s2721_s28 + $0x378] sm:$0xff] }
  0x36   : > { %1500 = vmatpush.bf16.msrb.mxu1 %v2502_v34  ;;  %1469 = vmatmul.bf16.vlgmr.msra.gmra.mxu2 %v533_v40  ;;  %v2545_v34 = vld [vmem:[%s2721_s28 + $0x2d0] sm:$0xff]  ;;  %v2527_v40 = vld [vmem:[%s2721_s28 + $0x240] sm:$0xff] }
  0x37   : > { %1513 = vmatpush.bf16.msrb.mxu2 %v2510_v35  ;;  %1482 = vmatmul.bf16.vlgmr.msra.gmra.mxu3 %v534_v46  ;;  %v2520_v35 = vld [vmem:[%s2721_s28 + $0x208] sm:$0xff]  ;;  %v541_v46 = vld [vmem:[#allocation1] sm:$0xff] }
  0x38   : > { %1526 = vmatpush.bf16.msrb.mxu3 %v2518_v37  ;;  %v2536_v37 = vld [vmem:[%s2721_s28 + $0x288] sm:$0xff] }
  0x39   : > { %1488 = vmatpush.bf16.msrb.mxu0 %v2493_v39  ;;  %v2519_v39 = vld [vmem:[%s2721_s28 + $0x200] sm:$0xff]  ;;  %v542_v50 = vld [vmem:[#allocation1 + $0x9] sm:$0xff] }
  0x3a   : > { %1501 = vmatpush.bf16.msrb.mxu1 %v2501_v41  ;;  %v2535_v41 = vld [vmem:[%s2721_s28 + $0x280] sm:$0xff] }
  0x3b   : > { %1514 = vmatpush.bf16.msrb.mxu2 %v2509_v42  ;;  %v2558_v42 = vld [vmem:[%s2721_s28 + $0x338] sm:$0xff] }
  0x3c   : > { %1527 = vmatpush.bf16.msrb.mxu3 %v2517_v44  ;;  %v2574_v44 = vld [vmem:[%s2721_s28 + $0x3b8] sm:$0xff] }
  0x3d   : > { %1489 = vmatpush.bf16.msrb.mxu0 %v2492_v45  ;;  %v2543_v45 = vld [vmem:[%s2721_s28 + $0x2c0] sm:$0xff] }
  0x3e   : > { %1502 = vmatpush.bf16.msrb.mxu1 %v2500_v52  ;;  %v544_v52 = vld [vmem:[#allocation1 + $0x1b] sm:$0xff] }
  0x3f   : > { %1515 = vmatpush.bf16.msrb.mxu2 %v2508_v53  ;;  %v2573_v53 = vld [vmem:[%s2721_s28 + $0x3b0] sm:$0xff] }
  0x40   : > { %1528 = vmatpush.bf16.msrb.mxu3 %v2516_v54  ;;  %v2581_v54 = vld [vmem:[%s2721_s28 + $0x3f0] sm:$0xff] }
  0x41   : > { %1490 = vmatpush.bf16.msrb.mxu0 %v2491_v55  ;;  %v2556_v55 = vld [vmem:[%s2721_s28 + $0x328] sm:$0xff] }
  0x42   : > { %1503 = vmatpush.bf16.msrb.mxu1 %v2499_v56  ;;  %v2564_v56 = vld [vmem:[%s2721_s28 + $0x368] sm:$0xff] }
  0x43   : > { %1516 = vmatpush.bf16.msrb.mxu2 %v2507_v57  ;;  %v2572_v57 = vld [vmem:[%s2721_s28 + $0x3a8] sm:$0xff] }
  0x44   : > { %1529 = vmatpush.bf16.msrb.mxu3 %v2515_v58  ;;  %v2580_v58 = vld [vmem:[%s2721_s28 + $0x3e8] sm:$0xff] }
  0x45   : > { %1491 = vmatpush.bf16.msrb.mxu0 %v2490_v59  ;;  %v2555_v59 = vld [vmem:[%s2721_s28 + $0x320] sm:$0xff] }
  0x46   : > { %1504 = vmatpush.bf16.msrb.mxu1 %v2498_v60  ;;  %v2563_v60 = vld [vmem:[%s2721_s28 + $0x360] sm:$0xff] }
  0x47   : > { %1517 = vmatpush.bf16.msrb.mxu2 %v2506_v61  ;;  %v2571_v61 = vld [vmem:[%s2721_s28 + $0x3a0] sm:$0xff] }
  0x48   : > { %1530 = vmatpush.bf16.msrb.mxu3 %v2514_v62  ;;  %v2579_v62 = vld [vmem:[%s2721_s28 + $0x3e0] sm:$0xff] }
  0x49   : > { %1492 = vmatpush.bf16.msrb.mxu0 %v2489_v63  ;;  %v2554_v63 = vld [vmem:[%s2721_s28 + $0x318] sm:$0xff] }
  0x4a   : > { %1505 = vmatpush.bf16.msrb.mxu1 %v2497_v0  ;;  %v2562_v0 = vld [vmem:[%s2721_s28 + $0x358] sm:$0xff] }
  0x4b   : > { %1518 = vmatpush.bf16.msrb.mxu2 %v2505_v1  ;;  %v2570_v1 = vld [vmem:[%s2721_s28 + $0x398] sm:$0xff] }
  0x4c   : > { %1531 = vmatpush.bf16.msrb.mxu3 %v2513_v2  ;;  %v2578_v2 = vld [vmem:[%s2721_s28 + $0x3d8] sm:$0xff] }
  0x4d   : > { %1493 = vmatpush.bf16.msrb.mxu0 %v2488_v3  ;;  %v2553_v3 = vld [vmem:[%s2721_s28 + $0x310] sm:$0xff] }
  0x4e   : > { %1506 = vmatpush.bf16.msrb.mxu1 %v2496_v4  ;;  %v2561_v4 = vld [vmem:[%s2721_s28 + $0x350] sm:$0xff] }
  0x4f   : > { %1519 = vmatpush.bf16.msrb.mxu2 %v2504_v5  ;;  %v2569_v5 = vld [vmem:[%s2721_s28 + $0x390] sm:$0xff] }
  0x50   : > { %1532 = vmatpush.bf16.msrb.mxu3 %v2512_v6  ;;  %v2577_v6 = vld [vmem:[%s2721_s28 + $0x3d0] sm:$0xff] }
  0x51   : > { %1494 = vmatpush.bf16.msrb.mxu0 %v2487_v7  ;;  %v2552_v7 = vld [vmem:[%s2721_s28 + $0x308] sm:$0xff] }
  0x52   : > { %1507 = vmatpush.bf16.msrb.mxu1 %v2495_v8  ;;  %v2560_v8 = vld [vmem:[%s2721_s28 + $0x348] sm:$0xff] }
  0x53   : > { %1520 = vmatpush.bf16.msrb.mxu2 %v2503_v9  ;;  %v545_v9 = vld [vmem:[#allocation1 + $0x24] sm:$0xff] }
  0x54   : > { %1533 = vmatpush.bf16.msrb.mxu3 %v2511_v13  ;;  %1495 = vmatmul.bf16.vlgmr.msrb.gmra.mxu0 %v2768_v48  ;;  %v543_v48 = vld [vmem:[#allocation1 + $0x12] sm:$0xff]  ;;  %v240_v13 = vld [vmem:[%s2716_s24 + $0x10] sm:$0x3] }
  0x55   : > { %1539 = vmatpush.bf16.msra.mxu0 %v2526_v10  ;;  %1508 = vmatmul.bf16.vlgmr.msrb.gmra.mxu1 %v2773_v51  ;;  %v2565_v51 = vld [vmem:[%s2721_s28 + $0x370] sm:$0xff] }
  0x56   : > { %1552 = vmatpush.bf16.msra.mxu1 %v2534_v11  ;;  %1521 = vmatmul.bf16.vlgmr.msrb.gmra.mxu2 %v2766_v47  ;;  %v2582_v47 = vld [vmem:[%s2721_s28 + $0x3f8] sm:$0xff]  ;;  %v546_v11 = vld [vmem:[#allocation1 + $0x2d] sm:$0xff] }
  0x57   : > { %1565 = vmatpush.bf16.msra.mxu2 %v2542_v12  ;;  %1534 = vmatmul.bf16.vlgmr.msrb.gmra.mxu3 %v2770_v49  ;;  %v2557_v49 = vld [vmem:[%s2721_s28 + $0x330] sm:$0xff]  ;;  %v548_v12 = vld [vmem:[#allocation1 + $0x3f] sm:$0xff] }
  0x58   : > { %1578 = vmatpush.bf16.msra.mxu3 %v2550_v14  ;;  %v547_v10 = vld [vmem:[#allocation1 + $0x36] sm:$0xff]  ;;  %v2568_v14 = vld [vmem:[%s2721_s28 + $0x388] sm:$0xff] }
  0x59   : > { %1540 = vmatpush.bf16.msra.mxu0 %v2525_v15  ;;  %550 = vst [vmem:[#allocation1] ss:$9 sm:$0xff] %v240_v13  ;;  %v2576_v15 = vld [vmem:[%s2721_s28 + $0x3c8] sm:$0xff] }
  0x5a   : > { %1553 = vmatpush.bf16.msra.mxu1 %v2533_v16  ;;  %v2551_v16 = vld [vmem:[%s2721_s28 + $0x300] sm:$0xff] }
  0x5b   : > { %1566 = vmatpush.bf16.msra.mxu2 %v2541_v17  ;;  %v2559_v17 = vld [vmem:[%s2721_s28 + $0x340] sm:$0xff] }
  0x5c   : > { %1579 = vmatpush.bf16.msra.mxu3 %v2549_v18  ;;  %v2590_v18 = vld [vmem:[%s2721_s28 + $0x438] sm:$0xff] }
  0x5d   : > { %1541 = vmatpush.bf16.msra.mxu0 %v2524_v19  ;;  %v2567_v19 = vld [vmem:[%s2721_s28 + $0x380] sm:$0xff] }
  0x5e   : > { %1554 = vmatpush.bf16.msra.mxu1 %v2532_v20  ;;  %v2598_v20 = vld [vmem:[%s2721_s28 + $0x478] sm:$0xff] }
  0x5f   : > { %1567 = vmatpush.bf16.msra.mxu2 %v2540_v21  ;;  %v2575_v21 = vld [vmem:[%s2721_s28 + $0x3c0] sm:$0xff] }
  0x60   : > { %1580 = vmatpush.bf16.msra.mxu3 %v2548_v22  ;;  %v2589_v22 = vld [vmem:[%s2721_s28 + $0x430] sm:$0xff] }
  0x61   : > { %1542 = vmatpush.bf16.msra.mxu0 %v2523_v23  ;;  %v2597_v23 = vld [vmem:[%s2721_s28 + $0x470] sm:$0xff] }
  0x62   : > { %1555 = vmatpush.bf16.msra.mxu1 %v2531_v24  ;;  %v2588_v24 = vld [vmem:[%s2721_s28 + $0x428] sm:$0xff] }
  0x63   : > { %1568 = vmatpush.bf16.msra.mxu2 %v2539_v25  ;;  %v2596_v25 = vld [vmem:[%s2721_s28 + $0x468] sm:$0xff] }
  0x64   : > { %1581 = vmatpush.bf16.msra.mxu3 %v2547_v26  ;;  %v2587_v26 = vld [vmem:[%s2721_s28 + $0x420] sm:$0xff] }
  0x65   : > { %1543 = vmatpush.bf16.msra.mxu0 %v2522_v27  ;;  %v2595_v27 = vld [vmem:[%s2721_s28 + $0x460] sm:$0xff] }
  0x66   : > { %1556 = vmatpush.bf16.msra.mxu1 %v2530_v28  ;;  %v2586_v28 = vld [vmem:[%s2721_s28 + $0x418] sm:$0xff] }
  0x67   : > { %1569 = vmatpush.bf16.msra.mxu2 %v2538_v29  ;;  %v2594_v29 = vld [vmem:[%s2721_s28 + $0x458] sm:$0xff] }
  0x68   : > { %1582 = vmatpush.bf16.msra.mxu3 %v2546_v30  ;;  %v2585_v30 = vld [vmem:[%s2721_s28 + $0x410] sm:$0xff] }
  0x69   : > { %1544 = vmatpush.bf16.msra.mxu0 %v2521_v31  ;;  %v2593_v31 = vld [vmem:[%s2721_s28 + $0x450] sm:$0xff] }
  0x6a   : > { %1557 = vmatpush.bf16.msra.mxu1 %v2529_v32  ;;  %v2584_v32 = vld [vmem:[%s2721_s28 + $0x408] sm:$0xff] }
  0x6b   : > { %1570 = vmatpush.bf16.msra.mxu2 %v2537_v33  ;;  %v2592_v33 = vld [vmem:[%s2721_s28 + $0x448] sm:$0xff] }
  0x6c   : > { %1583 = vmatpush.bf16.msra.mxu3 %v2545_v34  ;;  %v2583_v34 = vld [vmem:[%s2721_s28 + $0x400] sm:$0xff] }
  0x6d   : > { %1545 = vmatpush.bf16.msra.mxu0 %v2520_v35  ;;  %v2591_v35 = vld [vmem:[%s2721_s28 + $0x440] sm:$0xff] }
  0x6e   : > { %1558 = vmatpush.bf16.msra.mxu1 %v2528_v36  ;;  %v551_v36 = vld [vmem:[#allocation1] sm:$0xff] }
  0x6f   : > { %1571 = vmatpush.bf16.msra.mxu2 %v2536_v37  ;;  %v552_v37 = vld [vmem:[#allocation1 + $0x9] sm:$0xff] }
  0x70   : > { %1584 = vmatpush.bf16.msra.mxu3 %v2544_v38 }
  0x71   : > { %1546 = vmatpush.bf16.msra.mxu0 %v2519_v39 }
  0x72   : > { %1559 = vmatpush.bf16.msra.mxu1 %v2527_v40 }
  0x73   : > { %1572 = vmatpush.bf16.msra.mxu2 %v2535_v41 }
  0x74   : > { %1585 = vmatpush.bf16.msra.mxu3 %v2543_v45  ;;  %1547 = vmatmul.bf16.vlgmr.msra.gmra.mxu0 %v541_v46 }
  0x75   : > { %1591 = vmatpush.bf16.msrb.mxu0 %v2558_v42  ;;  %1560 = vmatmul.bf16.vlgmr.msra.gmra.mxu1 %v542_v50 }
  0x76   : > { %1604 = vmatpush.bf16.msrb.mxu1 %v2566_v43  ;;  %1573 = vmatmul.bf16.vlgmr.msra.gmra.mxu2 %v543_v48 }
  0x77   : > { %1617 = vmatpush.bf16.msrb.mxu2 %v2574_v44  ;;  %1586 = vmatmul.bf16.vlgmr.msra.gmra.mxu3 %v544_v52 }
  0x78   : > { %1630 = vmatpush.bf16.msrb.mxu3 %v2582_v47 }
  0x79   : > { %1592 = vmatpush.bf16.msrb.mxu0 %v2557_v49 }
  0x7a   : > { %1605 = vmatpush.bf16.msrb.mxu1 %v2565_v51 }
  0x7b   : > { %1618 = vmatpush.bf16.msrb.mxu2 %v2573_v53 }
  0x7c   : > { %1631 = vmatpush.bf16.msrb.mxu3 %v2581_v54 }
  0x7d   : > { %1593 = vmatpush.bf16.msrb.mxu0 %v2556_v55 }
  0x7e   : > { %1606 = vmatpush.bf16.msrb.mxu1 %v2564_v56 }
  0x7f   : > { %1619 = vmatpush.bf16.msrb.mxu2 %v2572_v57 }
  0x80   : > { %1632 = vmatpush.bf16.msrb.mxu3 %v2580_v58 }
  0x81   : > { %1594 = vmatpush.bf16.msrb.mxu0 %v2555_v59 }
  0x82   : > { %1607 = vmatpush.bf16.msrb.mxu1 %v2563_v60 }
  0x83   : > { %1620 = vmatpush.bf16.msrb.mxu2 %v2571_v61 }
  0x84   : > { %1633 = vmatpush.bf16.msrb.mxu3 %v2579_v62 }
  0x85   : > { %1595 = vmatpush.bf16.msrb.mxu0 %v2554_v63 }
  0x86   : > { %1608 = vmatpush.bf16.msrb.mxu1 %v2562_v0 }
  0x87   : > { %1621 = vmatpush.bf16.msrb.mxu2 %v2570_v1 }
  0x88   : > { %1634 = vmatpush.bf16.msrb.mxu3 %v2578_v2 }
  0x89   : > { %1596 = vmatpush.bf16.msrb.mxu0 %v2553_v3 }
  0x8a   : > { %1609 = vmatpush.bf16.msrb.mxu1 %v2561_v4 }
  0x8b   : > { %1622 = vmatpush.bf16.msrb.mxu2 %v2569_v5 }
  0x8c   : > { %1635 = vmatpush.bf16.msrb.mxu3 %v2577_v6 }
  0x8d   : > { %1597 = vmatpush.bf16.msrb.mxu0 %v2552_v7 }
  0x8e   : > { %1610 = vmatpush.bf16.msrb.mxu1 %v2560_v8 }
  0x8f   : > { %1623 = vmatpush.bf16.msrb.mxu2 %v2568_v14 }
  0x90   : > { %1636 = vmatpush.bf16.msrb.mxu3 %v2576_v15 }
  0x91   : > { %1598 = vmatpush.bf16.msrb.mxu0 %v2551_v16 }
  0x92   : > { %1611 = vmatpush.bf16.msrb.mxu1 %v2559_v17 }
  0x93   : > { %1624 = vmatpush.bf16.msrb.mxu2 %v2567_v19 }
  0x94   : > { %1637 = vmatpush.bf16.msrb.mxu3 %v2575_v21  ;;  %1599 = vmatmul.bf16.vlgmr.msrb.gmra.mxu0 %v545_v9 }
  0x95   : > { %1643 = vmatpush.bf16.msra.mxu0 %v2590_v18  ;;  %1612 = vmatmul.bf16.vlgmr.msrb.gmra.mxu1 %v546_v11 }
  0x96   : > { %1656 = vmatpush.bf16.msra.mxu1 %v2598_v20  ;;  %1625 = vmatmul.bf16.vlgmr.msrb.gmra.mxu2 %v547_v10 }
  0x97   : > { %1638 = vmatmul.bf16.vlgmr.msrb.gmra.mxu3 %v548_v12 }
  0x99   : > { %1644 = vmatpush.bf16.msra.mxu0 %v2589_v22 }
  0x9a   : > { %1657 = vmatpush.bf16.msra.mxu1 %v2597_v23 }
  0x9d   : > { %1645 = vmatpush.bf16.msra.mxu0 %v2588_v24  ;;  %v237_v24 = vld [vmem:[#allocation2] sm:$0x3] }
  0x9e   : > { %1658 = vmatpush.bf16.msra.mxu1 %v2596_v25 }
  0xa1   : > { %1646 = vmatpush.bf16.msra.mxu0 %v2587_v26 }
  0xa2   : > { %1659 = vmatpush.bf16.msra.mxu1 %v2595_v27 }
  0xa5   : > { %1647 = vmatpush.bf16.msra.mxu0 %v2586_v28 }
  0xa6   : > { %1660 = vmatpush.bf16.msra.mxu1 %v2594_v29 }
  0xa9   : > { %1648 = vmatpush.bf16.msra.mxu0 %v2585_v30 }
  0xaa   : > { %1661 = vmatpush.bf16.msra.mxu1 %v2593_v31 }
  0xad   : > { %1649 = vmatpush.bf16.msra.mxu0 %v2584_v32 }
  0xae   : > { %1662 = vmatpush.bf16.msra.mxu1 %v2592_v33 }
  0xb1   : > { %1650 = vmatpush.bf16.msra.mxu0 %v2583_v34  ;;  %v1444_v38 = vpop.f32.mrf.mxu0 }
  0xb2   : > { %1663 = vmatpush.bf16.msra.mxu1 %v2591_v35  ;;  %v1457_v39 = vpop.f32.mrf.mxu1 }
  0xb3   : > { %v1458_v40 = vadd.f32 %v1457_v39, %v1444_v38 }
  0xb4   : > { %1651 = vmatmul.bf16.vlgmr.msra.gmra.mxu0 %v551_v36 }
  0xb5   : > { %1664 = vmatmul.bf16.vlgmr.msra.gmra.mxu1 %v552_v37 }
  0xb9   : > { %v1470_v41 = vpop.f32.mrf.mxu2  ;;  %v1446_v43 = vpop.f32.mrf.mxu0 }
  0xba   : > { %v1471_v42 = vadd.f32 %v1470_v41, %v1458_v40  ;;  %v1483_v44 = vpop.f32.mrf.mxu3  ;;  %v1459_v45 = vpop.f32.mrf.mxu1 }
  0xbc   : > { %v1484_v46 = vadd.f32 %v1483_v44, %v1471_v42 }
  0xc1   : > { %v1472_v47 = vpop.f32.mrf.mxu2 }
  0xc2   : > { %v1485_v48 = vpop.f32.mrf.mxu3 }
  0xd1   : > { %v1496_v49 = vpop.f32.mrf.mxu0 }
  0xd2   : > { %v1509_v50 = vpop.f32.mrf.mxu1  ;;  %v1497_v1 = vadd.f32 %v1496_v49, %v1484_v46 }
  0xd4   : > { %v1510_v2 = vadd.f32 %v1509_v50, %v1497_v1 }
  0xd9   : > { %v1522_v51 = vpop.f32.mrf.mxu2  ;;  %v1498_v53 = vpop.f32.mrf.mxu0 }
  0xda   : > { %v1535_v52 = vpop.f32.mrf.mxu3  ;;  %v1511_v54 = vpop.f32.mrf.mxu1  ;;  %v1523_v3 = vadd.f32 %v1522_v51, %v1510_v2 }
  0xdc   : > { %v1536_v6 = vadd.f32 %v1535_v52, %v1523_v3 }
  0xe1   : > { %v1524_v55 = vpop.f32.mrf.mxu2 }
  0xe2   : > { %v1537_v56 = vpop.f32.mrf.mxu3 }
  0xf1   : > { %v1548_v57 = vpop.f32.mrf.mxu0 }
  0xf2   : > { %v1561_v58 = vpop.f32.mrf.mxu1  ;;  %v1549_v7 = vadd.f32 %v1548_v57, %v1536_v6 }
  0xf4   : > { %v1562_v12 = vadd.f32 %v1561_v58, %v1549_v7 }
  0xf9   : > { %v1574_v59 = vpop.f32.mrf.mxu2  ;;  %v1550_v60 = vpop.f32.mrf.mxu0 }
  0xfa   : > { %v1587_v61 = vpop.f32.mrf.mxu3  ;;  %v1563_v62 = vpop.f32.mrf.mxu1  ;;  %v1575_v13 = vadd.f32 %v1574_v59, %v1562_v12 }
  0xfc   : > { %v1588_v14 = vadd.f32 %v1587_v61, %v1575_v13 }
 0x101   : > { %v1576_v63 = vpop.f32.mrf.mxu2 }
 0x102   : > { %v1589_v0 = vpop.f32.mrf.mxu3 }
 0x111   : > { %v1600_v4 = vpop.f32.mrf.mxu0 }
 0x112   : > { %v1613_v5 = vpop.f32.mrf.mxu1  ;;  %v1601_v17 = vadd.f32 %v1600_v4, %v1588_v14 }
 0x114   : > { %v1614_v18 = vadd.f32 %v1613_v5, %v1601_v17 }
 0x119   : > { %v1626_v8 = vpop.f32.mrf.mxu2  ;;  %v1602_v9 = vpop.f32.mrf.mxu0 }
 0x11a   : > { %v1639_v10 = vpop.f32.mrf.mxu3  ;;  %v1615_v11 = vpop.f32.mrf.mxu1  ;;  %v1627_v19 = vadd.f32 %v1626_v8, %v1614_v18 }
 0x11c   : > { %v1640_v20 = vadd.f32 %v1639_v10, %v1627_v19 }
 0x121   : > { %v1628_v15 = vpop.f32.mrf.mxu2 }
 0x122   : > { %v1641_v16 = vpop.f32.mrf.mxu3 }
 0x131   : > { %v1652_v21 = vpop.f32.mrf.mxu0 }
 0x132   : > { %v1653_v22 = vadd.f32 %v1652_v21, %v1640_v20  ;;  %v1665_v23 = vpop.f32.mrf.mxu1 }
 0x134   : > { %v1666_v25 = vadd.f32 %v1665_v23, %v1653_v22 }
 0x136   : > { %v1669_v26 = vadd.f32 %v1666_v25, %v237_v24  ;;  %1674 = sbr.rel (%p2418_p6) target bundleno = 734 (0x2de), region = 48 }
 0x138   : > { %1670 = vst [vmem:[#allocation2] sm:$0x3] %v1669_v26 }
 0x139   : > { %v1654_v27 = vpop.f32.mrf.mxu0 }
 0x13a   : > { %v1667_v28 = vpop.f32.mrf.mxu1 }
 0x13b   : > { %v2606_v29 = vld [vmem:[%s2927_s3 + $0x38] sm:$0xff]  ;;  %v2605_v30 = vld [vmem:[%s2927_s3 + $0x30] sm:$0xff]  ;;  %v2604_v31 = vld [vmem:[%s2927_s3 + $0x28] sm:$0xff]  ;;  %vm1764_vm0 = vcmask 74752  }
 0x13c   : > { %1751 = vmatpush.bf16.msra.mxu0 %v2606_v29  ;;  %v2603_v32 = vld [vmem:[%s2927_s3 + $0x20] sm:$0xff]  ;;  %v2602_v33 = vld [vmem:[%s2927_s3 + $0x18] sm:$0xff]  ;;  %v2601_v35 = vld [vmem:[%s2927_s3 + $0x10] sm:$0xff] }
 0x13d   : > { %v2623_v34 = vld [vmem:[%s2926_s2] ss:$0 sm:$0xff]  ;;  %v2600_v38 = vld [vmem:[%s2927_s3 + $0x8] sm:$0xff] }
 0x13e   : > { %v2599_v40 = vld [vmem:[%s2927_s3] sm:$0xff] }
 0x13f   : > { %v1675_v36 = vld [vmem:[#allocation2] sm:$0x3]  ;;  %v2624_v42 = vld [vmem:[%s2928_s4] ss:$0 sm:$0xff] }
 0x140   : > { %1752 = vmatpush.bf16.msra.mxu0 %v2605_v30  ;;  %v1680_v37 = vadd.f32 %v2623_v34, %v1675_v36 }
 0x142   : > { %v1681_v39 = vmax.f32 %v1680_v37, 0.0 }
 0x144   : > { %1753 = vmatpush.bf16.msra.mxu0 %v2604_v31  ;;  %v1682_v41 = vpack.c.bf16 %v1681_v39, %v1681_v39 }
 0x148   : > { %1754 = vmatpush.bf16.msra.mxu0 %v2603_v32 }
 0x14c   : > { %1755 = vmatpush.bf16.msra.mxu0 %v2602_v33 }
 0x150   : > { %1756 = vmatpush.bf16.msra.mxu0 %v2601_v35 }
 0x154   : > { %1757 = vmatpush.bf16.msra.mxu0 %v2600_v38 }
 0x158   : > { %1758 = vmatpush.bf16.msra.mxu0 %v2599_v40 }
 0x15b   : > { %1759 = vmatmul.bf16.vlgmr.msra.gmra.mxu0 %v1682_v41 }
 0x1d8   : > { %v1760_v43 = vpop.f32.mrf.mxu0 }
 0x1d9   : > { %v1761_v44 = vadd.f32 %v2624_v42, %v1760_v43 }
 0x1db   : > { %v1765_v45 = vsel %vm1764_vm0, %v1761_v44, -inf }
 0x1dc   : > { %1766 = vmax.xlane.f32.xlu0 %v1765_v45 }
 0x1e0   : > { %v1762_v46 = vpop.f32.mrf.mxu0 }
 0x24f   : > { %v1767_v47 = vpop.xlane.xlu0 %1766 }
 0x250   : > { %v1768_v48 = vsub.f32 %v1761_v44, %v1767_v47 }
 0x252   : > { %v1769_v49 = vmul.f32 1.442695, %v1768_v48 }
 0x254   : > { %2625 = vpow2.f32 %v1769_v49 }
 0x25a   : > { %v2626_v50 = vpop.eup %2625 }
 0x25b   : > { %v1771_v51 = vsel %vm1764_vm0, %v2626_v50, 0.0 }
 0x25c   : > { %1772 = vadd.xlane.f32.xlu0 %v1771_v51 }
 0x2cf   : > { %v1773_v52 = vpop.xlane.xlu0 %1772 }
 0x2d0   : > { %2627 = vlog2.f32 %v1773_v52 }
 0x2d6   : > { %v2628_v53 = vpop.eup %2627 }
 0x2d7   : > { %v1775_v54 = vmul.f32 0.6931472, %v2628_v53 }
 0x2d9   : > { %v1776_v55 = vadd.f32 %v1775_v54, %v1767_v47 }
 0x2db   : > { %v1777_v56 = vsub.f32 %v1761_v44, %v1776_v55 }
 0x2dd   : > { %1778 = vst.msk [vmem:[#allocation3] sm:$0x3] %vm1764_vm0, %v1777_v56 }
 0x2de PF: > { %p2611_p7 = scmp.eq.s32.totalorder %s2707_s19, 3  ;;  %s2670_s26 = smov [#allocation3]  }
 0x2df   : > { %s1785_s27 = sshll.u32 %s2670_s26, 4  ;;  %s1787_s30 = sshll.u32 %s2929_s5, 4  ;;  %s1786_s27 = int_to_ptr.vmem [resolvable:$true] %s1785_s27  ;;  %s1788_s30 = int_to_ptr.hbm [resolvable:$true] %s1787_s30 }
 0x2e0   : > { %2608 = dma.vmem_to_hbm [thread:$0]  (%p2611_p7), %s1786_s27, 32, %s1788_s30, [#allocation4]  }
 0x2e1   : > { %2662 = dma.done.wait (%p2611_p7), [#allocation4], 32  }
 0x2e2   : > { %2664 = vsyncadd (%p2611_p7), [#allocation4], 4294967264 }
 0x2e3 PF: > { %s16_s18 = sadd.s32 1, %s2667_s18  }
 0x2e4   : > { %p13_p8 = scmp.ge.s32.totalorder %s16_s18, 6  }
 0x2e6   :  { %15 = sbr.rel (!%p13_p8) target bundleno = 1 (0x1), region = 78 }
 0x2eb   :  { %1801 = vsyncpa [#allocation4], 1 }
 0x2ec   :  { %1803 = vsyncpa [#allocation4 + $0x1], 1 }

</bundles_post_ra>
